<compile_context>
chip_gen: v5e
topology: v5e:2x2
jax: 0.10.0
libtpu: 0.0.40
codegen_flags: <defaults>
</compile_context>

<pallas_src>
import functools

import jax
import jax.numpy as jnp
from jax.experimental import pallas as pl
from jax.experimental.pallas import tpu as pltpu


_NPAD = 128      # fc5 output padded to a full lane group (lane-dense store)
_R2 = 89         # conv2 rows in the flattened 10-wide grid (valid: 9x9)
_R3 = 67         # conv3 rows in the flattened 10-wide grid (valid: 7x7)


# ---------------------------------------------------------------------------
# Pallas GEMM kernel (used for the conv1 im2col): y = relu(x @ w + b).
# bf16 operands, f32 MXU accumulation, fused bias + ReLU, bf16 output.
# ---------------------------------------------------------------------------
def _gemm_bias_relu_kernel(x_ref, w_ref, b_ref, o_ref):
    acc = jnp.dot(x_ref[...], w_ref[...], preferred_element_type=jnp.float32)
    o_ref[...] = jnp.maximum(acc + b_ref[...], 0.0).astype(o_ref.dtype)


def _pick_tile_m(m, k, n, itemsize=2):
    """One block when the double-buffered footprint is small (the launch-bound
    regime at inference batch sizes); otherwise tile M with a cap that stays
    well inside v7x's ~32 MiB default scoped VMEM (v5e/v6e have more)."""
    footprint = 2 * (m * k + k * n + m * n) * itemsize
    if footprint <= (4 << 20):
        return m
    if m % 8 != 0:
        # TODO(synk): very large non-8-multiple M would need padding to tile.
        return m
    for t in (1024, 512, 256, 128, 64, 32, 16, 8):
        if t < m and m % t == 0:
            return t
    return m


def pallas_linear_relu(x, w, b2d, *, out_dtype):
    m, k = x.shape
    kw_, n = w.shape
    assert k == kw_ and b2d.shape == (1, n)
    tm = _pick_tile_m(m, k, n)
    return pl.pallas_call(
        _gemm_bias_relu_kernel,
        out_shape=jax.ShapeDtypeStruct((m, n), out_dtype),
        grid=(m // tm,),
        in_specs=[
            pl.BlockSpec((tm, k), lambda i: (i, 0)),
            pl.BlockSpec((k, n), lambda i: (0, 0)),
            pl.BlockSpec((1, n), lambda i: (0, 0)),
        ],
        out_specs=pl.BlockSpec((tm, n), lambda i: (i, 0)),
        compiler_params=pltpu.CompilerParams(
            dimension_semantics=("parallel",)),
    )(x, w, b2d)


# ---------------------------------------------------------------------------
# conv1 (8x8, stride 4) + ReLU via im2col + Pallas GEMM, returning the output
# in a space-to-depth layout: (B, 100, 128), where row 10*i + j is the 2x2
# conv1-output block at rows 2i..2i+1 / cols 2j..2j+1 and the 128 channels are
# ordered (dy, dx, cout).  In this layout conv2 (4x4, stride 2) is a 2x2
# stride-1 convolution.
# ---------------------------------------------------------------------------
def conv1_space_to_depth(frames_nchw, w1, b1, compute_dtype=jnp.bfloat16):
    # TODO(synk): the im2col itself is plain-JAX layout glue; conv1 could also
    # be folded into a kernel, but the review allows im2col+GEMM for conv1.
    bsz = frames_nchw.shape[0]
    x = jnp.transpose(frames_nchw, (0, 2, 3, 1)).astype(compute_dtype)  # NHWC
    c = x.shape[-1]
    cols = []
    for ky in range(8):
        for kx in range(8):
            cols.append(x[:, ky:ky + 80:4, kx:kx + 80:4, :])     # (B,20,20,C)
    patches = jnp.stack(cols, axis=3)                            # (B,20,20,64,C)
    # Reorder rows to (b, i, j, dy, dx) with (oy, ox) = (2i+dy, 2j+dx).
    patches = patches.reshape(bsz, 10, 2, 10, 2, 64 * c)
    patches = patches.transpose(0, 1, 3, 2, 4, 5)
    patches = patches.reshape(bsz * 400, 64 * c)                 # (B*400, 256)
    y = pallas_linear_relu(patches, w1, b1, out_dtype=compute_dtype)
    return y.reshape(bsz, 100, 4 * w1.shape[1])                  # (B, 100, 128)


# ---------------------------------------------------------------------------
# Fused kernel: conv2 + conv3 + attention MLP + softmax(49) + weighted
# aggregation + fc4(+ReLU) + fc5, one grid step per batch element.
# ---------------------------------------------------------------------------
def _daqn_fused_kernel(y1_ref, g_ref, w2_ref, b2_ref, w3_ref, b3_ref,
                       wa1f_ref, wa1g_ref, ba1_ref, wa2_ref, sb_ref,
                       w4_ref, b4_ref, w5f_ref, w5g_ref, b5_ref,
                       out_ref, y2_scr):
    # y1_ref: (1, 100, 128) bf16  — conv1 output, space-to-depth layout.
    # g_ref : (1, 1, 8)     f32   — goal vector.
    g = g_ref[0]                                        # (1, 8)
    gb = g.astype(jnp.bfloat16)

    # ---- conv2: 4x4/stride-2 == 2x2/stride-1 on the space-to-depth layout.
    # acc2 row r = 10p + q holds output pixel (p, q); rows with q == 9 are
    # finite wrap-around junk that never feeds a valid conv3 output.
    acc2 = jnp.zeros((_R2, 64), jnp.float32)
    for bi in range(2):
        for bj in range(2):
            s = 10 * bi + bj
            acc2 = acc2 + jnp.dot(y1_ref[0, s:s + _R2, :], w2_ref[bi, bj],
                                  preferred_element_type=jnp.float32)
    y2_scr[...] = jnp.maximum(acc2 + b2_ref[...], 0.0).astype(y2_scr.dtype)

    # ---- conv3: 3x3/stride-1 in the same flattened 10-wide coordinates.
    acc3 = jnp.zeros((_R3, 64), jnp.float32)
    for ki in range(3):
        for kj in range(3):
            s = 10 * ki + kj
            acc3 = acc3 + jnp.dot(y2_scr[s:s + _R3, :], w3_ref[ki, kj],
                                  preferred_element_type=jnp.float32)
    f = jnp.maximum(acc3 + b3_ref[...], 0.0)            # (67, 64) f32
    fb = f.astype(jnp.bfloat16)

    # ---- attention MLP: Linear(72,128)+ReLU, concat as split matmuls.
    hid = jnp.dot(fb, wa1f_ref[...], preferred_element_type=jnp.float32)
    hid = hid + jnp.dot(gb, wa1g_ref[...], preferred_element_type=jnp.float32)
    hid = jnp.maximum(hid + ba1_ref[...], 0.0)          # (67, 128)

    # Linear(128,1) as a VPU multiply + lane reduction (no N=1 MXU matmul).
    # sb adds the att2 bias plus -1e30 on junk rows (masked out of softmax).
    scores = jnp.sum(hid * wa2_ref[...], axis=1, keepdims=True) + sb_ref[...]

    # ---- softmax over the 49 valid regions + attention-weighted aggregation.
    m = jnp.max(scores, axis=0, keepdims=True)
    e = jnp.exp(scores - m)                             # junk rows -> exactly 0
    attn = e * pl.reciprocal(jnp.sum(e, axis=0, keepdims=True), approx=True)
    agg = jnp.sum(f * attn, axis=0, keepdims=True)      # (1, 64) f32

    # ---- fc4 + ReLU, then fc5 on concat([h, goal]) as split matmuls.
    h = jnp.dot(agg.astype(jnp.bfloat16), w4_ref[...],
                preferred_element_type=jnp.float32)
    h = jnp.maximum(h + b4_ref[...], 0.0)               # (1, 512)
    out = jnp.dot(h.astype(jnp.bfloat16), w5f_ref[...],
                  preferred_element_type=jnp.float32)
    out = out + jnp.dot(gb, w5g_ref[...], preferred_element_type=jnp.float32)
    out_ref[0] = (out + b5_ref[...]).astype(out_ref.dtype)   # (1, 128) lane-dense


@functools.partial(jax.jit, static_argnames=("num_actions",))
def daqn_forward(kp, frames_nchw, goals, *, num_actions=18):
    bsz = frames_nchw.shape[0]
    y1 = conv1_space_to_depth(frames_nchw, kp["w1"], kp["b1"])  # (B,100,128) bf16
    goals3 = goals.reshape(bsz, 1, -1).astype(jnp.float32)
    gdim = goals3.shape[-1]

    def full(shape):
        return pl.BlockSpec(shape, lambda b: (0,) * len(shape))

    # TODO(synk): for large training batches, pack TB>1 batch elements per grid
    # step to raise the head matmuls' M; at inference B the per-batch grid
    # keeps both v7x TensorCores busy (2 parallel steps at B=2).
    out = pl.pallas_call(
        _daqn_fused_kernel,
        out_shape=jax.ShapeDtypeStruct((bsz, 1, _NPAD), jnp.float32),
        grid=(bsz,),
        in_specs=[
            pl.BlockSpec((1, 100, 128), lambda b: (b, 0, 0)),
            pl.BlockSpec((1, 1, gdim), lambda b: (b, 0, 0)),
            full(kp["w2"].shape), full(kp["b2"].shape),
            full(kp["w3"].shape), full(kp["b3"].shape),
            full(kp["wa1f"].shape), full(kp["wa1g"].shape),
            full(kp["ba1"].shape), full(kp["wa2"].shape),
            full(kp["sb"].shape),
            full(kp["w4"].shape), full(kp["b4"].shape),
            full(kp["w5f"].shape), full(kp["w5g"].shape),
            full(kp["b5"].shape),
        ],
        out_specs=pl.BlockSpec((1, 1, _NPAD), lambda b: (b, 0, 0)),
        scratch_shapes=[pltpu.VMEM((_R2, 64), jnp.bfloat16)],
        compiler_params=pltpu.CompilerParams(
            dimension_semantics=("parallel",)),
    )(y1, goals3, kp["w2"], kp["b2"], kp["w3"], kp["b3"],
      kp["wa1f"], kp["wa1g"], kp["ba1"], kp["wa2"], kp["sb"],
      kp["w4"], kp["b4"], kp["w5f"], kp["w5g"], kp["b5"])
    return out.reshape(bsz, _NPAD)[:, :num_actions]


# ---------------------------------------------------------------------------
# Parameters: raw torch-layout init + one-time conversion to kernel layout.
# ---------------------------------------------------------------------------
def init_params(key, in_channels=4, num_actions=18):
    def uni(k, shape, fan_in):
        bound = 1.0 / jnp.sqrt(jnp.float32(fan_in))
        return jax.random.uniform(k, shape, jnp.float32, -bound, bound)

    ks = jax.random.split(key, 14)
    p = {}
    p["conv1_w"] = uni(ks[0], (32, in_channels, 8, 8), in_channels * 64)
    p["conv1_b"] = uni(ks[1], (32,), in_channels * 64)
    p["conv2_w"] = uni(ks[2], (64, 32, 4, 4), 32 * 16)
    p["conv2_b"] = uni(ks[3], (64,), 32 * 16)
    p["conv3_w"] = uni(ks[4], (64, 64, 3, 3), 64 * 9)
    p["conv3_b"] = uni(ks[5], (64,), 64 * 9)
    p["att1_w"] = uni(ks[6], (128, 72), 72)            # Linear(64+8, 128)
    p["att1_b"] = uni(ks[7], (128,), 72)
    p["att2_w"] = uni(ks[8], (1, 128), 128)            # Linear(128, 1)
    p["att2_b"] = uni(ks[9], (1,), 128)
    p["fc4_w"] = uni(ks[10], (512, 64), 64)            # Linear(64, 512)
    p["fc4_b"] = uni(ks[11], (512,), 64)
    p["fc5_w"] = uni(ks[12], (num_actions, 520), 520)  # Linear(520, A)
    p["fc5_b"] = uni(ks[13], (num_actions,), 520)
    return p


def prepare_params(p, conv_dtype=jnp.bfloat16):
    """One-time conversion to kernel-ready layouts (outside the hot path)."""
    kp = {}
    # conv1: plain im2col GEMM weight, (kh*kw*Cin, Cout), row order (kh,kw,cin)
    kp["w1"] = jnp.transpose(p["conv1_w"], (2, 3, 1, 0)).reshape(
        -1, p["conv1_w"].shape[0]).astype(conv_dtype)
    kp["b1"] = p["conv1_b"].reshape(1, -1).astype(jnp.float32)

    # conv2 as a 2x2 stride-1 conv over the space-to-depth conv1 output:
    # w2s[bi, bj, 64*dy + 32*dx + cin, cout] = W2[cout, cin, 2bi+dy, 2bj+dx]
    w2 = jnp.transpose(p["conv2_w"], (2, 3, 1, 0))      # (kh, kw, cin, cout)
    w2 = w2.reshape(2, 2, 2, 2, 32, 64)                 # (bi, dy, bj, dx, ci, co)
    w2 = jnp.transpose(w2, (0, 2, 1, 3, 4, 5))          # (bi, bj, dy, dx, ci, co)
    kp["w2"] = w2.reshape(2, 2, 128, 64).astype(conv_dtype)
    kp["b2"] = p["conv2_b"].reshape(1, -1).astype(jnp.float32)

    # conv3 per-tap weights: (ki, kj, cin, cout)
    kp["w3"] = jnp.transpose(p["conv3_w"], (2, 3, 1, 0)).astype(conv_dtype)
    kp["b3"] = p["conv3_b"].reshape(1, -1).astype(jnp.float32)

    # attention MLP (concat -> split matmuls); bf16 weights, f32 biases.
    a1 = p["att1_w"].T                                  # (72, 128)
    kp["wa1f"] = a1[:64].astype(conv_dtype)
    kp["wa1g"] = a1[64:].astype(conv_dtype)
    kp["ba1"] = p["att1_b"].reshape(1, -1).astype(jnp.float32)
    kp["wa2"] = p["att2_w"].astype(jnp.float32)         # (1, 128) for VPU reduce
    # score bias: att2 bias on valid rows (r % 10 < 7), -1e30 on junk rows.
    rows = jnp.arange(_R3, dtype=jnp.int32) % 10
    kp["sb"] = jnp.where(rows < 7, p["att2_b"][0].astype(jnp.float32),
                         jnp.float32(-1e30)).reshape(_R3, 1)

    kp["w4"] = p["fc4_w"].T.astype(conv_dtype)          # (64, 512)
    kp["b4"] = p["fc4_b"].reshape(1, -1).astype(jnp.float32)

    # fc5: split (fc4-output / goal) halves, zero-padded to 128 output lanes.
    a = p["fc5_w"].shape[0]
    w5 = p["fc5_w"].T                                   # (520, A)
    w5p = jnp.zeros((520, _NPAD), jnp.float32).at[:, :a].set(w5)
    kp["w5f"] = w5p[:512].astype(conv_dtype)
    kp["w5g"] = w5p[512:].astype(conv_dtype)
    kp["b5"] = jnp.zeros((1, _NPAD), jnp.float32).at[:, :a].set(p["fc5_b"])
    return kp


# ---------------------------------------------------------------------------
# Pure-JAX f32 reference of the PyTorch forward (for the correctness check).
# ---------------------------------------------------------------------------
def reference_forward(p, frames, goals):
    def conv(x, w, b, s):
        y = jax.lax.conv_general_dilated(
            x, w, (s, s), "VALID",
            dimension_numbers=("NCHW", "OIHW", "NCHW"))
        return jax.nn.relu(y + b[None, :, None, None])

    bsz = frames.shape[0]
    x = conv(frames, p["conv1_w"], p["conv1_b"], 4)
    x = conv(x, p["conv2_w"], p["conv2_b"], 2)
    x = conv(x, p["conv3_w"], p["conv3_b"], 1)                  # (B, 64, 7, 7)
    f = x.reshape(bsz, 64, 49).transpose(0, 2, 1).reshape(-1, 64)
    q = jnp.repeat(goals, 49, axis=0)                           # (B*49, 8)
    a_in = jnp.concatenate([f, q], axis=1)                      # (B*49, 72)
    hid = jax.nn.relu(a_in @ p["att1_w"].T + p["att1_b"])
    scores = (hid @ p["att2_w"].T + p["att2_b"]).reshape(bsz, 49, 1)
    attn = jax.nn.softmax(scores, axis=1)
    agg = jnp.sum(f.reshape(bsz, 49, 64) * attn, axis=1)        # (B, 64)
    h = jax.nn.relu(agg @ p["fc4_w"].T + p["fc4_b"])            # (B, 512)
    feat = jnp.concatenate([h, goals], axis=1)                  # (B, 520)
    return feat @ p["fc5_w"].T + p["fc5_b"]                     # (B, A)


if __name__ == "__main__":
    key = jax.random.PRNGKey(0)
    k_params, k_frames, k_goals = jax.random.split(key, 3)

    # The module hard-codes 49 (=7x7) attention regions, forcing 84x84 inputs.
    B, C, H, W = 2, 4, 84, 84
    frames = jax.random.normal(k_frames, (B, C, H, W), jnp.float32)
    goals = jax.random.normal(k_goals, (B, 8), jnp.float32)

    raw_params = init_params(k_params, in_channels=4, num_actions=18)
    kernel_params = prepare_params(raw_params)

    q_values = daqn_forward(kernel_params, frames, goals, num_actions=18)
    q_values = jax.block_until_ready(q_values)

    assert q_values.shape == (B, 18), q_values.shape
    assert bool(jnp.all(jnp.isfinite(q_values)))

    # correctness vs pure-JAX f32 reference (bf16 operands, f32 accumulation
    # -> loose tolerance)
    ref = reference_forward(raw_params, frames, goals)
    max_err = float(jnp.max(jnp.abs(q_values - ref)))
    assert max_err < 5e-2, f"max abs err vs reference: {max_err}"

    print("KERNEL_OK")
</pallas_src>

<mosaic_0001>
module attributes {stable_mosaic.version = 11 : i64} {
  func.func @_gemm_bias_relu_kernel(%arg0: i32, %arg1: memref<800x256xbf16, #tpu.memory_space<vmem>>, %arg2: memref<256x32xbf16, #tpu.memory_space<vmem>>, %arg3: memref<1x32xf32, #tpu.memory_space<vmem>>, %arg4: memref<800x32xbf16, #tpu.memory_space<vmem>>) attributes {dimension_semantics = [#tpu.dimension_semantics<parallel>], iteration_bounds = array<i64: 1>, scalar_prefetch = 0 : i64, scratch_operands = 0 : i64, tpu.core_type = #tpu.core_type<tc>, window_params = [{transform_indices = @transform_0, window_bounds = array<i64: 800, 256>}, {pipeline_mode = #tpu.pipeline_mode<synchronous>, transform_indices = @transform_1, window_bounds = array<i64: 256, 32>}, {pipeline_mode = #tpu.pipeline_mode<synchronous>, transform_indices = @transform_2, window_bounds = array<i64: 1, 32>}, {transform_indices = @transform_3, window_bounds = array<i64: 800, 32>}]} {
    %c0 = arith.constant 0 : index
    %c0_0 = arith.constant 0 : index
    %0 = vector.load %arg1[%c0, %c0_0] : memref<800x256xbf16, #tpu.memory_space<vmem>>, vector<800x256xbf16>
    %c0_1 = arith.constant 0 : index
    %c0_2 = arith.constant 0 : index
    %1 = vector.load %arg2[%c0_1, %c0_2] : memref<256x32xbf16, #tpu.memory_space<vmem>>, vector<256x32xbf16>
    %cst = arith.constant dense<0.000000e+00> : vector<800x32xf32>
    %2 = tpu.matmul %0, %1, %cst {dimension_numbers = #tpu.dot_dimension_numbers<[1], [0], [0], [1], [0, 0, 1, 1], [], []>} : vector<800x256xbf16>, vector<256x32xbf16>, vector<800x32xf32> -> vector<800x32xf32>
    %c0_3 = arith.constant 0 : index
    %c0_4 = arith.constant 0 : index
    %3 = vector.load %arg3[%c0_3, %c0_4] : memref<1x32xf32, #tpu.memory_space<vmem>>, vector<1x32xf32>
    %4 = vector.broadcast %3 : vector<1x32xf32> to vector<800x32xf32>
    %5 = arith.addf %2, %4 : vector<800x32xf32>
    %cst_5 = arith.constant 0.000000e+00 : f32
    %6 = vector.broadcast %cst_5 : f32 to vector<800x32xf32>
    %7 = arith.maximumf %5, %6 : vector<800x32xf32>
    %8 = arith.truncf %7 : vector<800x32xf32> to vector<800x32xbf16>
    %c0_6 = arith.constant 0 : index
    %c0_7 = arith.constant 0 : index
    %9 = vector.load %arg4[%c0_6, %c0_7] : memref<800x32xbf16, #tpu.memory_space<vmem>>, vector<800x32xbf16>
    tpu.vector_store %arg4[%c0_6, %c0_7], %8 {strides = array<i32>} : memref<800x32xbf16, #tpu.memory_space<vmem>>, vector<800x32xbf16>,
    return
  }
  func.func @transform_0(%arg0: i32) -> (i32, i32) {
    %c0_i32 = arith.constant 0 : i32
    %c0_i32_0 = arith.constant 0 : i32
    return %arg0, %c0_i32 : i32, i32
  }
  func.func @transform_1(%arg0: i32) -> (i32, i32) {
    %c0_i32 = arith.constant 0 : i32
    %c0_i32_0 = arith.constant 0 : i32
    %c0_i32_1 = arith.constant 0 : i32
    return %c0_i32, %c0_i32_0 : i32, i32
  }
  func.func @transform_2(%arg0: i32) -> (i32, i32) {
    %c0_i32 = arith.constant 0 : i32
    %c0_i32_0 = arith.constant 0 : i32
    %c0_i32_1 = arith.constant 0 : i32
    return %c0_i32, %c0_i32_0 : i32, i32
  }
  func.func @transform_3(%arg0: i32) -> (i32, i32) {
    %c0_i32 = arith.constant 0 : i32
    %c0_i32_0 = arith.constant 0 : i32
    return %arg0, %c0_i32 : i32, i32
  }
}

module attributes {stable_mosaic.version = 11 : i64} {
  func.func @_daqn_fused_kernel(%arg0: i32, %arg1: memref<1x100x128xbf16, #tpu.memory_space<vmem>>, %arg2: memref<1x1x8xf32, #tpu.memory_space<vmem>>, %arg3: memref<2x2x128x64xbf16, #tpu.memory_space<vmem>>, %arg4: memref<1x64xf32, #tpu.memory_space<vmem>>, %arg5: memref<3x3x64x64xbf16, #tpu.memory_space<vmem>>, %arg6: memref<1x64xf32, #tpu.memory_space<vmem>>, %arg7: memref<64x128xbf16, #tpu.memory_space<vmem>>, %arg8: memref<8x128xbf16, #tpu.memory_space<vmem>>, %arg9: memref<1x128xf32, #tpu.memory_space<vmem>>, %arg10: memref<1x128xf32, #tpu.memory_space<vmem>>, %arg11: memref<67x1xf32, #tpu.memory_space<vmem>>, %arg12: memref<64x512xbf16, #tpu.memory_space<vmem>>, %arg13: memref<1x512xf32, #tpu.memory_space<vmem>>, %arg14: memref<512x128xbf16, #tpu.memory_space<vmem>>, %arg15: memref<8x128xbf16, #tpu.memory_space<vmem>>, %arg16: memref<1x128xf32, #tpu.memory_space<vmem>>, %arg17: memref<1x1x128xf32, #tpu.memory_space<vmem>>, %arg18: memref<89x64xbf16, #tpu.memory_space<vmem>>) attributes {dimension_semantics = [#tpu.dimension_semantics<parallel>], iteration_bounds = array<i64: 2>, scalar_prefetch = 0 : i64, scratch_operands = 1 : i64, tpu.core_type = #tpu.core_type<tc>, window_params = [{transform_indices = @transform_0, window_bounds = array<i64: 1, 100, 128>}, {transform_indices = @transform_1, window_bounds = array<i64: 1, 1, 8>}, {pipeline_mode = #tpu.pipeline_mode<synchronous>, transform_indices = @transform_2, window_bounds = array<i64: 2, 2, 128, 64>}, {pipeline_mode = #tpu.pipeline_mode<synchronous>, transform_indices = @transform_3, window_bounds = array<i64: 1, 64>}, {pipeline_mode = #tpu.pipeline_mode<synchronous>, transform_indices = @transform_4, window_bounds = array<i64: 3, 3, 64, 64>}, {pipeline_mode = #tpu.pipeline_mode<synchronous>, transform_indices = @transform_5, window_bounds = array<i64: 1, 64>}, {pipeline_mode = #tpu.pipeline_mode<synchronous>, transform_indices = @transform_6, window_bounds = array<i64: 64, 128>}, {pipeline_mode = #tpu.pipeline_mode<synchronous>, transform_indices = @transform_7, window_bounds = array<i64: 8, 128>}, {pipeline_mode = #tpu.pipeline_mode<synchronous>, transform_indices = @transform_8, window_bounds = array<i64: 1, 128>}, {pipeline_mode = #tpu.pipeline_mode<synchronous>, transform_indices = @transform_9, window_bounds = array<i64: 1, 128>}, {pipeline_mode = #tpu.pipeline_mode<synchronous>, transform_indices = @transform_10, window_bounds = array<i64: 67, 1>}, {pipeline_mode = #tpu.pipeline_mode<synchronous>, transform_indices = @transform_11, window_bounds = array<i64: 64, 512>}, {pipeline_mode = #tpu.pipeline_mode<synchronous>, transform_indices = @transform_12, window_bounds = array<i64: 1, 512>}, {pipeline_mode = #tpu.pipeline_mode<synchronous>, transform_indices = @transform_13, window_bounds = array<i64: 512, 128>}, {pipeline_mode = #tpu.pipeline_mode<synchronous>, transform_indices = @transform_14, window_bounds = array<i64: 8, 128>}, {pipeline_mode = #tpu.pipeline_mode<synchronous>, transform_indices = @transform_15, window_bounds = array<i64: 1, 128>}, {transform_indices = @transform_16, window_bounds = array<i64: 1, 1, 128>}]} {
    %c0 = arith.constant 0 : index
    %c0_0 = arith.constant 0 : index
    %c0_1 = arith.constant 0 : index
    %0 = vector.load %arg2[%c0, %c0_0, %c0_1] : memref<1x1x8xf32, #tpu.memory_space<vmem>>, vector<1x1x8xf32>
    %1 = vector.shape_cast %0 : vector<1x1x8xf32> to vector<1x8xf32>
    %2 = arith.truncf %1 : vector<1x8xf32> to vector<1x8xbf16>
    %cst = arith.constant 0.000000e+00 : f32
    %3 = vector.broadcast %cst : f32 to vector<89x64xf32>
    %c0_2 = arith.constant 0 : index
    %c0_3 = arith.constant 0 : index
    %c0_4 = arith.constant 0 : index
    %4 = vector.load %arg1[%c0_2, %c0_3, %c0_4] : memref<1x100x128xbf16, #tpu.memory_space<vmem>>, vector<1x89x128xbf16>
    %5 = vector.shape_cast %4 : vector<1x89x128xbf16> to vector<89x128xbf16>
    %c0_5 = arith.constant 0 : index
    %c0_6 = arith.constant 0 : index
    %c0_7 = arith.constant 0 : index
    %c0_8 = arith.constant 0 : index
    %6 = vector.load %arg3[%c0_5, %c0_6, %c0_7, %c0_8] : memref<2x2x128x64xbf16, #tpu.memory_space<vmem>>, vector<1x1x128x64xbf16>
    %7 = vector.shape_cast %6 : vector<1x1x128x64xbf16> to vector<128x64xbf16>
    %cst_9 = arith.constant dense<0.000000e+00> : vector<89x64xf32>
    %8 = tpu.matmul %5, %7, %cst_9 {dimension_numbers = #tpu.dot_dimension_numbers<[1], [0], [0], [1], [0, 0, 1, 1], [], []>} : vector<89x128xbf16>, vector<128x64xbf16>, vector<89x64xf32> -> vector<89x64xf32>
    %9 = arith.addf %3, %8 : vector<89x64xf32>
    %c0_10 = arith.constant 0 : index
    %c1 = arith.constant 1 : index
    %c0_11 = arith.constant 0 : index
    %10 = vector.load %arg1[%c0_10, %c1, %c0_11] : memref<1x100x128xbf16, #tpu.memory_space<vmem>>, vector<1x89x128xbf16>
    %11 = vector.shape_cast %10 : vector<1x89x128xbf16> to vector<89x128xbf16>
    %c0_12 = arith.constant 0 : index
    %c1_13 = arith.constant 1 : index
    %c0_14 = arith.constant 0 : index
    %c0_15 = arith.constant 0 : index
    %12 = vector.load %arg3[%c0_12, %c1_13, %c0_14, %c0_15] : memref<2x2x128x64xbf16, #tpu.memory_space<vmem>>, vector<1x1x128x64xbf16>
    %13 = vector.shape_cast %12 : vector<1x1x128x64xbf16> to vector<128x64xbf16>
    %cst_16 = arith.constant dense<0.000000e+00> : vector<89x64xf32>
    %14 = tpu.matmul %11, %13, %cst_16 {dimension_numbers = #tpu.dot_dimension_numbers<[1], [0], [0], [1], [0, 0, 1, 1], [], []>} : vector<89x128xbf16>, vector<128x64xbf16>, vector<89x64xf32> -> vector<89x64xf32>
    %15 = arith.addf %9, %14 : vector<89x64xf32>
    %c0_17 = arith.constant 0 : index
    %c10 = arith.constant 10 : index
    %c0_18 = arith.constant 0 : index
    %16 = vector.load %arg1[%c0_17, %c10, %c0_18] : memref<1x100x128xbf16, #tpu.memory_space<vmem>>, vector<1x89x128xbf16>
    %17 = vector.shape_cast %16 : vector<1x89x128xbf16> to vector<89x128xbf16>
    %c1_19 = arith.constant 1 : index
    %c0_20 = arith.constant 0 : index
    %c0_21 = arith.constant 0 : index
    %c0_22 = arith.constant 0 : index
    %18 = vector.load %arg3[%c1_19, %c0_20, %c0_21, %c0_22] : memref<2x2x128x64xbf16, #tpu.memory_space<vmem>>, vector<1x1x128x64xbf16>
    %19 = vector.shape_cast %18 : vector<1x1x128x64xbf16> to vector<128x64xbf16>
    %cst_23 = arith.constant dense<0.000000e+00> : vector<89x64xf32>
    %20 = tpu.matmul %17, %19, %cst_23 {dimension_numbers = #tpu.dot_dimension_numbers<[1], [0], [0], [1], [0, 0, 1, 1], [], []>} : vector<89x128xbf16>, vector<128x64xbf16>, vector<89x64xf32> -> vector<89x64xf32>
    %21 = arith.addf %15, %20 : vector<89x64xf32>
    %c0_24 = arith.constant 0 : index
    %c11 = arith.constant 11 : index
    %c0_25 = arith.constant 0 : index
    %22 = vector.load %arg1[%c0_24, %c11, %c0_25] : memref<1x100x128xbf16, #tpu.memory_space<vmem>>, vector<1x89x128xbf16>
    %23 = vector.shape_cast %22 : vector<1x89x128xbf16> to vector<89x128xbf16>
    %c1_26 = arith.constant 1 : index
    %c1_27 = arith.constant 1 : index
    %c0_28 = arith.constant 0 : index
    %c0_29 = arith.constant 0 : index
    %24 = vector.load %arg3[%c1_26, %c1_27, %c0_28, %c0_29] : memref<2x2x128x64xbf16, #tpu.memory_space<vmem>>, vector<1x1x128x64xbf16>
    %25 = vector.shape_cast %24 : vector<1x1x128x64xbf16> to vector<128x64xbf16>
    %cst_30 = arith.constant dense<0.000000e+00> : vector<89x64xf32>
    %26 = tpu.matmul %23, %25, %cst_30 {dimension_numbers = #tpu.dot_dimension_numbers<[1], [0], [0], [1], [0, 0, 1, 1], [], []>} : vector<89x128xbf16>, vector<128x64xbf16>, vector<89x64xf32> -> vector<89x64xf32>
    %27 = arith.addf %21, %26 : vector<89x64xf32>
    %c0_31 = arith.constant 0 : index
    %c0_32 = arith.constant 0 : index
    %28 = vector.load %arg4[%c0_31, %c0_32] : memref<1x64xf32, #tpu.memory_space<vmem>>, vector<1x64xf32>
    %29 = vector.broadcast %28 : vector<1x64xf32> to vector<89x64xf32>
    %30 = arith.addf %27, %29 : vector<89x64xf32>
    %cst_33 = arith.constant 0.000000e+00 : f32
    %31 = vector.broadcast %cst_33 : f32 to vector<89x64xf32>
    %32 = arith.maximumf %30, %31 : vector<89x64xf32>
    %33 = arith.truncf %32 : vector<89x64xf32> to vector<89x64xbf16>
    %c0_34 = arith.constant 0 : index
    %c0_35 = arith.constant 0 : index
    %34 = vector.load %arg18[%c0_34, %c0_35] : memref<89x64xbf16, #tpu.memory_space<vmem>>, vector<89x64xbf16>
    tpu.vector_store %arg18[%c0_34, %c0_35], %33 {strides = array<i32>} : memref<89x64xbf16, #tpu.memory_space<vmem>>, vector<89x64xbf16>,
    %cst_36 = arith.constant 0.000000e+00 : f32
    %35 = vector.broadcast %cst_36 : f32 to vector<67x64xf32>
    %c0_37 = arith.constant 0 : index
    %c0_38 = arith.constant 0 : index
    %36 = vector.load %arg18[%c0_37, %c0_38] : memref<89x64xbf16, #tpu.memory_space<vmem>>, vector<67x64xbf16>
    %c0_39 = arith.constant 0 : index
    %c0_40 = arith.constant 0 : index
    %c0_41 = arith.constant 0 : index
    %c0_42 = arith.constant 0 : index
    %37 = vector.load %arg5[%c0_39, %c0_40, %c0_41, %c0_42] : memref<3x3x64x64xbf16, #tpu.memory_space<vmem>>, vector<1x1x64x64xbf16>
    %38 = vector.shape_cast %37 : vector<1x1x64x64xbf16> to vector<64x64xbf16>
    %cst_43 = arith.constant dense<0.000000e+00> : vector<67x64xf32>
    %39 = tpu.matmul %36, %38, %cst_43 {dimension_numbers = #tpu.dot_dimension_numbers<[1], [0], [0], [1], [0, 0, 1, 1], [], []>} : vector<67x64xbf16>, vector<64x64xbf16>, vector<67x64xf32> -> vector<67x64xf32>
    %40 = arith.addf %35, %39 : vector<67x64xf32>
    %c1_44 = arith.constant 1 : index
    %c0_45 = arith.constant 0 : index
    %41 = vector.load %arg18[%c1_44, %c0_45] : memref<89x64xbf16, #tpu.memory_space<vmem>>, vector<67x64xbf16>
    %c0_46 = arith.constant 0 : index
    %c1_47 = arith.constant 1 : index
    %c0_48 = arith.constant 0 : index
    %c0_49 = arith.constant 0 : index
    %42 = vector.load %arg5[%c0_46, %c1_47, %c0_48, %c0_49] : memref<3x3x64x64xbf16, #tpu.memory_space<vmem>>, vector<1x1x64x64xbf16>
    %43 = vector.shape_cast %42 : vector<1x1x64x64xbf16> to vector<64x64xbf16>
    %cst_50 = arith.constant dense<0.000000e+00> : vector<67x64xf32>
    %44 = tpu.matmul %41, %43, %cst_50 {dimension_numbers = #tpu.dot_dimension_numbers<[1], [0], [0], [1], [0, 0, 1, 1], [], []>} : vector<67x64xbf16>, vector<64x64xbf16>, vector<67x64xf32> -> vector<67x64xf32>
    %45 = arith.addf %40, %44 : vector<67x64xf32>
    %c2 = arith.constant 2 : index
    %c0_51 = arith.constant 0 : index
    %46 = vector.load %arg18[%c2, %c0_51] : memref<89x64xbf16, #tpu.memory_space<vmem>>, vector<67x64xbf16>
    %c0_52 = arith.constant 0 : index
    %c2_53 = arith.constant 2 : index
    %c0_54 = arith.constant 0 : index
    %c0_55 = arith.constant 0 : index
    %47 = vector.load %arg5[%c0_52, %c2_53, %c0_54, %c0_55] : memref<3x3x64x64xbf16, #tpu.memory_space<vmem>>, vector<1x1x64x64xbf16>
    %48 = vector.shape_cast %47 : vector<1x1x64x64xbf16> to vector<64x64xbf16>
    %cst_56 = arith.constant dense<0.000000e+00> : vector<67x64xf32>
    %49 = tpu.matmul %46, %48, %cst_56 {dimension_numbers = #tpu.dot_dimension_numbers<[1], [0], [0], [1], [0, 0, 1, 1], [], []>} : vector<67x64xbf16>, vector<64x64xbf16>, vector<67x64xf32> -> vector<67x64xf32>
    %50 = arith.addf %45, %49 : vector<67x64xf32>
    %c10_57 = arith.constant 10 : index
    %c0_58 = arith.constant 0 : index
    %51 = vector.load %arg18[%c10_57, %c0_58] : memref<89x64xbf16, #tpu.memory_space<vmem>>, vector<67x64xbf16>
    %c1_59 = arith.constant 1 : index
    %c0_60 = arith.constant 0 : index
    %c0_61 = arith.constant 0 : index
    %c0_62 = arith.constant 0 : index
    %52 = vector.load %arg5[%c1_59, %c0_60, %c0_61, %c0_62] : memref<3x3x64x64xbf16, #tpu.memory_space<vmem>>, vector<1x1x64x64xbf16>
    %53 = vector.shape_cast %52 : vector<1x1x64x64xbf16> to vector<64x64xbf16>
    %cst_63 = arith.constant dense<0.000000e+00> : vector<67x64xf32>
    %54 = tpu.matmul %51, %53, %cst_63 {dimension_numbers = #tpu.dot_dimension_numbers<[1], [0], [0], [1], [0, 0, 1, 1], [], []>} : vector<67x64xbf16>, vector<64x64xbf16>, vector<67x64xf32> -> vector<67x64xf32>
    %55 = arith.addf %50, %54 : vector<67x64xf32>
    %c11_64 = arith.constant 11 : index
    %c0_65 = arith.constant 0 : index
    %56 = vector.load %arg18[%c11_64, %c0_65] : memref<89x64xbf16, #tpu.memory_space<vmem>>, vector<67x64xbf16>
    %c1_66 = arith.constant 1 : index
    %c1_67 = arith.constant 1 : index
    %c0_68 = arith.constant 0 : index
    %c0_69 = arith.constant 0 : index
    %57 = vector.load %arg5[%c1_66, %c1_67, %c0_68, %c0_69] : memref<3x3x64x64xbf16, #tpu.memory_space<vmem>>, vector<1x1x64x64xbf16>
    %58 = vector.shape_cast %57 : vector<1x1x64x64xbf16> to vector<64x64xbf16>
    %cst_70 = arith.constant dense<0.000000e+00> : vector<67x64xf32>
    %59 = tpu.matmul %56, %58, %cst_70 {dimension_numbers = #tpu.dot_dimension_numbers<[1], [0], [0], [1], [0, 0, 1, 1], [], []>} : vector<67x64xbf16>, vector<64x64xbf16>, vector<67x64xf32> -> vector<67x64xf32>
    %60 = arith.addf %55, %59 : vector<67x64xf32>
    %c12 = arith.constant 12 : index
    %c0_71 = arith.constant 0 : index
    %61 = vector.load %arg18[%c12, %c0_71] : memref<89x64xbf16, #tpu.memory_space<vmem>>, vector<67x64xbf16>
    %c1_72 = arith.constant 1 : index
    %c2_73 = arith.constant 2 : index
    %c0_74 = arith.constant 0 : index
    %c0_75 = arith.constant 0 : index
    %62 = vector.load %arg5[%c1_72, %c2_73, %c0_74, %c0_75] : memref<3x3x64x64xbf16, #tpu.memory_space<vmem>>, vector<1x1x64x64xbf16>
    %63 = vector.shape_cast %62 : vector<1x1x64x64xbf16> to vector<64x64xbf16>
    %cst_76 = arith.constant dense<0.000000e+00> : vector<67x64xf32>
    %64 = tpu.matmul %61, %63, %cst_76 {dimension_numbers = #tpu.dot_dimension_numbers<[1], [0], [0], [1], [0, 0, 1, 1], [], []>} : vector<67x64xbf16>, vector<64x64xbf16>, vector<67x64xf32> -> vector<67x64xf32>
    %65 = arith.addf %60, %64 : vector<67x64xf32>
    %c20 = arith.constant 20 : index
    %c0_77 = arith.constant 0 : index
    %66 = vector.load %arg18[%c20, %c0_77] : memref<89x64xbf16, #tpu.memory_space<vmem>>, vector<67x64xbf16>
    %c2_78 = arith.constant 2 : index
    %c0_79 = arith.constant 0 : index
    %c0_80 = arith.constant 0 : index
    %c0_81 = arith.constant 0 : index
    %67 = vector.load %arg5[%c2_78, %c0_79, %c0_80, %c0_81] : memref<3x3x64x64xbf16, #tpu.memory_space<vmem>>, vector<1x1x64x64xbf16>
    %68 = vector.shape_cast %67 : vector<1x1x64x64xbf16> to vector<64x64xbf16>
    %cst_82 = arith.constant dense<0.000000e+00> : vector<67x64xf32>
    %69 = tpu.matmul %66, %68, %cst_82 {dimension_numbers = #tpu.dot_dimension_numbers<[1], [0], [0], [1], [0, 0, 1, 1], [], []>} : vector<67x64xbf16>, vector<64x64xbf16>, vector<67x64xf32> -> vector<67x64xf32>
    %70 = arith.addf %65, %69 : vector<67x64xf32>
    %c21 = arith.constant 21 : index
    %c0_83 = arith.constant 0 : index
    %71 = vector.load %arg18[%c21, %c0_83] : memref<89x64xbf16, #tpu.memory_space<vmem>>, vector<67x64xbf16>
    %c2_84 = arith.constant 2 : index
    %c1_85 = arith.constant 1 : index
    %c0_86 = arith.constant 0 : index
    %c0_87 = arith.constant 0 : index
    %72 = vector.load %arg5[%c2_84, %c1_85, %c0_86, %c0_87] : memref<3x3x64x64xbf16, #tpu.memory_space<vmem>>, vector<1x1x64x64xbf16>
    %73 = vector.shape_cast %72 : vector<1x1x64x64xbf16> to vector<64x64xbf16>
    %cst_88 = arith.constant dense<0.000000e+00> : vector<67x64xf32>
    %74 = tpu.matmul %71, %73, %cst_88 {dimension_numbers = #tpu.dot_dimension_numbers<[1], [0], [0], [1], [0, 0, 1, 1], [], []>} : vector<67x64xbf16>, vector<64x64xbf16>, vector<67x64xf32> -> vector<67x64xf32>
    %75 = arith.addf %70, %74 : vector<67x64xf32>
    %c22 = arith.constant 22 : index
    %c0_89 = arith.constant 0 : index
    %76 = vector.load %arg18[%c22, %c0_89] : memref<89x64xbf16, #tpu.memory_space<vmem>>, vector<67x64xbf16>
    %c2_90 = arith.constant 2 : index
    %c2_91 = arith.constant 2 : index
    %c0_92 = arith.constant 0 : index
    %c0_93 = arith.constant 0 : index
    %77 = vector.load %arg5[%c2_90, %c2_91, %c0_92, %c0_93] : memref<3x3x64x64xbf16, #tpu.memory_space<vmem>>, vector<1x1x64x64xbf16>
    %78 = vector.shape_cast %77 : vector<1x1x64x64xbf16> to vector<64x64xbf16>
    %cst_94 = arith.constant dense<0.000000e+00> : vector<67x64xf32>
    %79 = tpu.matmul %76, %78, %cst_94 {dimension_numbers = #tpu.dot_dimension_numbers<[1], [0], [0], [1], [0, 0, 1, 1], [], []>} : vector<67x64xbf16>, vector<64x64xbf16>, vector<67x64xf32> -> vector<67x64xf32>
    %80 = arith.addf %75, %79 : vector<67x64xf32>
    %c0_95 = arith.constant 0 : index
    %c0_96 = arith.constant 0 : index
    %81 = vector.load %arg6[%c0_95, %c0_96] : memref<1x64xf32, #tpu.memory_space<vmem>>, vector<1x64xf32>
    %82 = vector.broadcast %81 : vector<1x64xf32> to vector<67x64xf32>
    %83 = arith.addf %80, %82 : vector<67x64xf32>
    %cst_97 = arith.constant 0.000000e+00 : f32
    %84 = vector.broadcast %cst_97 : f32 to vector<67x64xf32>
    %85 = arith.maximumf %83, %84 : vector<67x64xf32>
    %86 = arith.truncf %85 : vector<67x64xf32> to vector<67x64xbf16>
    %c0_98 = arith.constant 0 : index
    %c0_99 = arith.constant 0 : index
    %87 = vector.load %arg7[%c0_98, %c0_99] : memref<64x128xbf16, #tpu.memory_space<vmem>>, vector<64x128xbf16>
    %cst_100 = arith.constant dense<0.000000e+00> : vector<67x128xf32>
    %88 = tpu.matmul %86, %87, %cst_100 {dimension_numbers = #tpu.dot_dimension_numbers<[1], [0], [0], [1], [0, 0, 1, 1], [], []>} : vector<67x64xbf16>, vector<64x128xbf16>, vector<67x128xf32> -> vector<67x128xf32>
    %c0_101 = arith.constant 0 : index
    %c0_102 = arith.constant 0 : index
    %89 = vector.load %arg8[%c0_101, %c0_102] : memref<8x128xbf16, #tpu.memory_space<vmem>>, vector<8x128xbf16>
    %cst_103 = arith.constant dense<0.000000e+00> : vector<1x128xf32>
    %90 = tpu.matmul %2, %89, %cst_103 {dimension_numbers = #tpu.dot_dimension_numbers<[1], [0], [0], [1], [0, 0, 1, 1], [], []>} : vector<1x8xbf16>, vector<8x128xbf16>, vector<1x128xf32> -> vector<1x128xf32>
    %91 = vector.broadcast %90 : vector<1x128xf32> to vector<67x128xf32>
    %92 = arith.addf %88, %91 : vector<67x128xf32>
    %c0_104 = arith.constant 0 : index
    %c0_105 = arith.constant 0 : index
    %93 = vector.load %arg9[%c0_104, %c0_105] : memref<1x128xf32, #tpu.memory_space<vmem>>, vector<1x128xf32>
    %94 = vector.broadcast %93 : vector<1x128xf32> to vector<67x128xf32>
    %95 = arith.addf %92, %94 : vector<67x128xf32>
    %cst_106 = arith.constant 0.000000e+00 : f32
    %96 = vector.broadcast %cst_106 : f32 to vector<67x128xf32>
    %97 = arith.maximumf %95, %96 : vector<67x128xf32>
    %c0_107 = arith.constant 0 : index
    %c0_108 = arith.constant 0 : index
    %98 = vector.load %arg10[%c0_107, %c0_108] : memref<1x128xf32, #tpu.memory_space<vmem>>, vector<1x128xf32>
    %99 = vector.broadcast %98 : vector<1x128xf32> to vector<67x128xf32>
    %100 = arith.mulf %97, %99 : vector<67x128xf32>
    %cst_109 = arith.constant dense<0.000000e+00> : vector<67xf32>
    %101 = vector.multi_reduction <add>, %100, %cst_109 [1] : vector<67x128xf32> to vector<67xf32>
    %102 = vector.shape_cast %101 : vector<67xf32> to vector<67x1xf32>
    %c0_110 = arith.constant 0 : index
    %c0_111 = arith.constant 0 : index
    %103 = vector.load %arg11[%c0_110, %c0_111] : memref<67x1xf32, #tpu.memory_space<vmem>>, vector<67x1xf32>
    %104 = arith.addf %102, %103 : vector<67x1xf32>
    %cst_112 = arith.constant dense<0xFF800000> : vector<1xf32>
    %105 = vector.multi_reduction <maximumf>, %104, %cst_112 [0] : vector<67x1xf32> to vector<1xf32>
    %106 = vector.shape_cast %105 : vector<1xf32> to vector<1x1xf32>
    %107 = vector.broadcast %106 : vector<1x1xf32> to vector<67x1xf32>
    %108 = arith.subf %104, %107 : vector<67x1xf32>
    %109 = math.exp %108 : vector<67x1xf32>
    %cst_113 = arith.constant dense<0.000000e+00> : vector<1xf32>
    %110 = vector.multi_reduction <add>, %109, %cst_113 [0] : vector<67x1xf32> to vector<1xf32>
    %111 = vector.shape_cast %110 : vector<1xf32> to vector<1x1xf32>
    %112 = tpu.reciprocal %111 {approx = true} : vector<1x1xf32> -> vector<1x1xf32>
    %113 = vector.broadcast %112 : vector<1x1xf32> to vector<67x1xf32>
    %114 = arith.mulf %109, %113 : vector<67x1xf32>
    %115 = vector.broadcast %114 : vector<67x1xf32> to vector<67x64xf32>
    %116 = arith.mulf %85, %115 : vector<67x64xf32>
    %cst_114 = arith.constant dense<0.000000e+00> : vector<64xf32>
    %117 = vector.multi_reduction <add>, %116, %cst_114 [0] : vector<67x64xf32> to vector<64xf32>
    %118 = vector.shape_cast %117 : vector<64xf32> to vector<1x64xf32>
    %119 = arith.truncf %118 : vector<1x64xf32> to vector<1x64xbf16>
    %c0_115 = arith.constant 0 : index
    %c0_116 = arith.constant 0 : index
    %120 = vector.load %arg12[%c0_115, %c0_116] : memref<64x512xbf16, #tpu.memory_space<vmem>>, vector<64x512xbf16>
    %cst_117 = arith.constant dense<0.000000e+00> : vector<1x512xf32>
    %121 = tpu.matmul %119, %120, %cst_117 {dimension_numbers = #tpu.dot_dimension_numbers<[1], [0], [0], [1], [0, 0, 1, 1], [], []>} : vector<1x64xbf16>, vector<64x512xbf16>, vector<1x512xf32> -> vector<1x512xf32>
    %c0_118 = arith.constant 0 : index
    %c0_119 = arith.constant 0 : index
    %122 = vector.load %arg13[%c0_118, %c0_119] : memref<1x512xf32, #tpu.memory_space<vmem>>, vector<1x512xf32>
    %123 = arith.addf %121, %122 : vector<1x512xf32>
    %cst_120 = arith.constant 0.000000e+00 : f32
    %124 = vector.broadcast %cst_120 : f32 to vector<1x512xf32>
    %125 = arith.maximumf %123, %124 : vector<1x512xf32>
    %126 = arith.truncf %125 : vector<1x512xf32> to vector<1x512xbf16>
    %c0_121 = arith.constant 0 : index
    %c0_122 = arith.constant 0 : index
    %127 = vector.load %arg14[%c0_121, %c0_122] : memref<512x128xbf16, #tpu.memory_space<vmem>>, vector<512x128xbf16>
    %cst_123 = arith.constant dense<0.000000e+00> : vector<1x128xf32>
    %128 = tpu.matmul %126, %127, %cst_123 {dimension_numbers = #tpu.dot_dimension_numbers<[1], [0], [0], [1], [0, 0, 1, 1], [], []>} : vector<1x512xbf16>, vector<512x128xbf16>, vector<1x128xf32> -> vector<1x128xf32>
    %c0_124 = arith.constant 0 : index
    %c0_125 = arith.constant 0 : index
    %129 = vector.load %arg15[%c0_124, %c0_125] : memref<8x128xbf16, #tpu.memory_space<vmem>>, vector<8x128xbf16>
    %cst_126 = arith.constant dense<0.000000e+00> : vector<1x128xf32>
    %130 = tpu.matmul %2, %129, %cst_126 {dimension_numbers = #tpu.dot_dimension_numbers<[1], [0], [0], [1], [0, 0, 1, 1], [], []>} : vector<1x8xbf16>, vector<8x128xbf16>, vector<1x128xf32> -> vector<1x128xf32>
    %131 = arith.addf %128, %130 : vector<1x128xf32>
    %c0_127 = arith.constant 0 : index
    %c0_128 = arith.constant 0 : index
    %132 = vector.load %arg16[%c0_127, %c0_128] : memref<1x128xf32, #tpu.memory_space<vmem>>, vector<1x128xf32>
    %133 = arith.addf %131, %132 : vector<1x128xf32>
    %c0_129 = arith.constant 0 : index
    %c0_130 = arith.constant 0 : index
    %c0_131 = arith.constant 0 : index
    %134 = vector.load %arg17[%c0_129, %c0_130, %c0_131] : memref<1x1x128xf32, #tpu.memory_space<vmem>>, vector<1x1x128xf32>
    %135 = vector.shape_cast %134 : vector<1x1x128xf32> to vector<1x128xf32>
    %136 = vector.shape_cast %133 : vector<1x128xf32> to vector<1x1x128xf32>
    tpu.vector_store %arg17[%c0_129, %c0_130, %c0_131], %136 {strides = array<i32>} : memref<1x1x128xf32, #tpu.memory_space<vmem>>, vector<1x1x128xf32>,
    return
  }
  func.func @transform_0(%arg0: i32) -> (i32, i32, i32) {
    %c0_i32 = arith.constant 0 : i32
    %c0_i32_0 = arith.constant 0 : i32
    %c0_i32_1 = arith.constant 0 : i32
    return %arg0, %c0_i32, %c0_i32_0 : i32, i32, i32
  }
  func.func @transform_1(%arg0: i32) -> (i32, i32, i32) {
    %c0_i32 = arith.constant 0 : i32
    %c0_i32_0 = arith.constant 0 : i32
    %c0_i32_1 = arith.constant 0 : i32
    return %arg0, %c0_i32, %c0_i32_0 : i32, i32, i32
  }
  func.func @transform_2(%arg0: i32) -> (i32, i32, i32, i32) {
    %c0_i32 = arith.constant 0 : i32
    %c0_i32_0 = arith.constant 0 : i32
    %c0_i32_1 = arith.constant 0 : i32
    %c0_i32_2 = arith.constant 0 : i32
    %c0_i32_3 = arith.constant 0 : i32
    return %c0_i32, %c0_i32_0, %c0_i32_1, %c0_i32_2 : i32, i32, i32, i32
  }
  func.func @transform_3(%arg0: i32) -> (i32, i32) {
    %c0_i32 = arith.constant 0 : i32
    %c0_i32_0 = arith.constant 0 : i32
    %c0_i32_1 = arith.constant 0 : i32
    return %c0_i32, %c0_i32_0 : i32, i32
  }
  func.func @transform_4(%arg0: i32) -> (i32, i32, i32, i32) {
    %c0_i32 = arith.constant 0 : i32
    %c0_i32_0 = arith.constant 0 : i32
    %c0_i32_1 = arith.constant 0 : i32
    %c0_i32_2 = arith.constant 0 : i32
    %c0_i32_3 = arith.constant 0 : i32
    return %c0_i32, %c0_i32_0, %c0_i32_1, %c0_i32_2 : i32, i32, i32, i32
  }
  func.func @transform_5(%arg0: i32) -> (i32, i32) {
    %c0_i32 = arith.constant 0 : i32
    %c0_i32_0 = arith.constant 0 : i32
    %c0_i32_1 = arith.constant 0 : i32
    return %c0_i32, %c0_i32_0 : i32, i32
  }
  func.func @transform_6(%arg0: i32) -> (i32, i32) {
    %c0_i32 = arith.constant 0 : i32
    %c0_i32_0 = arith.constant 0 : i32
    %c0_i32_1 = arith.constant 0 : i32
    return %c0_i32, %c0_i32_0 : i32, i32
  }
  func.func @transform_7(%arg0: i32) -> (i32, i32) {
    %c0_i32 = arith.constant 0 : i32
    %c0_i32_0 = arith.constant 0 : i32
    %c0_i32_1 = arith.constant 0 : i32
    return %c0_i32, %c0_i32_0 : i32, i32
  }
  func.func @transform_8(%arg0: i32) -> (i32, i32) {
    %c0_i32 = arith.constant 0 : i32
    %c0_i32_0 = arith.constant 0 : i32
    %c0_i32_1 = arith.constant 0 : i32
    return %c0_i32, %c0_i32_0 : i32, i32
  }
  func.func @transform_9(%arg0: i32) -> (i32, i32) {
    %c0_i32 = arith.constant 0 : i32
    %c0_i32_0 = arith.constant 0 : i32
    %c0_i32_1 = arith.constant 0 : i32
    return %c0_i32, %c0_i32_0 : i32, i32
  }
  func.func @transform_10(%arg0: i32) -> (i32, i32) {
    %c0_i32 = arith.constant 0 : i32
    %c0_i32_0 = arith.constant 0 : i32
    %c0_i32_1 = arith.constant 0 : i32
    return %c0_i32, %c0_i32_0 : i32, i32
  }
  func.func @transform_11(%arg0: i32) -> (i32, i32) {
    %c0_i32 = arith.constant 0 : i32
    %c0_i32_0 = arith.constant 0 : i32
    %c0_i32_1 = arith.constant 0 : i32
    return %c0_i32, %c0_i32_0 : i32, i32
  }
  func.func @transform_12(%arg0: i32) -> (i32, i32) {
    %c0_i32 = arith.constant 0 : i32
    %c0_i32_0 = arith.constant 0 : i32
    %c0_i32_1 = arith.constant 0 : i32
    return %c0_i32, %c0_i32_0 : i32, i32
  }
  func.func @transform_13(%arg0: i32) -> (i32, i32) {
    %c0_i32 = arith.constant 0 : i32
    %c0_i32_0 = arith.constant 0 : i32
    %c0_i32_1 = arith.constant 0 : i32
    return %c0_i32, %c0_i32_0 : i32, i32
  }
  func.func @transform_14(%arg0: i32) -> (i32, i32) {
    %c0_i32 = arith.constant 0 : i32
    %c0_i32_0 = arith.constant 0 : i32
    %c0_i32_1 = arith.constant 0 : i32
    return %c0_i32, %c0_i32_0 : i32, i32
  }
  func.func @transform_15(%arg0: i32) -> (i32, i32) {
    %c0_i32 = arith.constant 0 : i32
    %c0_i32_0 = arith.constant 0 : i32
    %c0_i32_1 = arith.constant 0 : i32
    return %c0_i32, %c0_i32_0 : i32, i32
  }
  func.func @transform_16(%arg0: i32) -> (i32, i32, i32) {
    %c0_i32 = arith.constant 0 : i32
    %c0_i32_0 = arith.constant 0 : i32
    %c0_i32_1 = arith.constant 0 : i32
    return %arg0, %c0_i32, %c0_i32_0 : i32, i32, i32
  }
}

</mosaic_0001>

<bundles_post_ra>
// kernel: daqn_forward.2
= control target key start
LH: loop header
LB: loop body
LE: loop exit
PB: predicated region body
PF: predicated region fallthrough
CT: control target
= control target key end

     0   :  { %vm1464_vm0 = vcmask 257024   ;;  %s3345_s1 = inlined_call_operand.vmem [shape: bf16[256,32], index: 1, kind: input, shape index: {}]   ;;  %s3346_s2 = inlined_call_operand.vmem [shape: f32[1,32], index: 2, kind: input, shape index: {}]   ;;  %s3347_s0 = inlined_call_operand.vmem [shape: bf16[800,256], index: 0, kind: input, shape index: {}]   ;;  %s3348_s3 = inlined_call_operand.vmem [shape: bf16[800,32], index: 3, kind: output, shape index: {}]  }
   0x1   :  { %v2140_v0 = vld [vmem:[%s3345_s1 + $0x38] sm:$0xff]  ;;  %v2139_v2 = vld [vmem:[%s3345_s1 + $0x30] sm:$0xff]  ;;  %v2138_v4 = vld [vmem:[%s3345_s1 + $0x28] sm:$0xff] }
   0x2   :  { %v2148_v1 = vld [vmem:[%s3345_s1 + $0x78] sm:$0xff]  ;;  %746 = vmatpush.bf16.msra.mxu0 %v2140_v0  ;;  %2149 = vmatpush.bf16.msra.mxu2 %v2140_v0  ;;  %v2147_v3 = vld [vmem:[%s3345_s1 + $0x70] sm:$0xff]  ;;  %v2146_v5 = vld [vmem:[%s3345_s1 + $0x68] sm:$0xff] }
   0x3   :  { %1005 = vmatpush.bf16.msra.mxu1 %v2148_v1  ;;  %2157 = vmatpush.bf16.msra.mxu3 %v2148_v1  ;;  %v2137_v6 = vld [vmem:[%s3345_s1 + $0x20] sm:$0xff]  ;;  %v2136_v8 = vld [vmem:[%s3345_s1 + $0x18] sm:$0xff]  ;;  %v2135_v10 = vld [vmem:[%s3345_s1 + $0x10] sm:$0xff] }
   0x4   :  { %v2145_v7 = vld [vmem:[%s3345_s1 + $0x60] sm:$0xff]  ;;  %v2144_v9 = vld [vmem:[%s3345_s1 + $0x58] sm:$0xff]  ;;  %v2143_v11 = vld [vmem:[%s3345_s1 + $0x50] sm:$0xff] }
   0x5   :  { %v2134_v12 = vld [vmem:[%s3345_s1 + $0x8] sm:$0xff]  ;;  %v2133_v14 = vld [vmem:[%s3345_s1] sm:$0xff]  ;;  %v1771_v18 = vld [vmem:[%s3347_s0 + $0x190] sm:$0xf] }
   0x6   :  { %747 = vmatpush.bf16.msra.mxu0 %v2139_v2  ;;  %2150 = vmatpush.bf16.msra.mxu2 %v2139_v2  ;;  %v2142_v13 = vld [vmem:[%s3345_s1 + $0x48] sm:$0xff]  ;;  %v2141_v15 = vld [vmem:[%s3345_s1 + $0x40] sm:$0xff]  ;;  %v2084_v19 = vld [vmem:[%s3347_s0 + $0x194] sm:$0xf0] }
   0x7   :  { %1006 = vmatpush.bf16.msra.mxu1 %v2147_v3  ;;  %2158 = vmatpush.bf16.msra.mxu3 %v2147_v3  ;;  %v1571_v16 = vld [vmem:[%s3347_s0] sm:$0xf]  ;;  %v2034_v17 = vld [vmem:[%s3347_s0 + $0x4] sm:$0xf0]  ;;  %v2033_v20 = vld [vmem:[%s3347_s0 + $0x4] sm:$0xf]  ;;  %v1772_v25 = vor.u32 %v2084_v19, %v1771_v18 }
   0x8   :  { %v1573_v21 = vld [vmem:[%s3347_s0 + $0x8] sm:$0xf0]  ;;  %v2083_v22 = vld [vmem:[%s3347_s0 + $0x194] sm:$0xf]  ;;  %v1773_v23 = vld [vmem:[%s3347_s0 + $0x198] sm:$0xf0]  ;;  %v1572_v24 = vor.u32 %v2034_v17, %v1571_v16 }
   0x9   :  { %v1576_v26 = vor.u32 %v2033_v20, %v1573_v21  ;;  %v1776_v27 = vor.u32 %v2083_v22, %v1773_v23  ;;  %v1579_v28 = vld [vmem:[%s3347_s0 + $0x10] sm:$0xf]  ;;  %v2036_v29 = vld [vmem:[%s3347_s0 + $0x14] sm:$0xf0]  ;;  %v1779_v30 = vld [vmem:[%s3347_s0 + $0x1a0] sm:$0xf] }
   0xa   :  { %748 = vmatpush.bf16.msra.mxu0 %v2138_v4  ;;  %2151 = vmatpush.bf16.msra.mxu2 %v2138_v4  ;;  %v2086_v31 = vld [vmem:[%s3347_s0 + $0x1a4] sm:$0xf0]  ;;  %v2035_v32 = vld [vmem:[%s3347_s0 + $0x14] sm:$0xf]  ;;  %v1581_v33 = vld [vmem:[%s3347_s0 + $0x18] sm:$0xf0]  ;;  %v1580_v36 = vor.u32 %v2036_v29, %v1579_v28 }
   0xb   :  { %1007 = vmatpush.bf16.msra.mxu1 %v2146_v5  ;;  %2159 = vmatpush.bf16.msra.mxu3 %v2146_v5  ;;  %v2085_v34 = vld [vmem:[%s3347_s0 + $0x1a4] sm:$0xf]  ;;  %v1781_v35 = vld [vmem:[%s3347_s0 + $0x1a8] sm:$0xf0]  ;;  %v1780_v37 = vor.u32 %v2086_v31, %v1779_v30  ;;  %v1584_v38 = vor.u32 %v2035_v32, %v1581_v33  ;;  %v1587_v40 = vld [vmem:[%s3347_s0 + $0x20] sm:$0xf] }
   0xc   :  { %v1784_v39 = vor.u32 %v2085_v34, %v1781_v35  ;;  %v2038_v41 = vld [vmem:[%s3347_s0 + $0x24] sm:$0xf0]  ;;  %v1787_v42 = vld [vmem:[%s3347_s0 + $0x1b0] sm:$0xf]  ;;  %v2088_v43 = vld [vmem:[%s3347_s0 + $0x1b4] sm:$0xf0] }
   0xd   :  { %v2037_v44 = vld [vmem:[%s3347_s0 + $0x24] sm:$0xf]  ;;  %v1589_v45 = vld [vmem:[%s3347_s0 + $0x28] sm:$0xf0]  ;;  %v2087_v46 = vld [vmem:[%s3347_s0 + $0x1b4] sm:$0xf]  ;;  %v1588_v48 = vor.u32 %v2038_v41, %v1587_v40  ;;  %v1788_v49 = vor.u32 %v2088_v43, %v1787_v42 }
   0xe   :  { %749 = vmatpush.bf16.msra.mxu0 %v2137_v6  ;;  %2152 = vmatpush.bf16.msra.mxu2 %v2137_v6  ;;  %v1789_v47 = vld [vmem:[%s3347_s0 + $0x1b8] sm:$0xf0]  ;;  %v1592_v50 = vor.u32 %v2037_v44, %v1589_v45  ;;  %v1595_v52 = vld [vmem:[%s3347_s0 + $0x30] sm:$0xf]  ;;  %v2040_v53 = vld [vmem:[%s3347_s0 + $0x34] sm:$0xf0] }
   0xf   :  { %1008 = vmatpush.bf16.msra.mxu1 %v2145_v7  ;;  %2160 = vmatpush.bf16.msra.mxu3 %v2145_v7  ;;  %v1792_v51 = vor.u32 %v2087_v46, %v1789_v47  ;;  %v1795_v54 = vld [vmem:[%s3347_s0 + $0x1c0] sm:$0xf]  ;;  %v2090_v55 = vld [vmem:[%s3347_s0 + $0x1c4] sm:$0xf0]  ;;  %v2039_v56 = vld [vmem:[%s3347_s0 + $0x34] sm:$0xf]  ;;  %v1596_v60 = vor.u32 %v2040_v53, %v1595_v52 }
  0x10   :  { %v1597_v57 = vld [vmem:[%s3347_s0 + $0x38] sm:$0xf0]  ;;  %v2089_v58 = vld [vmem:[%s3347_s0 + $0x1c4] sm:$0xf]  ;;  %v1797_v59 = vld [vmem:[%s3347_s0 + $0x1c8] sm:$0xf0]  ;;  %v1796_v61 = vor.u32 %v2090_v55, %v1795_v54 }
  0x11   :  { %v1600_v62 = vor.u32 %v2039_v56, %v1597_v57  ;;  %v1800_v63 = vor.u32 %v2089_v58, %v1797_v59  ;;  %v1603_v0 = vld [vmem:[%s3347_s0 + $0x40] sm:$0xf]  ;;  %v2042_v1 = vld [vmem:[%s3347_s0 + $0x44] sm:$0xf0]  ;;  %v1803_v2 = vld [vmem:[%s3347_s0 + $0x1d0] sm:$0xf] }
  0x12   :  { %750 = vmatpush.bf16.msra.mxu0 %v2136_v8  ;;  %2153 = vmatpush.bf16.msra.mxu2 %v2136_v8  ;;  %v2092_v3 = vld [vmem:[%s3347_s0 + $0x1d4] sm:$0xf0]  ;;  %v2041_v4 = vld [vmem:[%s3347_s0 + $0x44] sm:$0xf]  ;;  %v1605_v5 = vld [vmem:[%s3347_s0 + $0x48] sm:$0xf0]  ;;  %v1604_v8 = vor.u32 %v2042_v1, %v1603_v0 }
  0x13   :  { %1009 = vmatpush.bf16.msra.mxu1 %v2144_v9  ;;  %2161 = vmatpush.bf16.msra.mxu3 %v2144_v9  ;;  %v2091_v6 = vld [vmem:[%s3347_s0 + $0x1d4] sm:$0xf]  ;;  %v1805_v7 = vld [vmem:[%s3347_s0 + $0x1d8] sm:$0xf0]  ;;  %v1804_v9 = vor.u32 %v2092_v3, %v1803_v2  ;;  %v2093_v18 = vld [vmem:[%s3347_s0 + $0x1e4] sm:$0xf] }
  0x14   :  { %v2043_v16 = vld [vmem:[%s3347_s0 + $0x54] sm:$0xf]  ;;  %v1613_v17 = vld [vmem:[%s3347_s0 + $0x58] sm:$0xf0]  ;;  %v1813_v19 = vld [vmem:[%s3347_s0 + $0x1e8] sm:$0xf0] }
  0x15   :  { %v1616_v22 = vor.u32 %v2043_v16, %v1613_v17  ;;  %v1816_v23 = vor.u32 %v2093_v18, %v1813_v19  ;;  %v2045_v28 = vld [vmem:[%s3347_s0 + $0x64] sm:$0xf]  ;;  %v1621_v29 = vld [vmem:[%s3347_s0 + $0x68] sm:$0xf0]  ;;  %v2095_v30 = vld [vmem:[%s3347_s0 + $0x1f4] sm:$0xf] }
  0x16   :  { %751 = vmatpush.bf16.msra.mxu0 %v2135_v10  ;;  %2154 = vmatpush.bf16.msra.mxu2 %v2135_v10  ;;  %v1608_v10 = vor.u32 %v2041_v4, %v1605_v5  ;;  %v1821_v31 = vld [vmem:[%s3347_s0 + $0x1f8] sm:$0xf0]  ;;  %v1624_v34 = vor.u32 %v2045_v28, %v1621_v29  ;;  %v2047_v40 = vld [vmem:[%s3347_s0 + $0x74] sm:$0xf]  ;;  %v2097_v42 = vld [vmem:[%s3347_s0 + $0x204] sm:$0xf] }
  0x17   :  { %1010 = vmatpush.bf16.msra.mxu1 %v2143_v11  ;;  %2162 = vmatpush.bf16.msra.mxu3 %v2143_v11  ;;  %v1808_v11 = vor.u32 %v2091_v6, %v1805_v7  ;;  %v1824_v35 = vor.u32 %v2095_v30, %v1821_v31  ;;  %v1629_v41 = vld [vmem:[%s3347_s0 + $0x78] sm:$0xf0]  ;;  %v1829_v43 = vld [vmem:[%s3347_s0 + $0x208] sm:$0xf0]  ;;  %v2100_v52 = vld [vmem:[%s3347_s0 + $0x214] sm:$0xf0] }
  0x18   :  { %v1632_v46 = vor.u32 %v2047_v40, %v1629_v41  ;;  %v1832_v47 = vor.u32 %v2097_v42, %v1829_v43  ;;  %v2049_v53 = vld [vmem:[%s3347_s0 + $0x84] sm:$0xf]  ;;  %v1637_v54 = vld [vmem:[%s3347_s0 + $0x88] sm:$0xf0]  ;;  %v2099_v55 = vld [vmem:[%s3347_s0 + $0x214] sm:$0xf] }
  0x19   :  { %v1837_v56 = vld [vmem:[%s3347_s0 + $0x218] sm:$0xf0]  ;;  %v2051_v16 = vld [vmem:[%s3347_s0 + $0x94] sm:$0xf] }
  0x1a   :  { %752 = vmatpush.bf16.msra.mxu0 %v2134_v12  ;;  %2155 = vmatpush.bf16.msra.mxu2 %v2134_v12  ;;  %v1611_v12 = vld [vmem:[%s3347_s0 + $0x50] sm:$0xf]  ;;  %v1645_v17 = vld [vmem:[%s3347_s0 + $0x98] sm:$0xf0] }
  0x1b   :  { %1011 = vmatpush.bf16.msra.mxu1 %v2142_v13  ;;  %2163 = vmatpush.bf16.msra.mxu3 %v2142_v13  ;;  %v2044_v13 = vld [vmem:[%s3347_s0 + $0x54] sm:$0xf0]  ;;  %v1648_v29 = vor.u32 %v2051_v16, %v1645_v17 }
  0x1c   :  { %v1612_v20 = vor.u32 %v2044_v13, %v1611_v12  ;;  %v2052_v13 = vld [vmem:[%s3347_s0 + $0x94] sm:$0xf0] }
  0x1e   :  { %753 = vmatpush.bf16.msra.mxu0 %v2133_v14  ;;  %2156 = vmatpush.bf16.msra.mxu2 %v2133_v14  ;;  %v1811_v14 = vld [vmem:[%s3347_s0 + $0x1e0] sm:$0xf] }
  0x1f   :  { %1012 = vmatpush.bf16.msra.mxu1 %v2141_v15  ;;  %2164 = vmatpush.bf16.msra.mxu3 %v2141_v15  ;;  %v2094_v15 = vld [vmem:[%s3347_s0 + $0x1e4] sm:$0xf0] }
  0x20   :  { %v1812_v21 = vor.u32 %v2094_v15, %v1811_v14  ;;  %v1843_v14 = vld [vmem:[%s3347_s0 + $0x220] sm:$0xf]  ;;  %v2102_v15 = vld [vmem:[%s3347_s0 + $0x224] sm:$0xf0] }
  0x21   :  { %754 = vmatmul.bf16.vlgmr.msra.gmra.mxu0 %v1572_v24  ;;  %879 = vmatmul.bf16.vlgmr.msra.gmra.mxu2 %v1772_v25  ;;  %v1619_v24 = vld [vmem:[%s3347_s0 + $0x60] sm:$0xf]  ;;  %v2046_v25 = vld [vmem:[%s3347_s0 + $0x64] sm:$0xf0] }
  0x22   :  { %1013 = vmatmul.bf16.vlgmr.msra.gmra.mxu1 %v1576_v26  ;;  %1138 = vmatmul.bf16.vlgmr.msra.gmra.mxu3 %v1776_v27  ;;  %v1819_v26 = vld [vmem:[%s3347_s0 + $0x1f0] sm:$0xf]  ;;  %v2096_v27 = vld [vmem:[%s3347_s0 + $0x1f4] sm:$0xf0]  ;;  %v1620_v32 = vor.u32 %v2046_v25, %v1619_v24 }
  0x23   :  { %v1820_v33 = vor.u32 %v2096_v27, %v1819_v26  ;;  %v1844_v27 = vor.u32 %v2102_v15, %v1843_v14 }
  0x31   :  { %759 = vmatmul.bf16.gmra.mxu0 %v1580_v36  ;;  %884 = vmatmul.bf16.gmra.mxu2 %v1780_v37  ;;  %v1627_v36 = vld [vmem:[%s3347_s0 + $0x70] sm:$0xf]  ;;  %v2048_v37 = vld [vmem:[%s3347_s0 + $0x74] sm:$0xf0] }
  0x32   :  { %1018 = vmatmul.bf16.gmra.mxu1 %v1584_v38  ;;  %1143 = vmatmul.bf16.gmra.mxu3 %v1784_v39  ;;  %v1827_v38 = vld [vmem:[%s3347_s0 + $0x200] sm:$0xf]  ;;  %v2098_v39 = vld [vmem:[%s3347_s0 + $0x204] sm:$0xf0]  ;;  %v1628_v44 = vor.u32 %v2048_v37, %v1627_v36 }
  0x33   :  { %v1828_v45 = vor.u32 %v2098_v39, %v1827_v38 }
  0x41   :  { %764 = vmatmul.bf16.gmra.mxu0 %v1588_v48  ;;  %889 = vmatmul.bf16.gmra.mxu2 %v1788_v49  ;;  %v2430_v48 = vld [vmem:[%s3346_s2] ss:$0 sm:$0xff] }
  0x42   :  { %1023 = vmatmul.bf16.gmra.mxu1 %v1592_v50  ;;  %1148 = vmatmul.bf16.gmra.mxu3 %v1792_v51  ;;  %v1635_v49 = vld [vmem:[%s3347_s0 + $0x80] sm:$0xf]  ;;  %v2050_v50 = vld [vmem:[%s3347_s0 + $0x84] sm:$0xf0]  ;;  %v1835_v51 = vld [vmem:[%s3347_s0 + $0x210] sm:$0xf] }
  0x43   :  { %v1636_v57 = vor.u32 %v2050_v50, %v1635_v49  ;;  %v1836_v58 = vor.u32 %v2100_v52, %v1835_v51  ;;  %v2054_v50 = vld [vmem:[%s3347_s0 + $0xa4] sm:$0xf0]  ;;  %v1851_v51 = vld [vmem:[%s3347_s0 + $0x230] sm:$0xf]  ;;  %v2104_v52 = vld [vmem:[%s3347_s0 + $0x234] sm:$0xf0] }
  0x51   :  { %769 = vmatmul.bf16.gmra.mxu0 %v1596_v60  ;;  %894 = vmatmul.bf16.gmra.mxu2 %v1796_v61  ;;  %v1640_v60 = vor.u32 %v2049_v53, %v1637_v54  ;;  %v1840_v61 = vor.u32 %v2099_v55, %v1837_v56  ;;  %v2053_v53 = vld [vmem:[%s3347_s0 + $0xa4] sm:$0xf]  ;;  %v1653_v54 = vld [vmem:[%s3347_s0 + $0xa8] sm:$0xf0] }
  0x52   :  { %1028 = vmatmul.bf16.gmra.mxu1 %v1600_v62  ;;  %1153 = vmatmul.bf16.gmra.mxu3 %v1800_v63 }
  0x61   :  { %774 = vmatmul.bf16.gmra.mxu0 %v1604_v8  ;;  %899 = vmatmul.bf16.gmra.mxu2 %v1804_v9 }
  0x62   :  { %1033 = vmatmul.bf16.gmra.mxu1 %v1608_v10  ;;  %1158 = vmatmul.bf16.gmra.mxu3 %v1808_v11  ;;  %v1643_v10 = vld [vmem:[%s3347_s0 + $0x90] sm:$0xf] }
  0x63   :  { %v1644_v26 = vor.u32 %v2052_v13, %v1643_v10 }
  0x71   :  { %779 = vmatmul.bf16.gmra.mxu0 %v1612_v20  ;;  %904 = vmatmul.bf16.gmra.mxu2 %v1812_v21  ;;  %v2101_v20 = vld [vmem:[%s3347_s0 + $0x224] sm:$0xf]  ;;  %v1845_v21 = vld [vmem:[%s3347_s0 + $0x228] sm:$0xf0] }
  0x72   :  { %1038 = vmatmul.bf16.gmra.mxu1 %v1616_v22  ;;  %1163 = vmatmul.bf16.gmra.mxu3 %v1816_v23  ;;  %v1848_v30 = vor.u32 %v2101_v20, %v1845_v21 }
  0x81   :  { %784 = vmatmul.bf16.gmra.mxu0 %v1620_v32  ;;  %909 = vmatmul.bf16.gmra.mxu2 %v1820_v33 }
  0x82   :  { %1043 = vmatmul.bf16.gmra.mxu1 %v1624_v34  ;;  %1168 = vmatmul.bf16.gmra.mxu3 %v1824_v35 }
  0x91   :  { %789 = vmatmul.bf16.gmra.mxu0 %v1628_v44  ;;  %914 = vmatmul.bf16.gmra.mxu2 %v1828_v45 }
  0x92   :  { %1048 = vmatmul.bf16.gmra.mxu1 %v1632_v46  ;;  %1173 = vmatmul.bf16.gmra.mxu3 %v1832_v47  ;;  %v1651_v46 = vld [vmem:[%s3347_s0 + $0xa0] sm:$0xf] }
  0x9e   :  { %v755_v59 = vpop.f32.mrf.mxu0 }
  0x9f   :  { %v756_v62 = vadd.f32 %v2430_v48, %v755_v59  ;;  %v1014_v63 = vpop.f32.mrf.mxu1 }
  0xa1   :  { %v1015_v0 = vadd.f32 %v1014_v63, %v756_v62  ;;  %794 = vmatmul.bf16.gmra.mxu0 %v1636_v57  ;;  %919 = vmatmul.bf16.gmra.mxu2 %v1836_v58  ;;  %v2103_v57 = vld [vmem:[%s3347_s0 + $0x234] sm:$0xf]  ;;  %v1853_v58 = vld [vmem:[%s3347_s0 + $0x238] sm:$0xf0]  ;;  %v1652_v63 = vor.u32 %v2054_v50, %v1651_v46 }
  0xa2   :  { %1053 = vmatmul.bf16.gmra.mxu1 %v1640_v60  ;;  %1178 = vmatmul.bf16.gmra.mxu3 %v1840_v61 }
  0xa3   :  { %v1264_v1 = vmax.f32 %v1015_v0, 0.0  ;;  %v1852_v0 = vor.u32 %v2104_v52, %v1851_v51 }
  0xa4   :  { %v880_v2 = vpop.f32.mrf.mxu2 }
  0xa5   :  { %v1364_v3 = vpack.c.bf16 %v1264_v1, %v1264_v1  ;;  %v881_v4 = vadd.f32 %v2430_v48, %v880_v2  ;;  %v1139_v5 = vpop.f32.mrf.mxu3  ;;  %v1656_v2 = vor.u32 %v2053_v53, %v1653_v54 }
  0xa6   :  { %v757_v6 = vpop.f32.mrf.mxu0 }
  0xa7   :  { %1465 = vst.msk [vmem:[%s3348_s3] sm:$0xf] %vm1464_vm0, %v1364_v3  ;;  %v1140_v7 = vadd.f32 %v1139_v5, %v881_v4  ;;  %v758_v8 = vadd.f32 %v2430_v48, %v757_v6  ;;  %v1016_v9 = vpop.f32.mrf.mxu1  ;;  %v1856_v3 = vor.u32 %v2103_v57, %v1853_v58 }
  0xa9   :  { %v1314_v11 = vmax.f32 %v1140_v7, 0.0  ;;  %v1017_v12 = vadd.f32 %v1016_v9, %v758_v8 }
  0xab   :  { %v1414_v18 = vpack.c.bf16 %v1314_v11, %v1314_v11  ;;  %v1265_v19 = vmax.f32 %v1017_v12, 0.0 }
  0xac   :  { %v882_v22 = vpop.f32.mrf.mxu2 }
  0xad   :  { %1515 = vst.msk [vmem:[%s3348_s3 + $0xc8] sm:$0xf] %vm1464_vm0, %v1414_v18  ;;  %v1365_v23 = vpack.c.bf16 %v1265_v19, %v1265_v19  ;;  %v883_v24 = vadd.f32 %v2430_v48, %v882_v22  ;;  %v1141_v25 = vpop.f32.mrf.mxu3  ;;  %v1659_v19 = vld [vmem:[%s3347_s0 + $0xb0] sm:$0xf]  ;;  %v2056_v22 = vld [vmem:[%s3347_s0 + $0xb4] sm:$0xf0] }
  0xae   :  { %v760_v28 = vpop.f32.mrf.mxu0 }
  0xaf   :  { %1466 = vst.msk [vmem:[%s3348_s3 + $0x4] sm:$0xf] %vm1464_vm0, %v1365_v23  ;;  %v1142_v31 = vadd.f32 %v1141_v25, %v883_v24  ;;  %v761_v32 = vadd.f32 %v2430_v48, %v760_v28  ;;  %v1019_v33 = vpop.f32.mrf.mxu1  ;;  %v1859_v23 = vld [vmem:[%s3347_s0 + $0x240] sm:$0xf]  ;;  %v2106_v24 = vld [vmem:[%s3347_s0 + $0x244] sm:$0xf0] }
  0xb0   :  { %v2055_v25 = vld [vmem:[%s3347_s0 + $0xb4] sm:$0xf] }
  0xb1   :  { %v1315_v34 = vmax.f32 %v1142_v31, 0.0  ;;  %v1020_v35 = vadd.f32 %v1019_v33, %v761_v32  ;;  %799 = vmatmul.bf16.gmra.mxu0 %v1644_v26  ;;  %924 = vmatmul.bf16.gmra.mxu2 %v1844_v27  ;;  %v1661_v26 = vld [vmem:[%s3347_s0 + $0xb8] sm:$0xf0] }
  0xb2   :  { %1058 = vmatmul.bf16.gmra.mxu1 %v1648_v29  ;;  %1183 = vmatmul.bf16.gmra.mxu3 %v1848_v30  ;;  %v2105_v29 = vld [vmem:[%s3347_s0 + $0x244] sm:$0xf]  ;;  %v1861_v30 = vld [vmem:[%s3347_s0 + $0x248] sm:$0xf0] }
  0xb3   :  { %v1415_v36 = vpack.c.bf16 %v1315_v34, %v1315_v34  ;;  %v1266_v37 = vmax.f32 %v1020_v35, 0.0  ;;  %v1660_v35 = vor.u32 %v2056_v22, %v1659_v19 }
  0xb4   :  { %v885_v38 = vpop.f32.mrf.mxu2 }
  0xb5   :  { %1516 = vst.msk [vmem:[%s3348_s3 + $0xcc] sm:$0xf] %vm1464_vm0, %v1415_v36  ;;  %v1366_v39 = vpack.c.bf16 %v1266_v37, %v1266_v37  ;;  %v886_v40 = vadd.f32 %v2430_v48, %v885_v38  ;;  %v1144_v41 = vpop.f32.mrf.mxu3  ;;  %v1860_v36 = vor.u32 %v2106_v24, %v1859_v23  ;;  %v1664_v38 = vor.u32 %v2055_v25, %v1661_v26 }
  0xb6   :  { %v762_v42 = vpop.f32.mrf.mxu0 }
  0xb7   :  { %1467 = vst.msk [vmem:[%s3348_s3 + $0x8] sm:$0xf] %vm1464_vm0, %v1366_v39  ;;  %v1145_v43 = vadd.f32 %v1144_v41, %v886_v40  ;;  %v763_v44 = vadd.f32 %v2430_v48, %v762_v42  ;;  %v1021_v45 = vpop.f32.mrf.mxu1  ;;  %v1864_v39 = vor.u32 %v2105_v29, %v1861_v30 }
  0xb9   :  { %v1316_v47 = vmax.f32 %v1145_v43, 0.0  ;;  %v1022_v49 = vadd.f32 %v1021_v45, %v763_v44 }
  0xbb   :  { %v1416_v55 = vpack.c.bf16 %v1316_v47, %v1316_v47  ;;  %v1267_v56 = vmax.f32 %v1022_v49, 0.0 }
  0xbc   :  { %v887_v59 = vpop.f32.mrf.mxu2 }
  0xbd   :  { %1517 = vst.msk [vmem:[%s3348_s3 + $0xd0] sm:$0xf] %vm1464_vm0, %v1416_v55  ;;  %v1367_v60 = vpack.c.bf16 %v1267_v56, %v1267_v56  ;;  %v888_v61 = vadd.f32 %v2430_v48, %v887_v59  ;;  %v1146_v62 = vpop.f32.mrf.mxu3  ;;  %v1667_v56 = vld [vmem:[%s3347_s0 + $0xc0] sm:$0xf]  ;;  %v2058_v59 = vld [vmem:[%s3347_s0 + $0xc4] sm:$0xf0] }
  0xbe   :  { %v765_v1 = vpop.f32.mrf.mxu0 }
  0xbf   :  { %1468 = vst.msk [vmem:[%s3348_s3 + $0xc] sm:$0xf] %vm1464_vm0, %v1367_v60  ;;  %v1147_v4 = vadd.f32 %v1146_v62, %v888_v61  ;;  %v766_v5 = vadd.f32 %v2430_v48, %v765_v1  ;;  %v1024_v6 = vpop.f32.mrf.mxu1  ;;  %v1867_v60 = vld [vmem:[%s3347_s0 + $0x250] sm:$0xf]  ;;  %v2108_v61 = vld [vmem:[%s3347_s0 + $0x254] sm:$0xf0] }
  0xc0   :  { %v2057_v62 = vld [vmem:[%s3347_s0 + $0xc4] sm:$0xf] }
  0xc1   :  { %v1317_v7 = vmax.f32 %v1147_v4, 0.0  ;;  %v1025_v8 = vadd.f32 %v1024_v6, %v766_v5  ;;  %804 = vmatmul.bf16.gmra.mxu0 %v1652_v63  ;;  %929 = vmatmul.bf16.gmra.mxu2 %v1852_v0  ;;  %v1669_v63 = vld [vmem:[%s3347_s0 + $0xc8] sm:$0xf0] }
  0xc2   :  { %1063 = vmatmul.bf16.gmra.mxu1 %v1656_v2  ;;  %1188 = vmatmul.bf16.gmra.mxu3 %v1856_v3  ;;  %v2107_v2 = vld [vmem:[%s3347_s0 + $0x254] sm:$0xf]  ;;  %v1869_v3 = vld [vmem:[%s3347_s0 + $0x258] sm:$0xf0] }
  0xc3   :  { %v1417_v9 = vpack.c.bf16 %v1317_v7, %v1317_v7  ;;  %v1268_v10 = vmax.f32 %v1025_v8, 0.0  ;;  %v1668_v8 = vor.u32 %v2058_v59, %v1667_v56 }
  0xc4   :  { %v890_v11 = vpop.f32.mrf.mxu2 }
  0xc5   :  { %1518 = vst.msk [vmem:[%s3348_s3 + $0xd4] sm:$0xf] %vm1464_vm0, %v1417_v9  ;;  %v1368_v12 = vpack.c.bf16 %v1268_v10, %v1268_v10  ;;  %v891_v13 = vadd.f32 %v2430_v48, %v890_v11  ;;  %v1149_v14 = vpop.f32.mrf.mxu3  ;;  %v1868_v9 = vor.u32 %v2108_v61, %v1867_v60  ;;  %v1672_v11 = vor.u32 %v2057_v62, %v1669_v63 }
  0xc6   :  { %v767_v15 = vpop.f32.mrf.mxu0 }
  0xc7   :  { %1469 = vst.msk [vmem:[%s3348_s3 + $0x10] sm:$0xf] %vm1464_vm0, %v1368_v12  ;;  %v1150_v16 = vadd.f32 %v1149_v14, %v891_v13  ;;  %v768_v17 = vadd.f32 %v2430_v48, %v767_v15  ;;  %v1026_v18 = vpop.f32.mrf.mxu1  ;;  %v1872_v12 = vor.u32 %v2107_v2, %v1869_v3 }
  0xc9   :  { %v1318_v20 = vmax.f32 %v1150_v16, 0.0  ;;  %v1027_v21 = vadd.f32 %v1026_v18, %v768_v17 }
  0xcb   :  { %v1418_v27 = vpack.c.bf16 %v1318_v20, %v1318_v20  ;;  %v1269_v28 = vmax.f32 %v1027_v21, 0.0 }
  0xcc   :  { %v892_v31 = vpop.f32.mrf.mxu2 }
  0xcd   :  { %1519 = vst.msk [vmem:[%s3348_s3 + $0xd8] sm:$0xf] %vm1464_vm0, %v1418_v27  ;;  %v1369_v32 = vpack.c.bf16 %v1269_v28, %v1269_v28  ;;  %v893_v33 = vadd.f32 %v2430_v48, %v892_v31  ;;  %v1151_v34 = vpop.f32.mrf.mxu3  ;;  %v1675_v28 = vld [vmem:[%s3347_s0 + $0xd0] sm:$0xf]  ;;  %v2060_v31 = vld [vmem:[%s3347_s0 + $0xd4] sm:$0xf0] }
  0xce   :  { %v770_v37 = vpop.f32.mrf.mxu0 }
  0xcf   :  { %1470 = vst.msk [vmem:[%s3348_s3 + $0x14] sm:$0xf] %vm1464_vm0, %v1369_v32  ;;  %v1152_v40 = vadd.f32 %v1151_v34, %v893_v33  ;;  %v771_v41 = vadd.f32 %v2430_v48, %v770_v37  ;;  %v1029_v42 = vpop.f32.mrf.mxu1  ;;  %v1875_v32 = vld [vmem:[%s3347_s0 + $0x260] sm:$0xf]  ;;  %v2110_v33 = vld [vmem:[%s3347_s0 + $0x264] sm:$0xf0] }
  0xd0   :  { %v2059_v34 = vld [vmem:[%s3347_s0 + $0xd4] sm:$0xf] }
  0xd1   :  { %v1319_v43 = vmax.f32 %v1152_v40, 0.0  ;;  %v1030_v44 = vadd.f32 %v1029_v42, %v771_v41  ;;  %809 = vmatmul.bf16.gmra.mxu0 %v1660_v35  ;;  %934 = vmatmul.bf16.gmra.mxu2 %v1860_v36  ;;  %v1677_v35 = vld [vmem:[%s3347_s0 + $0xd8] sm:$0xf0] }
  0xd2   :  { %1068 = vmatmul.bf16.gmra.mxu1 %v1664_v38  ;;  %1193 = vmatmul.bf16.gmra.mxu3 %v1864_v39  ;;  %v2109_v38 = vld [vmem:[%s3347_s0 + $0x264] sm:$0xf]  ;;  %v1877_v39 = vld [vmem:[%s3347_s0 + $0x268] sm:$0xf0] }
  0xd3   :  { %v1419_v45 = vpack.c.bf16 %v1319_v43, %v1319_v43  ;;  %v1270_v46 = vmax.f32 %v1030_v44, 0.0  ;;  %v1676_v44 = vor.u32 %v2060_v31, %v1675_v28 }
  0xd4   :  { %v895_v47 = vpop.f32.mrf.mxu2 }
  0xd5   :  { %1520 = vst.msk [vmem:[%s3348_s3 + $0xdc] sm:$0xf] %vm1464_vm0, %v1419_v45  ;;  %v1370_v49 = vpack.c.bf16 %v1270_v46, %v1270_v46  ;;  %v896_v50 = vadd.f32 %v2430_v48, %v895_v47  ;;  %v1154_v51 = vpop.f32.mrf.mxu3  ;;  %v1876_v45 = vor.u32 %v2110_v33, %v1875_v32  ;;  %v1680_v47 = vor.u32 %v2059_v34, %v1677_v35 }
  0xd6   :  { %v772_v52 = vpop.f32.mrf.mxu0 }
  0xd7   :  { %1471 = vst.msk [vmem:[%s3348_s3 + $0x18] sm:$0xf] %vm1464_vm0, %v1370_v49  ;;  %v1155_v53 = vadd.f32 %v1154_v51, %v896_v50  ;;  %v773_v54 = vadd.f32 %v2430_v48, %v772_v52  ;;  %v1031_v55 = vpop.f32.mrf.mxu1  ;;  %v1880_v49 = vor.u32 %v2109_v38, %v1877_v39 }
  0xd9   :  { %v1320_v57 = vmax.f32 %v1155_v53, 0.0  ;;  %v1032_v58 = vadd.f32 %v1031_v55, %v773_v54 }
  0xdb   :  { %v1420_v0 = vpack.c.bf16 %v1320_v57, %v1320_v57  ;;  %v1271_v1 = vmax.f32 %v1032_v58, 0.0 }
  0xdc   :  { %v897_v4 = vpop.f32.mrf.mxu2 }
  0xdd   :  { %1521 = vst.msk [vmem:[%s3348_s3 + $0xe0] sm:$0xf] %vm1464_vm0, %v1420_v0  ;;  %v1371_v5 = vpack.c.bf16 %v1271_v1, %v1271_v1  ;;  %v898_v6 = vadd.f32 %v2430_v48, %v897_v4  ;;  %v1156_v7 = vpop.f32.mrf.mxu3  ;;  %v1683_v1 = vld [vmem:[%s3347_s0 + $0xe0] sm:$0xf]  ;;  %v2062_v4 = vld [vmem:[%s3347_s0 + $0xe4] sm:$0xf0] }
  0xde   :  { %v775_v10 = vpop.f32.mrf.mxu0 }
  0xdf   :  { %1472 = vst.msk [vmem:[%s3348_s3 + $0x1c] sm:$0xf] %vm1464_vm0, %v1371_v5  ;;  %v1157_v13 = vadd.f32 %v1156_v7, %v898_v6  ;;  %v776_v14 = vadd.f32 %v2430_v48, %v775_v10  ;;  %v1034_v15 = vpop.f32.mrf.mxu1  ;;  %v1883_v5 = vld [vmem:[%s3347_s0 + $0x270] sm:$0xf]  ;;  %v2112_v6 = vld [vmem:[%s3347_s0 + $0x274] sm:$0xf0] }
  0xe0   :  { %v2061_v7 = vld [vmem:[%s3347_s0 + $0xe4] sm:$0xf] }
  0xe1   :  { %v1321_v16 = vmax.f32 %v1157_v13, 0.0  ;;  %v1035_v17 = vadd.f32 %v1034_v15, %v776_v14  ;;  %814 = vmatmul.bf16.gmra.mxu0 %v1668_v8  ;;  %939 = vmatmul.bf16.gmra.mxu2 %v1868_v9  ;;  %v1685_v8 = vld [vmem:[%s3347_s0 + $0xe8] sm:$0xf0] }
  0xe2   :  { %1073 = vmatmul.bf16.gmra.mxu1 %v1672_v11  ;;  %1198 = vmatmul.bf16.gmra.mxu3 %v1872_v12  ;;  %v2111_v11 = vld [vmem:[%s3347_s0 + $0x274] sm:$0xf]  ;;  %v1885_v12 = vld [vmem:[%s3347_s0 + $0x278] sm:$0xf0] }
  0xe3   :  { %v1421_v18 = vpack.c.bf16 %v1321_v16, %v1321_v16  ;;  %v1272_v19 = vmax.f32 %v1035_v17, 0.0  ;;  %v1684_v17 = vor.u32 %v2062_v4, %v1683_v1 }
  0xe4   :  { %v900_v20 = vpop.f32.mrf.mxu2 }
  0xe5   :  { %1522 = vst.msk [vmem:[%s3348_s3 + $0xe4] sm:$0xf] %vm1464_vm0, %v1421_v18  ;;  %v1372_v21 = vpack.c.bf16 %v1272_v19, %v1272_v19  ;;  %v901_v22 = vadd.f32 %v2430_v48, %v900_v20  ;;  %v1159_v23 = vpop.f32.mrf.mxu3  ;;  %v1884_v18 = vor.u32 %v2112_v6, %v1883_v5  ;;  %v1688_v20 = vor.u32 %v2061_v7, %v1685_v8 }
  0xe6   :  { %v777_v24 = vpop.f32.mrf.mxu0 }
  0xe7   :  { %1473 = vst.msk [vmem:[%s3348_s3 + $0x20] sm:$0xf] %vm1464_vm0, %v1372_v21  ;;  %v1160_v25 = vadd.f32 %v1159_v23, %v901_v22  ;;  %v778_v26 = vadd.f32 %v2430_v48, %v777_v24  ;;  %v1036_v27 = vpop.f32.mrf.mxu1  ;;  %v1888_v21 = vor.u32 %v2111_v11, %v1885_v12 }
  0xe9   :  { %v1322_v29 = vmax.f32 %v1160_v25, 0.0  ;;  %v1037_v30 = vadd.f32 %v1036_v27, %v778_v26 }
  0xeb   :  { %v1422_v36 = vpack.c.bf16 %v1322_v29, %v1322_v29  ;;  %v1273_v37 = vmax.f32 %v1037_v30, 0.0 }
  0xec   :  { %v902_v40 = vpop.f32.mrf.mxu2 }
  0xed   :  { %1523 = vst.msk [vmem:[%s3348_s3 + $0xe8] sm:$0xf] %vm1464_vm0, %v1422_v36  ;;  %v1373_v41 = vpack.c.bf16 %v1273_v37, %v1273_v37  ;;  %v903_v42 = vadd.f32 %v2430_v48, %v902_v40  ;;  %v1161_v43 = vpop.f32.mrf.mxu3  ;;  %v1691_v37 = vld [vmem:[%s3347_s0 + $0xf0] sm:$0xf]  ;;  %v2064_v40 = vld [vmem:[%s3347_s0 + $0xf4] sm:$0xf0] }
  0xee   :  { %v780_v46 = vpop.f32.mrf.mxu0 }
  0xef   :  { %1474 = vst.msk [vmem:[%s3348_s3 + $0x24] sm:$0xf] %vm1464_vm0, %v1373_v41  ;;  %v1162_v50 = vadd.f32 %v1161_v43, %v903_v42  ;;  %v781_v51 = vadd.f32 %v2430_v48, %v780_v46  ;;  %v1039_v52 = vpop.f32.mrf.mxu1  ;;  %v1891_v41 = vld [vmem:[%s3347_s0 + $0x280] sm:$0xf]  ;;  %v2114_v42 = vld [vmem:[%s3347_s0 + $0x284] sm:$0xf0] }
  0xf0   :  { %v2063_v43 = vld [vmem:[%s3347_s0 + $0xf4] sm:$0xf] }
  0xf1   :  { %v1323_v53 = vmax.f32 %v1162_v50, 0.0  ;;  %v1040_v54 = vadd.f32 %v1039_v52, %v781_v51  ;;  %819 = vmatmul.bf16.gmra.mxu0 %v1676_v44  ;;  %944 = vmatmul.bf16.gmra.mxu2 %v1876_v45  ;;  %v1693_v44 = vld [vmem:[%s3347_s0 + $0xf8] sm:$0xf0] }
  0xf2   :  { %1078 = vmatmul.bf16.gmra.mxu1 %v1680_v47  ;;  %1203 = vmatmul.bf16.gmra.mxu3 %v1880_v49  ;;  %v2113_v47 = vld [vmem:[%s3347_s0 + $0x284] sm:$0xf]  ;;  %v1893_v49 = vld [vmem:[%s3347_s0 + $0x288] sm:$0xf0] }
  0xf3   :  { %v1423_v55 = vpack.c.bf16 %v1323_v53, %v1323_v53  ;;  %v1274_v56 = vmax.f32 %v1040_v54, 0.0  ;;  %v1692_v54 = vor.u32 %v2064_v40, %v1691_v37 }
  0xf4   :  { %v905_v57 = vpop.f32.mrf.mxu2 }
  0xf5   :  { %1524 = vst.msk [vmem:[%s3348_s3 + $0xec] sm:$0xf] %vm1464_vm0, %v1423_v55  ;;  %v1374_v58 = vpack.c.bf16 %v1274_v56, %v1274_v56  ;;  %v906_v59 = vadd.f32 %v2430_v48, %v905_v57  ;;  %v1164_v60 = vpop.f32.mrf.mxu3  ;;  %v1892_v55 = vor.u32 %v2114_v42, %v1891_v41  ;;  %v1696_v57 = vor.u32 %v2063_v43, %v1693_v44 }
  0xf6   :  { %v782_v61 = vpop.f32.mrf.mxu0 }
  0xf7   :  { %1475 = vst.msk [vmem:[%s3348_s3 + $0x28] sm:$0xf] %vm1464_vm0, %v1374_v58  ;;  %v1165_v62 = vadd.f32 %v1164_v60, %v906_v59  ;;  %v783_v63 = vadd.f32 %v2430_v48, %v782_v61  ;;  %v1041_v0 = vpop.f32.mrf.mxu1  ;;  %v1896_v58 = vor.u32 %v2113_v47, %v1893_v49 }
  0xf9   :  { %v1324_v2 = vmax.f32 %v1165_v62, 0.0  ;;  %v1042_v3 = vadd.f32 %v1041_v0, %v783_v63 }
  0xfb   :  { %v1424_v9 = vpack.c.bf16 %v1324_v2, %v1324_v2  ;;  %v1275_v10 = vmax.f32 %v1042_v3, 0.0 }
  0xfc   :  { %v907_v13 = vpop.f32.mrf.mxu2 }
  0xfd   :  { %1525 = vst.msk [vmem:[%s3348_s3 + $0xf0] sm:$0xf] %vm1464_vm0, %v1424_v9  ;;  %v1375_v14 = vpack.c.bf16 %v1275_v10, %v1275_v10  ;;  %v908_v15 = vadd.f32 %v2430_v48, %v907_v13  ;;  %v1166_v16 = vpop.f32.mrf.mxu3  ;;  %v1699_v10 = vld [vmem:[%s3347_s0 + $0x100] sm:$0xf]  ;;  %v2066_v13 = vld [vmem:[%s3347_s0 + $0x104] sm:$0xf0] }
  0xfe   :  { %v785_v19 = vpop.f32.mrf.mxu0 }
  0xff   :  { %1476 = vst.msk [vmem:[%s3348_s3 + $0x2c] sm:$0xf] %vm1464_vm0, %v1375_v14  ;;  %v1167_v22 = vadd.f32 %v1166_v16, %v908_v15  ;;  %v786_v23 = vadd.f32 %v2430_v48, %v785_v19  ;;  %v1044_v24 = vpop.f32.mrf.mxu1  ;;  %v1899_v14 = vld [vmem:[%s3347_s0 + $0x290] sm:$0xf]  ;;  %v2116_v15 = vld [vmem:[%s3347_s0 + $0x294] sm:$0xf0] }
 0x100   :  { %v2065_v16 = vld [vmem:[%s3347_s0 + $0x104] sm:$0xf] }
 0x101   :  { %v1325_v25 = vmax.f32 %v1167_v22, 0.0  ;;  %v1045_v26 = vadd.f32 %v1044_v24, %v786_v23  ;;  %824 = vmatmul.bf16.gmra.mxu0 %v1684_v17  ;;  %949 = vmatmul.bf16.gmra.mxu2 %v1884_v18  ;;  %v1701_v17 = vld [vmem:[%s3347_s0 + $0x108] sm:$0xf0] }
 0x102   :  { %1083 = vmatmul.bf16.gmra.mxu1 %v1688_v20  ;;  %1208 = vmatmul.bf16.gmra.mxu3 %v1888_v21  ;;  %v2115_v20 = vld [vmem:[%s3347_s0 + $0x294] sm:$0xf]  ;;  %v1901_v21 = vld [vmem:[%s3347_s0 + $0x298] sm:$0xf0] }
 0x103   :  { %v1425_v27 = vpack.c.bf16 %v1325_v25, %v1325_v25  ;;  %v1276_v28 = vmax.f32 %v1045_v26, 0.0  ;;  %v1700_v26 = vor.u32 %v2066_v13, %v1699_v10 }
 0x104   :  { %v910_v29 = vpop.f32.mrf.mxu2 }
 0x105   :  { %1526 = vst.msk [vmem:[%s3348_s3 + $0xf4] sm:$0xf] %vm1464_vm0, %v1425_v27  ;;  %v1376_v30 = vpack.c.bf16 %v1276_v28, %v1276_v28  ;;  %v911_v31 = vadd.f32 %v2430_v48, %v910_v29  ;;  %v1169_v32 = vpop.f32.mrf.mxu3  ;;  %v1900_v27 = vor.u32 %v2116_v15, %v1899_v14  ;;  %v1704_v29 = vor.u32 %v2065_v16, %v1701_v17 }
 0x106   :  { %v787_v33 = vpop.f32.mrf.mxu0 }
 0x107   :  { %1477 = vst.msk [vmem:[%s3348_s3 + $0x30] sm:$0xf] %vm1464_vm0, %v1376_v30  ;;  %v1170_v34 = vadd.f32 %v1169_v32, %v911_v31  ;;  %v788_v35 = vadd.f32 %v2430_v48, %v787_v33  ;;  %v1046_v36 = vpop.f32.mrf.mxu1  ;;  %v1904_v30 = vor.u32 %v2115_v20, %v1901_v21 }
 0x109   :  { %v1326_v38 = vmax.f32 %v1170_v34, 0.0  ;;  %v1047_v39 = vadd.f32 %v1046_v36, %v788_v35 }
 0x10b   :  { %v1426_v45 = vpack.c.bf16 %v1326_v38, %v1326_v38  ;;  %v1277_v46 = vmax.f32 %v1047_v39, 0.0 }
 0x10c   :  { %v912_v50 = vpop.f32.mrf.mxu2 }
 0x10d   :  { %1527 = vst.msk [vmem:[%s3348_s3 + $0xf8] sm:$0xf] %vm1464_vm0, %v1426_v45  ;;  %v1377_v51 = vpack.c.bf16 %v1277_v46, %v1277_v46  ;;  %v913_v52 = vadd.f32 %v2430_v48, %v912_v50  ;;  %v1171_v53 = vpop.f32.mrf.mxu3  ;;  %v1707_v46 = vld [vmem:[%s3347_s0 + $0x110] sm:$0xf]  ;;  %v2068_v50 = vld [vmem:[%s3347_s0 + $0x114] sm:$0xf0] }
 0x10e   :  { %v790_v56 = vpop.f32.mrf.mxu0 }
 0x10f   :  { %1478 = vst.msk [vmem:[%s3348_s3 + $0x34] sm:$0xf] %vm1464_vm0, %v1377_v51  ;;  %v1172_v59 = vadd.f32 %v1171_v53, %v913_v52  ;;  %v791_v60 = vadd.f32 %v2430_v48, %v790_v56  ;;  %v1049_v61 = vpop.f32.mrf.mxu1  ;;  %v1907_v51 = vld [vmem:[%s3347_s0 + $0x2a0] sm:$0xf]  ;;  %v2118_v52 = vld [vmem:[%s3347_s0 + $0x2a4] sm:$0xf0] }
 0x110   :  { %v2067_v53 = vld [vmem:[%s3347_s0 + $0x114] sm:$0xf] }
 0x111   :  { %v1327_v62 = vmax.f32 %v1172_v59, 0.0  ;;  %v1050_v63 = vadd.f32 %v1049_v61, %v791_v60  ;;  %829 = vmatmul.bf16.gmra.mxu0 %v1692_v54  ;;  %954 = vmatmul.bf16.gmra.mxu2 %v1892_v55  ;;  %v1709_v54 = vld [vmem:[%s3347_s0 + $0x118] sm:$0xf0] }
 0x112   :  { %1088 = vmatmul.bf16.gmra.mxu1 %v1696_v57  ;;  %1213 = vmatmul.bf16.gmra.mxu3 %v1896_v58  ;;  %v2117_v57 = vld [vmem:[%s3347_s0 + $0x2a4] sm:$0xf]  ;;  %v1909_v58 = vld [vmem:[%s3347_s0 + $0x2a8] sm:$0xf0] }
 0x113   :  { %v1427_v0 = vpack.c.bf16 %v1327_v62, %v1327_v62  ;;  %v1278_v1 = vmax.f32 %v1050_v63, 0.0  ;;  %v1708_v63 = vor.u32 %v2068_v50, %v1707_v46 }
 0x114   :  { %v915_v2 = vpop.f32.mrf.mxu2 }
 0x115   :  { %1528 = vst.msk [vmem:[%s3348_s3 + $0xfc] sm:$0xf] %vm1464_vm0, %v1427_v0  ;;  %v1378_v3 = vpack.c.bf16 %v1278_v1, %v1278_v1  ;;  %v916_v4 = vadd.f32 %v2430_v48, %v915_v2  ;;  %v1174_v5 = vpop.f32.mrf.mxu3  ;;  %v1908_v0 = vor.u32 %v2118_v52, %v1907_v51  ;;  %v1712_v2 = vor.u32 %v2067_v53, %v1709_v54 }
 0x116   :  { %v792_v6 = vpop.f32.mrf.mxu0 }
 0x117   :  { %1479 = vst.msk [vmem:[%s3348_s3 + $0x38] sm:$0xf] %vm1464_vm0, %v1378_v3  ;;  %v1175_v7 = vadd.f32 %v1174_v5, %v916_v4  ;;  %v793_v8 = vadd.f32 %v2430_v48, %v792_v6  ;;  %v1051_v9 = vpop.f32.mrf.mxu1  ;;  %v1912_v3 = vor.u32 %v2117_v57, %v1909_v58 }
 0x119   :  { %v1328_v11 = vmax.f32 %v1175_v7, 0.0  ;;  %v1052_v12 = vadd.f32 %v1051_v9, %v793_v8 }
 0x11b   :  { %v1428_v18 = vpack.c.bf16 %v1328_v11, %v1328_v11  ;;  %v1279_v19 = vmax.f32 %v1052_v12, 0.0 }
 0x11c   :  { %v917_v22 = vpop.f32.mrf.mxu2 }
 0x11d   :  { %1529 = vst.msk [vmem:[%s3348_s3 + $0x100] sm:$0xf] %vm1464_vm0, %v1428_v18  ;;  %v1379_v23 = vpack.c.bf16 %v1279_v19, %v1279_v19  ;;  %v918_v24 = vadd.f32 %v2430_v48, %v917_v22  ;;  %v1176_v25 = vpop.f32.mrf.mxu3  ;;  %v1715_v19 = vld [vmem:[%s3347_s0 + $0x120] sm:$0xf]  ;;  %v2070_v22 = vld [vmem:[%s3347_s0 + $0x124] sm:$0xf0] }
 0x11e   :  { %v795_v28 = vpop.f32.mrf.mxu0 }
 0x11f   :  { %1480 = vst.msk [vmem:[%s3348_s3 + $0x3c] sm:$0xf] %vm1464_vm0, %v1379_v23  ;;  %v1177_v31 = vadd.f32 %v1176_v25, %v918_v24  ;;  %v796_v32 = vadd.f32 %v2430_v48, %v795_v28  ;;  %v1054_v33 = vpop.f32.mrf.mxu1  ;;  %v1915_v23 = vld [vmem:[%s3347_s0 + $0x2b0] sm:$0xf]  ;;  %v2120_v24 = vld [vmem:[%s3347_s0 + $0x2b4] sm:$0xf0] }
 0x120   :  { %v2069_v25 = vld [vmem:[%s3347_s0 + $0x124] sm:$0xf] }
 0x121   :  { %v1329_v34 = vmax.f32 %v1177_v31, 0.0  ;;  %v1055_v35 = vadd.f32 %v1054_v33, %v796_v32  ;;  %834 = vmatmul.bf16.gmra.mxu0 %v1700_v26  ;;  %959 = vmatmul.bf16.gmra.mxu2 %v1900_v27  ;;  %v1717_v26 = vld [vmem:[%s3347_s0 + $0x128] sm:$0xf0] }
 0x122   :  { %1093 = vmatmul.bf16.gmra.mxu1 %v1704_v29  ;;  %1218 = vmatmul.bf16.gmra.mxu3 %v1904_v30  ;;  %v2119_v29 = vld [vmem:[%s3347_s0 + $0x2b4] sm:$0xf]  ;;  %v1917_v30 = vld [vmem:[%s3347_s0 + $0x2b8] sm:$0xf0] }
 0x123   :  { %v1429_v36 = vpack.c.bf16 %v1329_v34, %v1329_v34  ;;  %v1280_v37 = vmax.f32 %v1055_v35, 0.0  ;;  %v1716_v35 = vor.u32 %v2070_v22, %v1715_v19 }
 0x124   :  { %v920_v38 = vpop.f32.mrf.mxu2 }
 0x125   :  { %1530 = vst.msk [vmem:[%s3348_s3 + $0x104] sm:$0xf] %vm1464_vm0, %v1429_v36  ;;  %v1380_v39 = vpack.c.bf16 %v1280_v37, %v1280_v37  ;;  %v921_v40 = vadd.f32 %v2430_v48, %v920_v38  ;;  %v1179_v41 = vpop.f32.mrf.mxu3  ;;  %v1916_v36 = vor.u32 %v2120_v24, %v1915_v23  ;;  %v1720_v38 = vor.u32 %v2069_v25, %v1717_v26  ;;  %v2949_v26 = vld [vmem:[%s3346_s2] ss:$0 sm:$0xff] }
 0x126   :  { %v797_v42 = vpop.f32.mrf.mxu0 }
 0x127   :  { %1481 = vst.msk [vmem:[%s3348_s3 + $0x40] sm:$0xf] %vm1464_vm0, %v1380_v39  ;;  %v1180_v43 = vadd.f32 %v1179_v41, %v921_v40  ;;  %v798_v44 = vadd.f32 %v2430_v48, %v797_v42  ;;  %v1056_v45 = vpop.f32.mrf.mxu1  ;;  %v1920_v39 = vor.u32 %v2119_v29, %v1917_v30 }
 0x129   :  { %v1330_v47 = vmax.f32 %v1180_v43, 0.0  ;;  %v1057_v49 = vadd.f32 %v1056_v45, %v798_v44 }
 0x12b   :  { %v1430_v55 = vpack.c.bf16 %v1330_v47, %v1330_v47  ;;  %v1281_v56 = vmax.f32 %v1057_v49, 0.0 }
 0x12c   :  { %v922_v59 = vpop.f32.mrf.mxu2 }
 0x12d   :  { %1531 = vst.msk [vmem:[%s3348_s3 + $0x108] sm:$0xf] %vm1464_vm0, %v1430_v55  ;;  %v1381_v60 = vpack.c.bf16 %v1281_v56, %v1281_v56  ;;  %v923_v61 = vadd.f32 %v2430_v48, %v922_v59  ;;  %v1181_v62 = vpop.f32.mrf.mxu3  ;;  %v1723_v56 = vld [vmem:[%s3347_s0 + $0x130] sm:$0xf]  ;;  %v2072_v59 = vld [vmem:[%s3347_s0 + $0x134] sm:$0xf0] }
 0x12e   :  { %v800_v1 = vpop.f32.mrf.mxu0 }
 0x12f   :  { %1482 = vst.msk [vmem:[%s3348_s3 + $0x44] sm:$0xf] %vm1464_vm0, %v1381_v60  ;;  %v1182_v4 = vadd.f32 %v1181_v62, %v923_v61  ;;  %v801_v5 = vadd.f32 %v2430_v48, %v800_v1  ;;  %v1059_v6 = vpop.f32.mrf.mxu1  ;;  %v1923_v60 = vld [vmem:[%s3347_s0 + $0x2c0] sm:$0xf]  ;;  %v2122_v61 = vld [vmem:[%s3347_s0 + $0x2c4] sm:$0xf0] }
 0x130   :  { %v2071_v62 = vld [vmem:[%s3347_s0 + $0x134] sm:$0xf] }
 0x131   :  { %v1331_v7 = vmax.f32 %v1182_v4, 0.0  ;;  %v1060_v8 = vadd.f32 %v1059_v6, %v801_v5  ;;  %839 = vmatmul.bf16.gmra.mxu0 %v1708_v63  ;;  %964 = vmatmul.bf16.gmra.mxu2 %v1908_v0  ;;  %v1725_v63 = vld [vmem:[%s3347_s0 + $0x138] sm:$0xf0] }
 0x132   :  { %1098 = vmatmul.bf16.gmra.mxu1 %v1712_v2  ;;  %1223 = vmatmul.bf16.gmra.mxu3 %v1912_v3  ;;  %v2121_v2 = vld [vmem:[%s3347_s0 + $0x2c4] sm:$0xf]  ;;  %v1925_v3 = vld [vmem:[%s3347_s0 + $0x2c8] sm:$0xf0] }
 0x133   :  { %v1431_v9 = vpack.c.bf16 %v1331_v7, %v1331_v7  ;;  %v1282_v10 = vmax.f32 %v1060_v8, 0.0  ;;  %v1724_v8 = vor.u32 %v2072_v59, %v1723_v56 }
 0x134   :  { %v925_v11 = vpop.f32.mrf.mxu2 }
 0x135   :  { %1532 = vst.msk [vmem:[%s3348_s3 + $0x10c] sm:$0xf] %vm1464_vm0, %v1431_v9  ;;  %v1382_v12 = vpack.c.bf16 %v1282_v10, %v1282_v10  ;;  %v926_v13 = vadd.f32 %v2430_v48, %v925_v11  ;;  %v1184_v14 = vpop.f32.mrf.mxu3  ;;  %v1924_v9 = vor.u32 %v2122_v61, %v1923_v60  ;;  %v1728_v11 = vor.u32 %v2071_v62, %v1725_v63 }
 0x136   :  { %v802_v15 = vpop.f32.mrf.mxu0 }
 0x137   :  { %1483 = vst.msk [vmem:[%s3348_s3 + $0x48] sm:$0xf] %vm1464_vm0, %v1382_v12  ;;  %v1185_v16 = vadd.f32 %v1184_v14, %v926_v13  ;;  %v803_v17 = vadd.f32 %v2430_v48, %v802_v15  ;;  %v1061_v18 = vpop.f32.mrf.mxu1  ;;  %v1928_v12 = vor.u32 %v2121_v2, %v1925_v3 }
 0x139   :  { %v1332_v20 = vmax.f32 %v1185_v16, 0.0  ;;  %v1062_v21 = vadd.f32 %v1061_v18, %v803_v17 }
 0x13b   :  { %v1432_v27 = vpack.c.bf16 %v1332_v20, %v1332_v20  ;;  %v1283_v28 = vmax.f32 %v1062_v21, 0.0 }
 0x13c   :  { %v927_v31 = vpop.f32.mrf.mxu2 }
 0x13d   :  { %1533 = vst.msk [vmem:[%s3348_s3 + $0x110] sm:$0xf] %vm1464_vm0, %v1432_v27  ;;  %v1383_v32 = vpack.c.bf16 %v1283_v28, %v1283_v28  ;;  %v928_v33 = vadd.f32 %v2430_v48, %v927_v31  ;;  %v1186_v34 = vpop.f32.mrf.mxu3  ;;  %v2074_v31 = vld [vmem:[%s3347_s0 + $0x144] sm:$0xf0] }
 0x13e   :  { %v805_v37 = vpop.f32.mrf.mxu0 }
 0x13f   :  { %1484 = vst.msk [vmem:[%s3348_s3 + $0x4c] sm:$0xf] %vm1464_vm0, %v1383_v32  ;;  %v1187_v40 = vadd.f32 %v1186_v34, %v928_v33  ;;  %v806_v41 = vadd.f32 %v2430_v48, %v805_v37  ;;  %v1064_v42 = vpop.f32.mrf.mxu1  ;;  %v1931_v32 = vld [vmem:[%s3347_s0 + $0x2d0] sm:$0xf]  ;;  %v2124_v33 = vld [vmem:[%s3347_s0 + $0x2d4] sm:$0xf0] }
 0x140   :  { %v2073_v34 = vld [vmem:[%s3347_s0 + $0x144] sm:$0xf] }
 0x141   :  { %v1333_v43 = vmax.f32 %v1187_v40, 0.0  ;;  %v1065_v44 = vadd.f32 %v1064_v42, %v806_v41  ;;  %844 = vmatmul.bf16.gmra.mxu0 %v1716_v35  ;;  %969 = vmatmul.bf16.gmra.mxu2 %v1916_v36  ;;  %v1733_v35 = vld [vmem:[%s3347_s0 + $0x148] sm:$0xf0] }
 0x142   :  { %1103 = vmatmul.bf16.gmra.mxu1 %v1720_v38  ;;  %1228 = vmatmul.bf16.gmra.mxu3 %v1920_v39  ;;  %v2123_v38 = vld [vmem:[%s3347_s0 + $0x2d4] sm:$0xf]  ;;  %v1933_v39 = vld [vmem:[%s3347_s0 + $0x2d8] sm:$0xf0] }
 0x143   :  { %v1433_v45 = vpack.c.bf16 %v1333_v43, %v1333_v43  ;;  %v1284_v46 = vmax.f32 %v1065_v44, 0.0 }
 0x144   :  { %v930_v47 = vpop.f32.mrf.mxu2 }
 0x145   :  { %1534 = vst.msk [vmem:[%s3348_s3 + $0x114] sm:$0xf] %vm1464_vm0, %v1433_v45  ;;  %v1384_v49 = vpack.c.bf16 %v1284_v46, %v1284_v46  ;;  %v931_v50 = vadd.f32 %v2430_v48, %v930_v47  ;;  %v1189_v51 = vpop.f32.mrf.mxu3  ;;  %v1932_v45 = vor.u32 %v2124_v33, %v1931_v32  ;;  %v1736_v47 = vor.u32 %v2073_v34, %v1733_v35 }
 0x146   :  { %v807_v52 = vpop.f32.mrf.mxu0 }
 0x147   :  { %1485 = vst.msk [vmem:[%s3348_s3 + $0x50] sm:$0xf] %vm1464_vm0, %v1384_v49  ;;  %v1190_v53 = vadd.f32 %v1189_v51, %v931_v50  ;;  %v808_v54 = vadd.f32 %v2430_v48, %v807_v52  ;;  %v1066_v55 = vpop.f32.mrf.mxu1  ;;  %v1936_v49 = vor.u32 %v2123_v38, %v1933_v39 }
 0x149   :  { %v1334_v57 = vmax.f32 %v1190_v53, 0.0  ;;  %v1067_v58 = vadd.f32 %v1066_v55, %v808_v54 }
 0x14b   :  { %v1434_v0 = vpack.c.bf16 %v1334_v57, %v1334_v57  ;;  %v1285_v1 = vmax.f32 %v1067_v58, 0.0 }
 0x14c   :  { %v932_v4 = vpop.f32.mrf.mxu2 }
 0x14d   :  { %1535 = vst.msk [vmem:[%s3348_s3 + $0x118] sm:$0xf] %vm1464_vm0, %v1434_v0  ;;  %v1385_v5 = vpack.c.bf16 %v1285_v1, %v1285_v1  ;;  %v933_v6 = vadd.f32 %v2430_v48, %v932_v4  ;;  %v1191_v7 = vpop.f32.mrf.mxu3  ;;  %v1739_v1 = vld [vmem:[%s3347_s0 + $0x150] sm:$0xf]  ;;  %v2076_v4 = vld [vmem:[%s3347_s0 + $0x154] sm:$0xf0] }
 0x14e   :  { %v810_v10 = vpop.f32.mrf.mxu0 }
 0x14f   :  { %1486 = vst.msk [vmem:[%s3348_s3 + $0x54] sm:$0xf] %vm1464_vm0, %v1385_v5  ;;  %v1192_v13 = vadd.f32 %v1191_v7, %v933_v6  ;;  %v811_v14 = vadd.f32 %v2430_v48, %v810_v10  ;;  %v1069_v15 = vpop.f32.mrf.mxu1  ;;  %v1939_v5 = vld [vmem:[%s3347_s0 + $0x2e0] sm:$0xf]  ;;  %v2126_v6 = vld [vmem:[%s3347_s0 + $0x2e4] sm:$0xf0] }
 0x150   :  { %v2075_v7 = vld [vmem:[%s3347_s0 + $0x154] sm:$0xf] }
 0x151   :  { %v1335_v16 = vmax.f32 %v1192_v13, 0.0  ;;  %v1070_v17 = vadd.f32 %v1069_v15, %v811_v14  ;;  %849 = vmatmul.bf16.gmra.mxu0 %v1724_v8  ;;  %974 = vmatmul.bf16.gmra.mxu2 %v1924_v9  ;;  %v1741_v8 = vld [vmem:[%s3347_s0 + $0x158] sm:$0xf0] }
 0x152   :  { %1108 = vmatmul.bf16.gmra.mxu1 %v1728_v11  ;;  %1233 = vmatmul.bf16.gmra.mxu3 %v1928_v12  ;;  %v2125_v11 = vld [vmem:[%s3347_s0 + $0x2e4] sm:$0xf]  ;;  %v1941_v12 = vld [vmem:[%s3347_s0 + $0x2e8] sm:$0xf0] }
 0x153   :  { %v1435_v18 = vpack.c.bf16 %v1335_v16, %v1335_v16  ;;  %v1286_v19 = vmax.f32 %v1070_v17, 0.0  ;;  %v1740_v17 = vor.u32 %v2076_v4, %v1739_v1 }
 0x154   :  { %v935_v20 = vpop.f32.mrf.mxu2 }
 0x155   :  { %1536 = vst.msk [vmem:[%s3348_s3 + $0x11c] sm:$0xf] %vm1464_vm0, %v1435_v18  ;;  %v1386_v21 = vpack.c.bf16 %v1286_v19, %v1286_v19  ;;  %v936_v22 = vadd.f32 %v2430_v48, %v935_v20  ;;  %v1194_v23 = vpop.f32.mrf.mxu3  ;;  %v1731_v48 = vld [vmem:[%s3347_s0 + $0x140] sm:$0xf]  ;;  %v1940_v18 = vor.u32 %v2126_v6, %v1939_v5  ;;  %v1744_v20 = vor.u32 %v2075_v7, %v1741_v8 }
 0x156   :  { %v812_v24 = vpop.f32.mrf.mxu0  ;;  %v1732_v44 = vor.u32 %v2074_v31, %v1731_v48 }
 0x157   :  { %1487 = vst.msk [vmem:[%s3348_s3 + $0x58] sm:$0xf] %vm1464_vm0, %v1386_v21  ;;  %v1195_v25 = vadd.f32 %v1194_v23, %v936_v22  ;;  %v813_v27 = vadd.f32 %v2949_v26, %v812_v24  ;;  %v1071_v28 = vpop.f32.mrf.mxu1  ;;  %v1944_v21 = vor.u32 %v2125_v11, %v1941_v12 }
 0x159   :  { %v1336_v29 = vmax.f32 %v1195_v25, 0.0  ;;  %v1072_v30 = vadd.f32 %v1071_v28, %v813_v27 }
 0x15b   :  { %v1436_v36 = vpack.c.bf16 %v1336_v29, %v1336_v29  ;;  %v1287_v37 = vmax.f32 %v1072_v30, 0.0 }
 0x15c   :  { %v937_v40 = vpop.f32.mrf.mxu2 }
 0x15d   :  { %1537 = vst.msk [vmem:[%s3348_s3 + $0x120] sm:$0xf] %vm1464_vm0, %v1436_v36  ;;  %v1387_v41 = vpack.c.bf16 %v1287_v37, %v1287_v37  ;;  %v938_v42 = vadd.f32 %v2949_v26, %v937_v40  ;;  %v1196_v43 = vpop.f32.mrf.mxu3  ;;  %v1747_v37 = vld [vmem:[%s3347_s0 + $0x160] sm:$0xf]  ;;  %v2078_v40 = vld [vmem:[%s3347_s0 + $0x164] sm:$0xf0] }
 0x15e   :  { %v815_v46 = vpop.f32.mrf.mxu0 }
 0x15f   :  { %1488 = vst.msk [vmem:[%s3348_s3 + $0x5c] sm:$0xf] %vm1464_vm0, %v1387_v41  ;;  %v1197_v50 = vadd.f32 %v1196_v43, %v938_v42  ;;  %v816_v51 = vadd.f32 %v2949_v26, %v815_v46  ;;  %v1074_v52 = vpop.f32.mrf.mxu1  ;;  %v1947_v41 = vld [vmem:[%s3347_s0 + $0x2f0] sm:$0xf]  ;;  %v2128_v42 = vld [vmem:[%s3347_s0 + $0x2f4] sm:$0xf0] }
 0x160   :  { %v2077_v43 = vld [vmem:[%s3347_s0 + $0x164] sm:$0xf] }
 0x161   :  { %v1337_v53 = vmax.f32 %v1197_v50, 0.0  ;;  %v1075_v54 = vadd.f32 %v1074_v52, %v816_v51  ;;  %854 = vmatmul.bf16.gmra.mxu0 %v1732_v44  ;;  %979 = vmatmul.bf16.gmra.mxu2 %v1932_v45  ;;  %v1749_v44 = vld [vmem:[%s3347_s0 + $0x168] sm:$0xf0] }
 0x162   :  { %1113 = vmatmul.bf16.gmra.mxu1 %v1736_v47  ;;  %1238 = vmatmul.bf16.gmra.mxu3 %v1936_v49  ;;  %v2127_v47 = vld [vmem:[%s3347_s0 + $0x2f4] sm:$0xf]  ;;  %v1949_v49 = vld [vmem:[%s3347_s0 + $0x2f8] sm:$0xf0] }
 0x163   :  { %v1437_v55 = vpack.c.bf16 %v1337_v53, %v1337_v53  ;;  %v1288_v56 = vmax.f32 %v1075_v54, 0.0  ;;  %v1748_v54 = vor.u32 %v2078_v40, %v1747_v37 }
 0x164   :  { %v940_v57 = vpop.f32.mrf.mxu2 }
 0x165   :  { %1538 = vst.msk [vmem:[%s3348_s3 + $0x124] sm:$0xf] %vm1464_vm0, %v1437_v55  ;;  %v1388_v58 = vpack.c.bf16 %v1288_v56, %v1288_v56  ;;  %v941_v59 = vadd.f32 %v2949_v26, %v940_v57  ;;  %v1199_v60 = vpop.f32.mrf.mxu3  ;;  %v1948_v55 = vor.u32 %v2128_v42, %v1947_v41  ;;  %v1752_v57 = vor.u32 %v2077_v43, %v1749_v44 }
 0x166   :  { %v817_v61 = vpop.f32.mrf.mxu0 }
 0x167   :  { %1489 = vst.msk [vmem:[%s3348_s3 + $0x60] sm:$0xf] %vm1464_vm0, %v1388_v58  ;;  %v1200_v62 = vadd.f32 %v1199_v60, %v941_v59  ;;  %v818_v63 = vadd.f32 %v2949_v26, %v817_v61  ;;  %v1076_v0 = vpop.f32.mrf.mxu1  ;;  %v1952_v58 = vor.u32 %v2127_v47, %v1949_v49 }
 0x169   :  { %v1338_v2 = vmax.f32 %v1200_v62, 0.0  ;;  %v1077_v3 = vadd.f32 %v1076_v0, %v818_v63 }
 0x16b   :  { %v1438_v9 = vpack.c.bf16 %v1338_v2, %v1338_v2  ;;  %v1289_v10 = vmax.f32 %v1077_v3, 0.0 }
 0x16c   :  { %v942_v13 = vpop.f32.mrf.mxu2 }
 0x16d   :  { %1539 = vst.msk [vmem:[%s3348_s3 + $0x128] sm:$0xf] %vm1464_vm0, %v1438_v9  ;;  %v1389_v14 = vpack.c.bf16 %v1289_v10, %v1289_v10  ;;  %v943_v15 = vadd.f32 %v2949_v26, %v942_v13  ;;  %v1201_v16 = vpop.f32.mrf.mxu3  ;;  %v1755_v10 = vld [vmem:[%s3347_s0 + $0x170] sm:$0xf]  ;;  %v2080_v13 = vld [vmem:[%s3347_s0 + $0x174] sm:$0xf0] }
 0x16e   :  { %v820_v19 = vpop.f32.mrf.mxu0 }
 0x16f   :  { %1490 = vst.msk [vmem:[%s3348_s3 + $0x64] sm:$0xf] %vm1464_vm0, %v1389_v14  ;;  %v1202_v22 = vadd.f32 %v1201_v16, %v943_v15  ;;  %v821_v23 = vadd.f32 %v2949_v26, %v820_v19  ;;  %v1079_v24 = vpop.f32.mrf.mxu1  ;;  %v1955_v14 = vld [vmem:[%s3347_s0 + $0x300] sm:$0xf]  ;;  %v2130_v15 = vld [vmem:[%s3347_s0 + $0x304] sm:$0xf0] }
 0x170   :  { %v2079_v16 = vld [vmem:[%s3347_s0 + $0x174] sm:$0xf] }
 0x171   :  { %v1339_v25 = vmax.f32 %v1202_v22, 0.0  ;;  %v1080_v27 = vadd.f32 %v1079_v24, %v821_v23  ;;  %859 = vmatmul.bf16.gmra.mxu0 %v1740_v17  ;;  %984 = vmatmul.bf16.gmra.mxu2 %v1940_v18  ;;  %v1757_v17 = vld [vmem:[%s3347_s0 + $0x178] sm:$0xf0] }
 0x172   :  { %1118 = vmatmul.bf16.gmra.mxu1 %v1744_v20  ;;  %1243 = vmatmul.bf16.gmra.mxu3 %v1944_v21  ;;  %v2129_v20 = vld [vmem:[%s3347_s0 + $0x304] sm:$0xf]  ;;  %v1957_v21 = vld [vmem:[%s3347_s0 + $0x308] sm:$0xf0] }
 0x173   :  { %v1439_v28 = vpack.c.bf16 %v1339_v25, %v1339_v25  ;;  %v1290_v48 = vmax.f32 %v1080_v27, 0.0  ;;  %v1756_v27 = vor.u32 %v2080_v13, %v1755_v10 }
 0x174   :  { %v945_v29 = vpop.f32.mrf.mxu2 }
 0x175   :  { %1540 = vst.msk [vmem:[%s3348_s3 + $0x12c] sm:$0xf] %vm1464_vm0, %v1439_v28  ;;  %v1390_v30 = vpack.c.bf16 %v1290_v48, %v1290_v48  ;;  %v946_v31 = vadd.f32 %v2949_v26, %v945_v29  ;;  %v1204_v32 = vpop.f32.mrf.mxu3  ;;  %v1956_v28 = vor.u32 %v2130_v15, %v1955_v14  ;;  %v1760_v29 = vor.u32 %v2079_v16, %v1757_v17 }
 0x176   :  { %v822_v33 = vpop.f32.mrf.mxu0 }
 0x177   :  { %1491 = vst.msk [vmem:[%s3348_s3 + $0x68] sm:$0xf] %vm1464_vm0, %v1390_v30  ;;  %v1205_v34 = vadd.f32 %v1204_v32, %v946_v31  ;;  %v823_v35 = vadd.f32 %v2949_v26, %v822_v33  ;;  %v1081_v36 = vpop.f32.mrf.mxu1  ;;  %v1960_v30 = vor.u32 %v2129_v20, %v1957_v21 }
 0x179   :  { %v1340_v38 = vmax.f32 %v1205_v34, 0.0  ;;  %v1082_v39 = vadd.f32 %v1081_v36, %v823_v35 }
 0x17b   :  { %v1440_v45 = vpack.c.bf16 %v1340_v38, %v1340_v38  ;;  %v1291_v46 = vmax.f32 %v1082_v39, 0.0 }
 0x17c   :  { %v947_v50 = vpop.f32.mrf.mxu2 }
 0x17d   :  { %1541 = vst.msk [vmem:[%s3348_s3 + $0x130] sm:$0xf] %vm1464_vm0, %v1440_v45  ;;  %v1391_v51 = vpack.c.bf16 %v1291_v46, %v1291_v46  ;;  %v948_v52 = vadd.f32 %v2949_v26, %v947_v50  ;;  %v1206_v53 = vpop.f32.mrf.mxu3  ;;  %v1763_v46 = vld [vmem:[%s3347_s0 + $0x180] sm:$0xf]  ;;  %v2082_v50 = vld [vmem:[%s3347_s0 + $0x184] sm:$0xf0] }
 0x17e   :  { %v825_v56 = vpop.f32.mrf.mxu0 }
 0x17f   :  { %1492 = vst.msk [vmem:[%s3348_s3 + $0x6c] sm:$0xf] %vm1464_vm0, %v1391_v51  ;;  %v1207_v59 = vadd.f32 %v1206_v53, %v948_v52  ;;  %v826_v60 = vadd.f32 %v2949_v26, %v825_v56  ;;  %v1084_v61 = vpop.f32.mrf.mxu1  ;;  %v1963_v51 = vld [vmem:[%s3347_s0 + $0x310] sm:$0xf]  ;;  %v2132_v52 = vld [vmem:[%s3347_s0 + $0x314] sm:$0xf0] }
 0x180   :  { %v2081_v53 = vld [vmem:[%s3347_s0 + $0x184] sm:$0xf] }
 0x181   :  { %v1341_v62 = vmax.f32 %v1207_v59, 0.0  ;;  %v1085_v63 = vadd.f32 %v1084_v61, %v826_v60  ;;  %864 = vmatmul.bf16.gmra.mxu0 %v1748_v54  ;;  %989 = vmatmul.bf16.gmra.mxu2 %v1948_v55  ;;  %v1765_v54 = vld [vmem:[%s3347_s0 + $0x188] sm:$0xf0] }
 0x182   :  { %1123 = vmatmul.bf16.gmra.mxu1 %v1752_v57  ;;  %1248 = vmatmul.bf16.gmra.mxu3 %v1952_v58  ;;  %v2131_v57 = vld [vmem:[%s3347_s0 + $0x314] sm:$0xf]  ;;  %v1965_v58 = vld [vmem:[%s3347_s0 + $0x318] sm:$0xf0] }
 0x183   :  { %v1441_v0 = vpack.c.bf16 %v1341_v62, %v1341_v62  ;;  %v1292_v1 = vmax.f32 %v1085_v63, 0.0  ;;  %v1764_v63 = vor.u32 %v2082_v50, %v1763_v46 }
 0x184   :  { %v950_v2 = vpop.f32.mrf.mxu2 }
 0x185   :  { %1542 = vst.msk [vmem:[%s3348_s3 + $0x134] sm:$0xf] %vm1464_vm0, %v1441_v0  ;;  %v1392_v3 = vpack.c.bf16 %v1292_v1, %v1292_v1  ;;  %v951_v4 = vadd.f32 %v2949_v26, %v950_v2  ;;  %v1209_v5 = vpop.f32.mrf.mxu3  ;;  %v1964_v0 = vor.u32 %v2132_v52, %v1963_v51  ;;  %v1768_v2 = vor.u32 %v2081_v53, %v1765_v54 }
 0x186   :  { %v827_v6 = vpop.f32.mrf.mxu0 }
 0x187   :  { %1493 = vst.msk [vmem:[%s3348_s3 + $0x70] sm:$0xf] %vm1464_vm0, %v1392_v3  ;;  %v1210_v7 = vadd.f32 %v1209_v5, %v951_v4  ;;  %v828_v8 = vadd.f32 %v2949_v26, %v827_v6  ;;  %v1086_v9 = vpop.f32.mrf.mxu1  ;;  %v1968_v3 = vor.u32 %v2131_v57, %v1965_v58 }
 0x189   :  { %v1342_v11 = vmax.f32 %v1210_v7, 0.0  ;;  %v1087_v12 = vadd.f32 %v1086_v9, %v828_v8 }
 0x18b   :  { %v1442_v18 = vpack.c.bf16 %v1342_v11, %v1342_v11  ;;  %v1293_v19 = vmax.f32 %v1087_v12, 0.0 }
 0x18c   :  { %v952_v22 = vpop.f32.mrf.mxu2 }
 0x18d   :  { %1543 = vst.msk [vmem:[%s3348_s3 + $0x138] sm:$0xf] %vm1464_vm0, %v1442_v18  ;;  %v1393_v23 = vpack.c.bf16 %v1293_v19, %v1293_v19  ;;  %v953_v24 = vadd.f32 %v2949_v26, %v952_v22  ;;  %v1211_v25 = vpop.f32.mrf.mxu3 }
 0x18e   :  { %v830_v48 = vpop.f32.mrf.mxu0 }
 0x18f   :  { %1494 = vst.msk [vmem:[%s3348_s3 + $0x74] sm:$0xf] %vm1464_vm0, %v1393_v23  ;;  %v1212_v31 = vadd.f32 %v1211_v25, %v953_v24  ;;  %v831_v32 = vadd.f32 %v2949_v26, %v830_v48  ;;  %v1089_v33 = vpop.f32.mrf.mxu1 }
 0x191   :  { %v1343_v34 = vmax.f32 %v1212_v31, 0.0  ;;  %v1090_v35 = vadd.f32 %v1089_v33, %v831_v32  ;;  %869 = vmatmul.bf16.gmra.mxu0 %v1756_v27  ;;  %994 = vmatmul.bf16.gmra.mxu2 %v1956_v28 }
 0x192   :  { %1128 = vmatmul.bf16.gmra.mxu1 %v1760_v29  ;;  %1253 = vmatmul.bf16.gmra.mxu3 %v1960_v30 }
 0x193   :  { %v1443_v36 = vpack.c.bf16 %v1343_v34, %v1343_v34  ;;  %v1294_v37 = vmax.f32 %v1090_v35, 0.0 }
 0x194   :  { %v955_v38 = vpop.f32.mrf.mxu2 }
 0x195   :  { %1544 = vst.msk [vmem:[%s3348_s3 + $0x13c] sm:$0xf] %vm1464_vm0, %v1443_v36  ;;  %v1394_v39 = vpack.c.bf16 %v1294_v37, %v1294_v37  ;;  %v956_v40 = vadd.f32 %v2949_v26, %v955_v38  ;;  %v1214_v41 = vpop.f32.mrf.mxu3 }
 0x196   :  { %v832_v42 = vpop.f32.mrf.mxu0 }
 0x197   :  { %1495 = vst.msk [vmem:[%s3348_s3 + $0x78] sm:$0xf] %vm1464_vm0, %v1394_v39  ;;  %v1215_v43 = vadd.f32 %v1214_v41, %v956_v40  ;;  %v833_v44 = vadd.f32 %v2949_v26, %v832_v42  ;;  %v1091_v45 = vpop.f32.mrf.mxu1 }
 0x199   :  { %v1344_v47 = vmax.f32 %v1215_v43, 0.0  ;;  %v1092_v49 = vadd.f32 %v1091_v45, %v833_v44 }
 0x19b   :  { %v1444_v55 = vpack.c.bf16 %v1344_v47, %v1344_v47  ;;  %v1295_v56 = vmax.f32 %v1092_v49, 0.0 }
 0x19c   :  { %v957_v59 = vpop.f32.mrf.mxu2 }
 0x19d   :  { %1545 = vst.msk [vmem:[%s3348_s3 + $0x140] sm:$0xf] %vm1464_vm0, %v1444_v55  ;;  %v1395_v60 = vpack.c.bf16 %v1295_v56, %v1295_v56  ;;  %v958_v61 = vadd.f32 %v2949_v26, %v957_v59  ;;  %v1216_v62 = vpop.f32.mrf.mxu3 }
 0x19e   :  { %v835_v1 = vpop.f32.mrf.mxu0 }
 0x19f   :  { %1496 = vst.msk [vmem:[%s3348_s3 + $0x7c] sm:$0xf] %vm1464_vm0, %v1395_v60  ;;  %v1217_v4 = vadd.f32 %v1216_v62, %v958_v61  ;;  %v836_v5 = vadd.f32 %v2949_v26, %v835_v1  ;;  %v1094_v6 = vpop.f32.mrf.mxu1 }
 0x1a1   :  { %v1345_v7 = vmax.f32 %v1217_v4, 0.0  ;;  %v1095_v8 = vadd.f32 %v1094_v6, %v836_v5  ;;  %874 = vmatmul.bf16.gmra.mxu0 %v1764_v63  ;;  %999 = vmatmul.bf16.gmra.mxu2 %v1964_v0 }
 0x1a2   :  { %1133 = vmatmul.bf16.gmra.mxu1 %v1768_v2  ;;  %1258 = vmatmul.bf16.gmra.mxu3 %v1968_v3 }
 0x1a3   :  { %v1445_v9 = vpack.c.bf16 %v1345_v7, %v1345_v7  ;;  %v1296_v10 = vmax.f32 %v1095_v8, 0.0 }
 0x1a4   :  { %v960_v11 = vpop.f32.mrf.mxu2 }
 0x1a5   :  { %1546 = vst.msk [vmem:[%s3348_s3 + $0x144] sm:$0xf] %vm1464_vm0, %v1445_v9  ;;  %v1396_v12 = vpack.c.bf16 %v1296_v10, %v1296_v10  ;;  %v961_v13 = vadd.f32 %v2949_v26, %v960_v11  ;;  %v1219_v14 = vpop.f32.mrf.mxu3 }
 0x1a6   :  { %v837_v15 = vpop.f32.mrf.mxu0 }
 0x1a7   :  { %1497 = vst.msk [vmem:[%s3348_s3 + $0x80] sm:$0xf] %vm1464_vm0, %v1396_v12  ;;  %v1220_v16 = vadd.f32 %v1219_v14, %v961_v13  ;;  %v838_v17 = vadd.f32 %v2949_v26, %v837_v15  ;;  %v1096_v18 = vpop.f32.mrf.mxu1 }
 0x1a9   :  { %v1346_v19 = vmax.f32 %v1220_v16, 0.0  ;;  %v1097_v20 = vadd.f32 %v1096_v18, %v838_v17 }
 0x1ab   :  { %v1446_v21 = vpack.c.bf16 %v1346_v19, %v1346_v19  ;;  %v1297_v22 = vmax.f32 %v1097_v20, 0.0 }
 0x1ac   :  { %v962_v23 = vpop.f32.mrf.mxu2 }
 0x1ad   :  { %1547 = vst.msk [vmem:[%s3348_s3 + $0x148] sm:$0xf] %vm1464_vm0, %v1446_v21  ;;  %v1397_v24 = vpack.c.bf16 %v1297_v22, %v1297_v22  ;;  %v963_v25 = vadd.f32 %v2949_v26, %v962_v23  ;;  %v1221_v27 = vpop.f32.mrf.mxu3 }
 0x1ae   :  { %v840_v28 = vpop.f32.mrf.mxu0 }
 0x1af   :  { %1498 = vst.msk [vmem:[%s3348_s3 + $0x84] sm:$0xf] %vm1464_vm0, %v1397_v24  ;;  %v1222_v48 = vadd.f32 %v1221_v27, %v963_v25  ;;  %v841_v29 = vadd.f32 %v2949_v26, %v840_v28  ;;  %v1099_v30 = vpop.f32.mrf.mxu1 }
 0x1b1   :  { %v1347_v31 = vmax.f32 %v1222_v48, 0.0  ;;  %v1100_v32 = vadd.f32 %v1099_v30, %v841_v29 }
 0x1b3   :  { %v1447_v33 = vpack.c.bf16 %v1347_v31, %v1347_v31  ;;  %v1298_v34 = vmax.f32 %v1100_v32, 0.0 }
 0x1b4   :  { %v965_v35 = vpop.f32.mrf.mxu2 }
 0x1b5   :  { %1548 = vst.msk [vmem:[%s3348_s3 + $0x14c] sm:$0xf] %vm1464_vm0, %v1447_v33  ;;  %v1398_v36 = vpack.c.bf16 %v1298_v34, %v1298_v34  ;;  %v966_v37 = vadd.f32 %v2949_v26, %v965_v35  ;;  %v1224_v38 = vpop.f32.mrf.mxu3 }
 0x1b6   :  { %v842_v39 = vpop.f32.mrf.mxu0 }
 0x1b7   :  { %1499 = vst.msk [vmem:[%s3348_s3 + $0x88] sm:$0xf] %vm1464_vm0, %v1398_v36  ;;  %v1225_v40 = vadd.f32 %v1224_v38, %v966_v37  ;;  %v843_v41 = vadd.f32 %v2949_v26, %v842_v39  ;;  %v1101_v42 = vpop.f32.mrf.mxu1 }
 0x1b9   :  { %v1348_v43 = vmax.f32 %v1225_v40, 0.0  ;;  %v1102_v44 = vadd.f32 %v1101_v42, %v843_v41 }
 0x1bb   :  { %v1448_v45 = vpack.c.bf16 %v1348_v43, %v1348_v43  ;;  %v1299_v46 = vmax.f32 %v1102_v44, 0.0 }
 0x1bc   :  { %v967_v47 = vpop.f32.mrf.mxu2 }
 0x1bd   :  { %1549 = vst.msk [vmem:[%s3348_s3 + $0x150] sm:$0xf] %vm1464_vm0, %v1448_v45  ;;  %v1399_v49 = vpack.c.bf16 %v1299_v46, %v1299_v46  ;;  %v968_v50 = vadd.f32 %v2949_v26, %v967_v47  ;;  %v1226_v51 = vpop.f32.mrf.mxu3 }
 0x1be   :  { %v845_v52 = vpop.f32.mrf.mxu0 }
 0x1bf   :  { %1500 = vst.msk [vmem:[%s3348_s3 + $0x8c] sm:$0xf] %vm1464_vm0, %v1399_v49  ;;  %v1227_v53 = vadd.f32 %v1226_v51, %v968_v50  ;;  %v846_v54 = vadd.f32 %v2949_v26, %v845_v52  ;;  %v1104_v55 = vpop.f32.mrf.mxu1 }
 0x1c1   :  { %v1349_v56 = vmax.f32 %v1227_v53, 0.0  ;;  %v1105_v57 = vadd.f32 %v1104_v55, %v846_v54 }
 0x1c3   :  { %v1449_v58 = vpack.c.bf16 %v1349_v56, %v1349_v56  ;;  %v1300_v59 = vmax.f32 %v1105_v57, 0.0 }
 0x1c4   :  { %v970_v60 = vpop.f32.mrf.mxu2 }
 0x1c5   :  { %1550 = vst.msk [vmem:[%s3348_s3 + $0x154] sm:$0xf] %vm1464_vm0, %v1449_v58  ;;  %v1400_v61 = vpack.c.bf16 %v1300_v59, %v1300_v59  ;;  %v971_v62 = vadd.f32 %v2949_v26, %v970_v60  ;;  %v1229_v63 = vpop.f32.mrf.mxu3 }
 0x1c6   :  { %v847_v0 = vpop.f32.mrf.mxu0 }
 0x1c7   :  { %1501 = vst.msk [vmem:[%s3348_s3 + $0x90] sm:$0xf] %vm1464_vm0, %v1400_v61  ;;  %v1230_v1 = vadd.f32 %v1229_v63, %v971_v62  ;;  %v848_v2 = vadd.f32 %v2949_v26, %v847_v0  ;;  %v1106_v3 = vpop.f32.mrf.mxu1 }
 0x1c9   :  { %v1350_v4 = vmax.f32 %v1230_v1, 0.0  ;;  %v1107_v5 = vadd.f32 %v1106_v3, %v848_v2 }
 0x1cb   :  { %v1450_v6 = vpack.c.bf16 %v1350_v4, %v1350_v4  ;;  %v1301_v7 = vmax.f32 %v1107_v5, 0.0 }
 0x1cc   :  { %v972_v8 = vpop.f32.mrf.mxu2 }
 0x1cd   :  { %1551 = vst.msk [vmem:[%s3348_s3 + $0x158] sm:$0xf] %vm1464_vm0, %v1450_v6  ;;  %v1401_v9 = vpack.c.bf16 %v1301_v7, %v1301_v7  ;;  %v973_v10 = vadd.f32 %v2949_v26, %v972_v8  ;;  %v1231_v11 = vpop.f32.mrf.mxu3 }
 0x1ce   :  { %v850_v12 = vpop.f32.mrf.mxu0 }
 0x1cf   :  { %1502 = vst.msk [vmem:[%s3348_s3 + $0x94] sm:$0xf] %vm1464_vm0, %v1401_v9  ;;  %v1232_v13 = vadd.f32 %v1231_v11, %v973_v10  ;;  %v851_v14 = vadd.f32 %v2949_v26, %v850_v12  ;;  %v1109_v15 = vpop.f32.mrf.mxu1 }
 0x1d1   :  { %v1351_v16 = vmax.f32 %v1232_v13, 0.0  ;;  %v1110_v17 = vadd.f32 %v1109_v15, %v851_v14 }
 0x1d3   :  { %v1451_v18 = vpack.c.bf16 %v1351_v16, %v1351_v16  ;;  %v1302_v19 = vmax.f32 %v1110_v17, 0.0 }
 0x1d4   :  { %v975_v20 = vpop.f32.mrf.mxu2 }
 0x1d5   :  { %1552 = vst.msk [vmem:[%s3348_s3 + $0x15c] sm:$0xf] %vm1464_vm0, %v1451_v18  ;;  %v1402_v21 = vpack.c.bf16 %v1302_v19, %v1302_v19  ;;  %v976_v22 = vadd.f32 %v2949_v26, %v975_v20  ;;  %v1234_v23 = vpop.f32.mrf.mxu3 }
 0x1d6   :  { %v852_v24 = vpop.f32.mrf.mxu0 }
 0x1d7   :  { %1503 = vst.msk [vmem:[%s3348_s3 + $0x98] sm:$0xf] %vm1464_vm0, %v1402_v21  ;;  %v1235_v25 = vadd.f32 %v1234_v23, %v976_v22  ;;  %v853_v27 = vadd.f32 %v2949_v26, %v852_v24  ;;  %v1111_v28 = vpop.f32.mrf.mxu1 }
 0x1d9   :  { %v1352_v48 = vmax.f32 %v1235_v25, 0.0  ;;  %v1112_v29 = vadd.f32 %v1111_v28, %v853_v27 }
 0x1db   :  { %v1452_v30 = vpack.c.bf16 %v1352_v48, %v1352_v48  ;;  %v1303_v31 = vmax.f32 %v1112_v29, 0.0 }
 0x1dc   :  { %v977_v32 = vpop.f32.mrf.mxu2 }
 0x1dd   :  { %1553 = vst.msk [vmem:[%s3348_s3 + $0x160] sm:$0xf] %vm1464_vm0, %v1452_v30  ;;  %v1403_v33 = vpack.c.bf16 %v1303_v31, %v1303_v31  ;;  %v978_v34 = vadd.f32 %v2949_v26, %v977_v32  ;;  %v1236_v35 = vpop.f32.mrf.mxu3 }
 0x1de   :  { %v855_v36 = vpop.f32.mrf.mxu0 }
 0x1df   :  { %1504 = vst.msk [vmem:[%s3348_s3 + $0x9c] sm:$0xf] %vm1464_vm0, %v1403_v33  ;;  %v1237_v37 = vadd.f32 %v1236_v35, %v978_v34  ;;  %v856_v38 = vadd.f32 %v2949_v26, %v855_v36  ;;  %v1114_v39 = vpop.f32.mrf.mxu1 }
 0x1e1   :  { %v1353_v40 = vmax.f32 %v1237_v37, 0.0  ;;  %v1115_v41 = vadd.f32 %v1114_v39, %v856_v38 }
 0x1e3   :  { %v1453_v42 = vpack.c.bf16 %v1353_v40, %v1353_v40  ;;  %v1304_v43 = vmax.f32 %v1115_v41, 0.0 }
 0x1e4   :  { %v980_v44 = vpop.f32.mrf.mxu2 }
 0x1e5   :  { %1554 = vst.msk [vmem:[%s3348_s3 + $0x164] sm:$0xf] %vm1464_vm0, %v1453_v42  ;;  %v1404_v45 = vpack.c.bf16 %v1304_v43, %v1304_v43  ;;  %v981_v46 = vadd.f32 %v2949_v26, %v980_v44  ;;  %v1239_v47 = vpop.f32.mrf.mxu3 }
 0x1e6   :  { %v857_v49 = vpop.f32.mrf.mxu0 }
 0x1e7   :  { %1505 = vst.msk [vmem:[%s3348_s3 + $0xa0] sm:$0xf] %vm1464_vm0, %v1404_v45  ;;  %v1240_v50 = vadd.f32 %v1239_v47, %v981_v46  ;;  %v858_v51 = vadd.f32 %v2949_v26, %v857_v49  ;;  %v1116_v52 = vpop.f32.mrf.mxu1 }
 0x1e9   :  { %v1354_v53 = vmax.f32 %v1240_v50, 0.0  ;;  %v1117_v54 = vadd.f32 %v1116_v52, %v858_v51 }
 0x1eb   :  { %v1454_v55 = vpack.c.bf16 %v1354_v53, %v1354_v53  ;;  %v1305_v56 = vmax.f32 %v1117_v54, 0.0 }
 0x1ec   :  { %v982_v57 = vpop.f32.mrf.mxu2 }
 0x1ed   :  { %1555 = vst.msk [vmem:[%s3348_s3 + $0x168] sm:$0xf] %vm1464_vm0, %v1454_v55  ;;  %v1405_v58 = vpack.c.bf16 %v1305_v56, %v1305_v56  ;;  %v983_v59 = vadd.f32 %v2949_v26, %v982_v57  ;;  %v1241_v60 = vpop.f32.mrf.mxu3 }
 0x1ee   :  { %v860_v61 = vpop.f32.mrf.mxu0 }
 0x1ef   :  { %1506 = vst.msk [vmem:[%s3348_s3 + $0xa4] sm:$0xf] %vm1464_vm0, %v1405_v58  ;;  %v1242_v62 = vadd.f32 %v1241_v60, %v983_v59  ;;  %v861_v63 = vadd.f32 %v2949_v26, %v860_v61  ;;  %v1119_v0 = vpop.f32.mrf.mxu1 }
 0x1f1   :  { %v1355_v1 = vmax.f32 %v1242_v62, 0.0  ;;  %v1120_v2 = vadd.f32 %v1119_v0, %v861_v63 }
 0x1f3   :  { %v1455_v3 = vpack.c.bf16 %v1355_v1, %v1355_v1  ;;  %v1306_v4 = vmax.f32 %v1120_v2, 0.0 }
 0x1f4   :  { %v985_v5 = vpop.f32.mrf.mxu2 }
 0x1f5   :  { %1556 = vst.msk [vmem:[%s3348_s3 + $0x16c] sm:$0xf] %vm1464_vm0, %v1455_v3  ;;  %v1406_v6 = vpack.c.bf16 %v1306_v4, %v1306_v4  ;;  %v986_v7 = vadd.f32 %v2949_v26, %v985_v5  ;;  %v1244_v8 = vpop.f32.mrf.mxu3 }
 0x1f6   :  { %v862_v9 = vpop.f32.mrf.mxu0 }
 0x1f7   :  { %1507 = vst.msk [vmem:[%s3348_s3 + $0xa8] sm:$0xf] %vm1464_vm0, %v1406_v6  ;;  %v1245_v10 = vadd.f32 %v1244_v8, %v986_v7  ;;  %v863_v11 = vadd.f32 %v2949_v26, %v862_v9  ;;  %v1121_v12 = vpop.f32.mrf.mxu1 }
 0x1f9   :  { %v1356_v13 = vmax.f32 %v1245_v10, 0.0  ;;  %v1122_v14 = vadd.f32 %v1121_v12, %v863_v11 }
 0x1fb   :  { %v1456_v15 = vpack.c.bf16 %v1356_v13, %v1356_v13  ;;  %v1307_v16 = vmax.f32 %v1122_v14, 0.0 }
 0x1fc   :  { %v987_v17 = vpop.f32.mrf.mxu2 }
 0x1fd   :  { %1557 = vst.msk [vmem:[%s3348_s3 + $0x170] sm:$0xf] %vm1464_vm0, %v1456_v15  ;;  %v1407_v18 = vpack.c.bf16 %v1307_v16, %v1307_v16  ;;  %v988_v19 = vadd.f32 %v2949_v26, %v987_v17  ;;  %v1246_v20 = vpop.f32.mrf.mxu3 }
 0x1fe   :  { %v865_v21 = vpop.f32.mrf.mxu0 }
 0x1ff   :  { %1508 = vst.msk [vmem:[%s3348_s3 + $0xac] sm:$0xf] %vm1464_vm0, %v1407_v18  ;;  %v1247_v22 = vadd.f32 %v1246_v20, %v988_v19  ;;  %v866_v23 = vadd.f32 %v2949_v26, %v865_v21  ;;  %v1124_v24 = vpop.f32.mrf.mxu1 }
 0x201   :  { %v1357_v25 = vmax.f32 %v1247_v22, 0.0  ;;  %v1125_v27 = vadd.f32 %v1124_v24, %v866_v23 }
 0x203   :  { %v1457_v28 = vpack.c.bf16 %v1357_v25, %v1357_v25  ;;  %v1308_v48 = vmax.f32 %v1125_v27, 0.0 }
 0x204   :  { %v990_v29 = vpop.f32.mrf.mxu2 }
 0x205   :  { %1558 = vst.msk [vmem:[%s3348_s3 + $0x174] sm:$0xf] %vm1464_vm0, %v1457_v28  ;;  %v1408_v30 = vpack.c.bf16 %v1308_v48, %v1308_v48  ;;  %v991_v31 = vadd.f32 %v2949_v26, %v990_v29  ;;  %v1249_v32 = vpop.f32.mrf.mxu3 }
 0x206   :  { %v867_v33 = vpop.f32.mrf.mxu0 }
 0x207   :  { %1509 = vst.msk [vmem:[%s3348_s3 + $0xb0] sm:$0xf] %vm1464_vm0, %v1408_v30  ;;  %v1250_v34 = vadd.f32 %v1249_v32, %v991_v31  ;;  %v868_v35 = vadd.f32 %v2949_v26, %v867_v33  ;;  %v1126_v36 = vpop.f32.mrf.mxu1 }
 0x209   :  { %v1358_v37 = vmax.f32 %v1250_v34, 0.0  ;;  %v1127_v38 = vadd.f32 %v1126_v36, %v868_v35 }
 0x20b   :  { %v1458_v39 = vpack.c.bf16 %v1358_v37, %v1358_v37  ;;  %v1309_v40 = vmax.f32 %v1127_v38, 0.0 }
 0x20c   :  { %v992_v41 = vpop.f32.mrf.mxu2 }
 0x20d   :  { %1559 = vst.msk [vmem:[%s3348_s3 + $0x178] sm:$0xf] %vm1464_vm0, %v1458_v39  ;;  %v1409_v42 = vpack.c.bf16 %v1309_v40, %v1309_v40  ;;  %v993_v43 = vadd.f32 %v2949_v26, %v992_v41  ;;  %v1251_v44 = vpop.f32.mrf.mxu3 }
 0x20e   :  { %v870_v45 = vpop.f32.mrf.mxu0 }
 0x20f   :  { %1510 = vst.msk [vmem:[%s3348_s3 + $0xb4] sm:$0xf] %vm1464_vm0, %v1409_v42  ;;  %v1252_v46 = vadd.f32 %v1251_v44, %v993_v43  ;;  %v871_v47 = vadd.f32 %v2949_v26, %v870_v45  ;;  %v1129_v49 = vpop.f32.mrf.mxu1 }
 0x211   :  { %v1359_v50 = vmax.f32 %v1252_v46, 0.0  ;;  %v1130_v51 = vadd.f32 %v1129_v49, %v871_v47 }
 0x213   :  { %v1459_v52 = vpack.c.bf16 %v1359_v50, %v1359_v50  ;;  %v1310_v53 = vmax.f32 %v1130_v51, 0.0 }
 0x214   :  { %v995_v54 = vpop.f32.mrf.mxu2 }
 0x215   :  { %1560 = vst.msk [vmem:[%s3348_s3 + $0x17c] sm:$0xf] %vm1464_vm0, %v1459_v52  ;;  %v1410_v55 = vpack.c.bf16 %v1310_v53, %v1310_v53  ;;  %v996_v56 = vadd.f32 %v2949_v26, %v995_v54  ;;  %v1254_v57 = vpop.f32.mrf.mxu3 }
 0x216   :  { %v872_v58 = vpop.f32.mrf.mxu0 }
 0x217   :  { %1511 = vst.msk [vmem:[%s3348_s3 + $0xb8] sm:$0xf] %vm1464_vm0, %v1410_v55  ;;  %v1255_v59 = vadd.f32 %v1254_v57, %v996_v56  ;;  %v873_v60 = vadd.f32 %v2949_v26, %v872_v58  ;;  %v1131_v61 = vpop.f32.mrf.mxu1 }
 0x219   :  { %v1360_v62 = vmax.f32 %v1255_v59, 0.0  ;;  %v1132_v63 = vadd.f32 %v1131_v61, %v873_v60 }
 0x21b   :  { %v1460_v0 = vpack.c.bf16 %v1360_v62, %v1360_v62  ;;  %v1311_v1 = vmax.f32 %v1132_v63, 0.0 }
 0x21c   :  { %v997_v2 = vpop.f32.mrf.mxu2 }
 0x21d   :  { %1561 = vst.msk [vmem:[%s3348_s3 + $0x180] sm:$0xf] %vm1464_vm0, %v1460_v0  ;;  %v1411_v3 = vpack.c.bf16 %v1311_v1, %v1311_v1  ;;  %v998_v4 = vadd.f32 %v2949_v26, %v997_v2  ;;  %v1256_v5 = vpop.f32.mrf.mxu3 }
 0x21e   :  { %v875_v6 = vpop.f32.mrf.mxu0 }
 0x21f   :  { %1512 = vst.msk [vmem:[%s3348_s3 + $0xbc] sm:$0xf] %vm1464_vm0, %v1411_v3  ;;  %v1257_v7 = vadd.f32 %v1256_v5, %v998_v4  ;;  %v876_v8 = vadd.f32 %v2949_v26, %v875_v6  ;;  %v1134_v9 = vpop.f32.mrf.mxu1 }
 0x221   :  { %v1361_v10 = vmax.f32 %v1257_v7, 0.0  ;;  %v1135_v11 = vadd.f32 %v1134_v9, %v876_v8 }
 0x223   :  { %v1461_v12 = vpack.c.bf16 %v1361_v10, %v1361_v10  ;;  %v1312_v13 = vmax.f32 %v1135_v11, 0.0 }
 0x224   :  { %v1000_v14 = vpop.f32.mrf.mxu2 }
 0x225   :  { %1562 = vst.msk [vmem:[%s3348_s3 + $0x184] sm:$0xf] %vm1464_vm0, %v1461_v12  ;;  %v1412_v15 = vpack.c.bf16 %v1312_v13, %v1312_v13  ;;  %v1001_v16 = vadd.f32 %v2949_v26, %v1000_v14  ;;  %v1259_v17 = vpop.f32.mrf.mxu3 }
 0x226   :  { %v877_v18 = vpop.f32.mrf.mxu0 }
 0x227   :  { %1513 = vst.msk [vmem:[%s3348_s3 + $0xc0] sm:$0xf] %vm1464_vm0, %v1412_v15  ;;  %v1260_v19 = vadd.f32 %v1259_v17, %v1001_v16  ;;  %v878_v20 = vadd.f32 %v2949_v26, %v877_v18  ;;  %v1136_v21 = vpop.f32.mrf.mxu1 }
 0x229   :  { %v1362_v22 = vmax.f32 %v1260_v19, 0.0  ;;  %v1137_v23 = vadd.f32 %v1136_v21, %v878_v20 }
 0x22b   :  { %v1462_v24 = vpack.c.bf16 %v1362_v22, %v1362_v22  ;;  %v1313_v25 = vmax.f32 %v1137_v23, 0.0 }
 0x22c   :  { %v1002_v27 = vpop.f32.mrf.mxu2 }
 0x22d   :  { %1563 = vst.msk [vmem:[%s3348_s3 + $0x188] sm:$0xf] %vm1464_vm0, %v1462_v24  ;;  %v1413_v28 = vpack.c.bf16 %v1313_v25, %v1313_v25  ;;  %v1003_v48 = vadd.f32 %v2949_v26, %v1002_v27  ;;  %v1261_v29 = vpop.f32.mrf.mxu3 }
 0x22f   :  { %1514 = vst.msk [vmem:[%s3348_s3 + $0xc4] sm:$0xf] %vm1464_vm0, %v1413_v28  ;;  %v1262_v30 = vadd.f32 %v1261_v29, %v1003_v48 }
 0x231   :  { %v1363_v31 = vmax.f32 %v1262_v30, 0.0 }
 0x233   :  { %v1463_v32 = vpack.c.bf16 %v1363_v31, %v1363_v31 }
 0x235   :  { %1564 = vst.msk [vmem:[%s3348_s3 + $0x18c] sm:$0xf] %vm1464_vm0, %v1463_v32 }

// kernel: daqn_forward.3
= control target key start
LH: loop header
LB: loop body
LE: loop exit
PB: predicated region body
PF: predicated region fallthrough
CT: control target
= control target key end

     0   :  { %s5386_s0 = inlined_call_operand.vmem [shape: bf16[2,100,128], index: 0, kind: input, shape index: {}]   ;;  %s5387_s1 = inlined_call_operand.vmem [shape: f32[2,1,8], index: 1, kind: input, shape index: {}]   ;;  %s5388_s2 = inlined_call_operand.vmem [shape: bf16[2,2,128,64], index: 2, kind: input, shape index: {}]   ;;  %s5389_s3 = inlined_call_operand.vmem [shape: f32[1,64], index: 3, kind: input, shape index: {}]   ;;  %s5390_s4 = inlined_call_operand.vmem [shape: bf16[3,3,64,64], index: 4, kind: input, shape index: {}]   ;;  %s5391_s5 = inlined_call_operand.vmem [shape: f32[1,64], index: 5, kind: input, shape index: {}]   ;;  %s5392_s6 = inlined_call_operand.vmem [shape: bf16[64,128], index: 6, kind: input, shape index: {}]   ;;  %s5393_s7 = inlined_call_operand.vmem [shape: bf16[8,128], index: 7, kind: input, shape index: {}]   ;;  %s5394_s8 = inlined_call_operand.vmem [shape: f32[1,128], index: 8, kind: input, shape index: {}]   ;;  %s5395_s9 = inlined_call_operand.vmem [shape: f32[1,128], index: 9, kind: input, shape index: {}]   ;;  %s5396_s10 = inlined_call_operand.vmem [shape: f32[67,1], index: 10, kind: input, shape index: {}]   ;;  %s5397_s11 = inlined_call_operand.vmem [shape: bf16[64,512], index: 11, kind: input, shape index: {}]   ;;  %s5398_s12 = inlined_call_operand.vmem [shape: f32[1,512], index: 12, kind: input, shape index: {}]   ;;  %s5399_s13 = inlined_call_operand.vmem [shape: bf16[512,128], index: 13, kind: input, shape index: {}]   ;;  %s5400_s14 = inlined_call_operand.vmem [shape: bf16[8,128], index: 14, kind: input, shape index: {}]   ;;  %s5401_s15 = inlined_call_operand.vmem [shape: f32[1,128], index: 15, kind: input, shape index: {}]   ;;  %s5402_s16 = inlined_call_operand.hbm [shape: f32[2,1,128], index: 16, kind: output, shape index: {}]  }
   0x1   :  { %5411 = sst [smem:[#allocation13_spill]] %s5386_s0 }
   0x2   :  { %5412 = sst [smem:[#allocation14_spill]] %s5401_s15 }
   0x3   :  { %21 = vsyncpa [#allocation4], 0 }
   0x4   :  { %23 = vsyncpa [#allocation4 + $0x1], 0  ;;  %s4440_s21 = smov 0   ;;  %s4442_s22 = smov 0  }
   0x5   :  { %s4444_s23 = smov 0   ;;  %s4446_s24 = smov 0  }
   0x6 LB: > { %5413 = sst [smem:[#allocation6_spill]] %s4340_s21  ;;  %s4461_s25 = sadd.s32 4294967295, %s4352_s24   ;;  %s4352_s24 = sphi %s4446_s24, %s5430_s24   ;;  %s4348_s23 = sphi %s4444_s23, %s5432_s23   ;;  %s4344_s22 = sphi %s4442_s22, %s5434_s22   ;;  %s4340_s21 = sphi %s4440_s21, %s5433_s21  }
   0x7   : > { %5414 = sst [smem:[#allocation7_spill]] %s4348_s23  ;;  %s3305_s26 = sadd.s32 4294967294, %s4352_s24  }
   0x8   : > { %5415 = sst [smem:[#allocation8_spill]] %s4352_s24  ;;  %s4465_s27 = sadd.s32 1, %s4352_s24  }
   0x9   : > { %5416 = sst [smem:[#allocation9_spill]] %s4465_s27  ;;  %s382_s28 = sadd.s32 1, %s4348_s23 }
   0xa   : > { %s379_s29 = ssub.s32 %s4352_s24, %s4465_s27  ;;  %p392_p0 = scmp.ne.s32.totalorder %s4348_s23, %s4344_s22 }
   0xb   : > { %p380_p1 = scmp.eq.s32.totalorder %s379_s29, 0  ;;  %p393_p2 = scmp.eq.s32.totalorder %s4461_s25, 1 }
   0xc   : > { %p398_p3 = scmp.ne.s32.totalorder %s4344_s22, %s4340_s21  ;;  %p399_p4 = scmp.eq.s32.totalorder %s3305_s26, 1 }
   0xd   : > { %s4476_s30 = scalar_select %p380_p1, %s4348_s23, %s382_s28  }
   0xe   : > { %p4478_p5 = por %p393_p2, %p392_p0  ;;  %p4482_p6 = por %p399_p4, %p398_p3 }
   0xf   : > { %5417 = sst [smem:[#allocation10_spill]] %s4476_s30  ;;  %p3308_p7 = scmp.ge.s32.totalorder %s4352_s24, 1 }
  0x10   : > { %s5418_s0 = scalar_select %p4478_p5, 1, 0 }
  0x11   : > { %s5420_s17 = scalar_select %p4482_p6, 1, 0 }
  0x12   : > { %5419 = sst [smem:[#allocation11_spill]] %s5418_s0  ;;  %p473_p8 = scmp.lt.s32.totalorder %s4352_s24, 3 }
  0x13   : > { %5421 = sst [smem:[#allocation12_spill]] %s5420_s17 }
  0x14   : > { %p474_p9 = pnand %p3308_p7, %p473_p8 }
  0x15   : > { %p525_p10 = scmp.lt.s32.totalorder (!%p474_p9), %s4461_s25, 1  ;;  %s5422_s0 = sld [smem:[#allocation13_spill]] (!%p474_p9) }
  0x16   : > { %477 = sbr.rel (%p474_p9) target bundleno = 1378 (0x562), region = 84  ;;  %s523_s18 = sand.u32 (!%p474_p9), 1, %s4344_s22  }
  0x17   : > { %s3237_s19 = scalar_lea.hbm (!%p474_p9), %s5402_s16, %s4461_s25  ;;  %s524_s26 = scalar_lea.vmem (!%p474_p9), [#allocation3], %s523_s18 }
  0x18   : > { %s3239_s28 = sshll.u32 (!%p474_p9), %s524_s26, 4  ;;  %s3241_s23 = sshll.u32 (!%p474_p9), %s3237_s19, 4  ;;  %s3240_s28 = int_to_ptr.vmem [resolvable:$true] %s3239_s28  ;;  %s3242_s23 = int_to_ptr.hbm [resolvable:$true] %s3241_s23 }
  0x19   : > { %s4310_s17 = scalar_lea.hbm (!%p474_p9), %s5402_s16, 2 }
  0x1b   : > { %v4089_v0 = vld [vmem:[%s5388_s2 + $0x78] sm:$0xff]  ;;  %v4088_v4 = vld [vmem:[%s5388_s2 + $0x70] sm:$0xff]  ;;  %s4508_s20 = scalar_select %p525_p10, %s4461_s25, 1  ;;  %v4087_v8 = vld [vmem:[%s5388_s2 + $0x68] sm:$0xff]  ;;  %vm611_vm0 = vsmask.f32 7424 }
  0x1c   : > { %v4081_v1 = vld [vmem:[%s5388_s2 + $0x38] sm:$0xff]  ;;  %713 = vmatpush.bf16.msra.mxu0 %v4089_v0  ;;  %v4080_v5 = vld [vmem:[%s5388_s2 + $0x30] sm:$0xff]  ;;  %v4079_v9 = vld [vmem:[%s5388_s2 + $0x28] sm:$0xff]  ;;  %vm904_vm1 = vcmask 1046528   ;;  %vm1038_vm2 = vsmask.f32 6400 }
  0x1d   : > { %v4103_v2 = vld [vmem:[%s5388_s2 + $0xb8] sm:$0xff]  ;;  %806 = vmatpush.bf16.msra.mxu1 %v4081_v1  ;;  %v4102_v6 = vld [vmem:[%s5388_s2 + $0xb0] sm:$0xff]  ;;  %s4222_s29 = smul.u32 52, %s4508_s20  ;;  %v4101_v10 = vld [vmem:[%s5388_s2 + $0xa8] sm:$0xff]  ;;  %vm1237_vm3 = vcmask 519168   ;;  %vm1367_vm4 = vcmask 523264   ;;  %s532_s30 = scalar_lea.vmem %s5387_s1, %s4508_s20 }
  0x1e   : > { %v4111_v3 = vld [vmem:[%s5388_s2 + $0xf8] sm:$0xff]  ;;  %970 = vmatpush.bf16.msra.mxu2 %v4103_v2  ;;  %v4110_v7 = vld [vmem:[%s5388_s2 + $0xf0] sm:$0xff]  ;;  %v4109_v11 = vld [vmem:[%s5388_s2 + $0xe8] sm:$0xff]  ;;  %vm1249_vm5 = vcmask 516096   ;;  %vm1250_vm6 = vsmask.f32 256 }
  0x1f   : > { %1146 = vmatpush.bf16.msra.mxu3 %v4111_v3  ;;  %s4532_s15 = scalar_lea.vmem %s5422_s0, %s4222_s29  ;;  %v4086_v12 = vld [vmem:[%s5388_s2 + $0x60] sm:$0xff]  ;;  %v4085_v16 = vld [vmem:[%s5388_s2 + $0x58] sm:$0xff]  ;;  %v4084_v25 = vld [vmem:[%s5388_s2 + $0x50] sm:$0xff]  ;;  %vm1872_vm8 = vcmask 1045504   ;;  %vm2103_vm9 = vsmask.f32 5376 }
  0x20   : > { %714 = vmatpush.bf16.msra.mxu0 %v4088_v4  ;;  %v4078_v13 = vld [vmem:[%s5388_s2 + $0x20] sm:$0xff]  ;;  %v4090_v18 = vld [vmem:[%s4532_s15 + $0x4] sm:$0xf0]  ;;  %v4077_v19 = vld [vmem:[%s5388_s2 + $0x18] sm:$0xff]  ;;  %vm2273_vm10 = vcmask 1044480   ;;  %vm2404_vm11 = vcmask 1043456  }
  0x21   : > { %807 = vmatpush.bf16.msra.mxu1 %v4080_v5  ;;  %v4100_v14 = vld [vmem:[%s5388_s2 + $0xa0] sm:$0xff]  ;;  %v4099_v20 = vld [vmem:[%s5388_s2 + $0x98] sm:$0xff]  ;;  %v4562_v23 = vld [vmem:[%s4532_s15 + $0xc] sm:$0xff]  ;;  %vm2400_vm12 = vcmask 64512   ;;  %vm2545_vm13 = vcmask 1042432   ;;  %vm2567_vm14 = vcmask 7168  }
  0x22   : > { %971 = vmatpush.bf16.msra.mxu2 %v4102_v6  ;;  %v4108_v15 = vld [vmem:[%s5388_s2 + $0xe0] sm:$0xff]  ;;  %v4107_v22 = vld [vmem:[%s5388_s2 + $0xd8] sm:$0xff]  ;;  %v4076_v26 = vld [vmem:[%s5388_s2 + $0x10] sm:$0xff]  ;;  %v1048_v33 = vshrl.u32 %v4562_v23, 16  ;;  %v1051_v34 = vshll.u32 %v4562_v23, 16  ;;  %v906_v53 = vrot.slane %v4562_v23, 1 }
  0x23   : > { %1147 = vmatpush.bf16.msra.mxu3 %v4110_v7  ;;  %v3432_v17 = vld [vmem:[%s4532_s15 + $0x4] sm:$0xe]  ;;  %v4571_v27 = vld [vmem:[%s4532_s15 + $0x8] sm:$0xff]  ;;  %v4098_v29 = vld [vmem:[%s5388_s2 + $0x90] sm:$0xff]  ;;  %vm2580_vm15 = vcmask 2048   ;;  %s5425_s29 = sld [smem:[#allocation14_spill]] }
  0x24   : > { %715 = vmatpush.bf16.msra.mxu0 %v4087_v8  ;;  %v4068_v21 = vld [vmem:[%s4532_s15] sm:$0xff]  ;;  %v3433_v24 = vor.u32 %v4090_v18, %v3432_v17  ;;  %v4106_v30 = vld [vmem:[%s5388_s2 + $0xd0] sm:$0xff]  ;;  %v4083_v35 = vld [vmem:[%s5388_s2 + $0x48] sm:$0xff]  ;;  %v620_v39 = vshll.u32 %v4571_v27, 16  ;;  %v1050_v44 = vrot.slane %v1048_v33, 1  ;;  %v1053_v45 = vrot.slane %v1051_v34, 2 }
  0x25   : > { %808 = vmatpush.bf16.msra.mxu1 %v4079_v9  ;;  %v615_v28 = vshll.u32 %v4068_v21, 16  ;;  %v4075_v36 = vld [vmem:[%s5388_s2 + $0x8] sm:$0xff]  ;;  %v613_v37 = vshrl.u32 %v4068_v21, 16  ;;  %v4082_v46 = vld [vmem:[%s5388_s2 + $0x40] sm:$0xff]  ;;  %v4092_v59 = vld [vmem:[%s4532_s15 + $0x14] sm:$0xff]  ;;  %v624_v63 = vshrl.u32 %v4571_v27, 16 }
  0x26   : > { %972 = vmatpush.bf16.msra.mxu2 %v4101_v10  ;;  %v1040_v31 = vshrl.u32 %v3433_v24, 16  ;;  %v1043_v32 = vshll.u32 %v3433_v24, 16  ;;  %v4097_v40 = vld [vmem:[%s5388_s2 + $0x88] sm:$0xff]  ;;  %v4074_v47 = vld [vmem:[%s5388_s2] sm:$0xff]  ;;  %v622_v49 = vrot.slane %v620_v39, 1  ;;  %v905_v52 = vrot.slane %v3433_v24, 1  ;;  %vm4848_vm7 = vmand %vm1249_vm5, %vm1250_vm6 }
  0x27   : > { %1148 = vmatpush.bf16.msra.mxu3 %v4109_v11  ;;  %v617_v38 = vrot.slane %v615_v28, 1  ;;  %v4105_v41 = vld [vmem:[%s5388_s2 + $0xc8] sm:$0xff]  ;;  %v4096_v50 = vld [vmem:[%s5388_s2 + $0x80] sm:$0xff]  ;;  %v1054_v55 = vor.u32 %v1053_v45, %v1050_v44  ;;  %v4070_v60 = vld [vmem:[%s4532_s15 + $0x10] sm:$0xff]  ;;  %v1057_v61 = vshrl.u32 %v4092_v59, 16  ;;  %v1060_v62 = vshll.u32 %v4092_v59, 16 }
  0x28   : > { %716 = vmatpush.bf16.msra.mxu0 %v4086_v12  ;;  %v1042_v42 = vrot.slane %v1040_v31, 1  ;;  %v1045_v43 = vrot.slane %v1043_v32, 2  ;;  %v4104_v51 = vld [vmem:[%s5388_s2 + $0xc0] sm:$0xff]  ;;  %v907_v57 = vsel %vm904_vm1, %v905_v52, %v906_v53  ;;  %v628_v0 = vshll.u32 %v4070_v60, 16  ;;  %v4071_v11 = vld [vmem:[%s4532_s15 + $0x18] sm:$0xff]  ;;  %s4304_s25 = sshra.s32 %s3242_s23, 4  ;;  %s4305_s25 = int_to_ptr.hbm [resolvable:$true] %s4304_s25 }
  0x29   : > { %809 = vmatpush.bf16.msra.mxu1 %v4078_v13  ;;  %v618_v48 = vor.u32 %v617_v38, %v613_v37  ;;  %v1059_v1 = vrot.slane %v1057_v61, 1  ;;  %v1062_v2 = vrot.slane %v1060_v62, 2  ;;  %v626_v3 = vor.u32 %v624_v63, %v622_v49  ;;  %v4093_v10 = vld [vmem:[%s4532_s15 + $0x1c] sm:$0xff]  ;;  %v3452_v37 = vld [vmem:[%s4532_s15 + $0x2c] sm:$0xf]  ;;  %s4306_s20 = scalar_lea.hbm %s4305_s25, 1  ;;  %p4311_p0 = scmp.lt.s32.totalorder %s4305_s25, %s5402_s16 }
  0x2a   : > { %973 = vmatpush.bf16.msra.mxu2 %v4100_v14  ;;  %v1046_v54 = vor.u32 %v1045_v43, %v1042_v42  ;;  %v630_v4 = vrot.slane %v628_v0, 1  ;;  %v908_v5 = vrot.slane %v4092_v59, 1  ;;  %v1066_v12 = vshrl.u32 %v4093_v10, 16  ;;  %v4095_v38 = vld [vmem:[%s4532_s15 + $0x2c] sm:$0x30]  ;;  %v4118_v63 = vld [vmem:[%s5390_s4 + $0x18] sm:$0xff]  ;;  %p4307_p11 = scmp.ne.s32.totalorder %s4305_s25, %s4306_s20  ;;  %p4312_p1 = scmp.lt.s32.totalorder %s4310_s17, %s4306_s20 }
  0x2b   : > { %1149 = vmatpush.bf16.msra.mxu3 %v4108_v15  ;;  %v623_v56 = vsel %vm611_vm0, %v618_v48, %v622_v49  ;;  %v1063_v6 = vor.u32 %v1062_v2, %v1059_v1  ;;  %v1069_v13 = vshll.u32 %v4093_v10, 16  ;;  %v632_v14 = vshrl.u32 %v4070_v60, 16  ;;  %v3348_v43 = vld [vmem:[%s4532_s15 + $0x28] sm:$0xf]  ;;  %v4073_v44 = vld [vmem:[%s4532_s15 + $0x28] sm:$0x10] }
  0x2c   : > { %717 = vmatpush.bf16.msra.mxu0 %v4085_v16  ;;  %v1055_v58 = vsel %vm1038_vm2, %v1046_v54, %v1054_v55  ;;  %v631_v7 = vsel %vm611_vm0, %v626_v3, %v630_v4  ;;  %v909_v8 = vsel %vm904_vm1, %v906_v53, %v908_v5  ;;  %v636_v15 = vshll.u32 %v4071_v11, 16  ;;  %v4121_v49 = vld [vmem:[%s5390_s4 + $0x30] sm:$0xff]  ;;  %v4120_v0 = vld [vmem:[%s5390_s4 + $0x28] sm:$0xff]  ;;  %v4115_v3 = vld [vmem:[%s5390_s4] sm:$0xff]  ;;  %p4308_p12 = pnand %p4307_p11, %p4478_p5  ;;  %p4313_p2 = por %p4312_p1, %p4311_p0 }
  0x2d   : > { %810 = vmatpush.bf16.msra.mxu1 %v4077_v19  ;;  %v1064_v9 = vsel %vm1038_vm2, %v1054_v55, %v1063_v6  ;;  %v1068_v16 = vrot.slane %v1066_v12, 1  ;;  %v1071_v17 = vrot.slane %v1069_v13, 2  ;;  %v634_v18 = vor.u32 %v632_v14, %v630_v4  ;;  %v4117_v1 = vld [vmem:[%s5390_s4 + $0x10] sm:$0xff]  ;;  %v4116_v2 = vld [vmem:[%s5390_s4 + $0x8] sm:$0xff] }
  0x2e   : > { %974 = vmatpush.bf16.msra.mxu2 %v4099_v20  ;;  %v638_v19 = vrot.slane %v636_v15, 1  ;;  %v910_v20 = vrot.slane %v4093_v10, 1  ;;  %v3453_v42 = vor.u32 %v4095_v38, %v3452_v37  ;;  %v3349_v45 = vor.u32 %v4073_v44, %v3348_v43  ;;  %v4125_v14 = vld [vmem:[%s5390_s4 + $0x50] sm:$0xff]  ;;  %p4309_p13 = pneg %p4308_p12 }
  0x2f   : > { %1150 = vmatpush.bf16.msra.mxu3 %v4107_v22 }
  0x30   : > { %718 = vmatpush.bf16.msra.mxu0 %v4084_v25  ;;  %v639_v22 = vsel %vm611_vm0, %v634_v18, %v638_v19  ;;  %v911_v23 = vsel %vm904_vm1, %v908_v5, %v910_v20  ;;  %v4094_v25 = vld [vmem:[%s4532_s15 + $0x24] sm:$0xff]  ;;  %v1087_v48 = vshll.u32 %v3453_v42, 16  ;;  %v656_v61 = vshrl.u32 %v3349_v45, 16  ;;  %p4314_p3 = pnand %p4313_p2, %p4309_p13 }
  0x31   : > { %811 = vmatpush.bf16.msra.mxu1 %v4076_v26  ;;  %v4072_v26 = vld [vmem:[%s4532_s15 + $0x20] sm:$0xff]  ;;  %v1078_v28 = vshll.u32 %v4094_v25, 16 }
  0x32   : > { %975 = vmatpush.bf16.msra.mxu2 %v4098_v29  ;;  %v640_v29 = vshrl.u32 %v4071_v11, 16  ;;  %v1089_v53 = vrot.slane %v1087_v48, 2 }
  0x33   : > { %1151 = vmatpush.bf16.msra.mxu3 %v4106_v30  ;;  %v644_v30 = vshll.u32 %v4072_v26, 16  ;;  %v1080_v32 = vrot.slane %v1078_v28, 2  ;;  %v4123_v28 = vld [vmem:[%s5390_s4 + $0x40] sm:$0xff] }
  0x34   : > { %719 = vmatpush.bf16.msra.mxu0 %v4083_v35  ;;  %v642_v33 = vor.u32 %v640_v29, %v638_v19  ;;  %v912_v35 = vrot.slane %v4094_v25, 1  ;;  %v4124_v19 = vld [vmem:[%s5390_s4 + $0x48] sm:$0xff]  ;;  %v4132_v29 = vld [vmem:[%s5390_s4 + $0x70] sm:$0xff] }
  0x35   : > { %812 = vmatpush.bf16.msra.mxu1 %v4075_v36  ;;  %v646_v34 = vrot.slane %v644_v30, 1 }
  0x36   : > { %976 = vmatpush.bf16.msra.mxu2 %v4097_v40  ;;  %v913_v40 = vsel %vm904_vm1, %v910_v20, %v912_v35 }
  0x37   : > { %1152 = vmatpush.bf16.msra.mxu3 %v4105_v41  ;;  %v647_v39 = vsel %vm611_vm0, %v642_v33, %v646_v34  ;;  %v4131_v33 = vld [vmem:[%s5390_s4 + $0x68] sm:$0xff] }
  0x38   : > { %720 = vmatpush.bf16.msra.mxu0 %v4082_v46  ;;  %v4122_v46 = vld [vmem:[%s5390_s4 + $0x38] sm:$0xff] }
  0x39   : > { %813 = vmatpush.bf16.msra.mxu1 %v4074_v47  ;;  %v1084_v47 = vshrl.u32 %v3453_v42, 16 }
  0x3a   : > { %977 = vmatpush.bf16.msra.mxu2 %v4096_v50  ;;  %v648_v50 = vshrl.u32 %v4072_v26, 16 }
  0x3b   : > { %1153 = vmatpush.bf16.msra.mxu3 %v4104_v51  ;;  %721 = vmatmul.bf16.vlgmr.msra.gmra.mxu0 %v623_v56  ;;  %v652_v51 = vshll.u32 %v3349_v45, 16  ;;  %v1086_v52 = vrot.slane %v1084_v47, 1  ;;  %v914_v56 = vrot.slane %v3453_v42, 1 }
  0x3c   : > { %814 = vmatmul.bf16.vlgmr.msra.gmra.mxu1 %v4068_v21  ;;  %v1072_v21 = vor.u32 %v1071_v17, %v1068_v16  ;;  %1387 = vmatpush.bf16.msrb.mxu0 %v4122_v46  ;;  %v650_v54 = vor.u32 %v648_v50, %v646_v34  ;;  %v4119_v16 = vld [vmem:[%s5390_s4 + $0x20] sm:$0xff]  ;;  %v4133_v17 = vld [vmem:[%s5390_s4 + $0x78] sm:$0xff] }
  0x3d   : > { %978 = vmatmul.bf16.vlgmr.msra.gmra.mxu2 %v907_v57  ;;  %v654_v55 = vrot.slane %v652_v51, 1  ;;  %v1090_v57 = vor.u32 %v1089_v53, %v1086_v52  ;;  %v915_v59 = vsel %vm904_vm1, %v912_v35, %v914_v56  ;;  %1454 = vmatpush.bf16.msrb.mxu1 %v4118_v63 }
  0x3e   : > { %1154 = vmatmul.bf16.vlgmr.msra.gmra.mxu3 %v1055_v58  ;;  %v1073_v24 = vsel %vm1038_vm2, %v1063_v6, %v1072_v21 }
  0x3f   : > { %v655_v58 = vsel %vm611_vm0, %v650_v54, %v654_v55  ;;  %v658_v62 = vor.u32 %v656_v61, %v654_v55  ;;  %1683 = vmatpush.bf16.msrb.mxu3 %v4133_v17  ;;  %v4137_v54 = vld [vmem:[%s5390_s4 + $0x98] sm:$0xff] }
  0x40   : > { %1388 = vmatpush.bf16.msrb.mxu0 %v4121_v49 }
  0x41   : > { %1455 = vmatpush.bf16.msrb.mxu1 %v4117_v1 }
  0x43   : > { %1684 = vmatpush.bf16.msrb.mxu3 %v4132_v29 }
  0x44   : > { %1389 = vmatpush.bf16.msrb.mxu0 %v4120_v0 }
  0x45   : > { %1456 = vmatpush.bf16.msrb.mxu1 %v4116_v2 }
  0x47   : > { %1685 = vmatpush.bf16.msrb.mxu3 %v4131_v33 }
  0x48   : > { %1390 = vmatpush.bf16.msrb.mxu0 %v4119_v16 }
  0x49   : > { %1457 = vmatpush.bf16.msrb.mxu1 %v4115_v3 }
  0x4b   : > { %726 = vmatmul.bf16.gmra.mxu0 %v631_v7  ;;  %v4126_v7 = vld [vmem:[%s5390_s4 + $0x58] sm:$0xff] }
  0x4c   : > { %819 = vmatmul.bf16.gmra.mxu1 %v4571_v27  ;;  %v1075_v27 = vshrl.u32 %v4094_v25, 16  ;;  %1552 = vmatpush.bf16.msrb.mxu2 %v4126_v7 }
  0x4d   : > { %983 = vmatmul.bf16.gmra.mxu2 %v909_v8  ;;  %1817 = vmatpush.bf16.msra.mxu0 %v4137_v54 }
  0x4e   : > { %1159 = vmatmul.bf16.gmra.mxu3 %v1064_v9  ;;  %v1077_v31 = vrot.slane %v1075_v27, 1 }
  0x50   : > { %v1081_v36 = vor.u32 %v1080_v32, %v1077_v31  ;;  %1553 = vmatpush.bf16.msrb.mxu2 %v4125_v14 }
  0x52   : > { %v1082_v41 = vsel %vm1038_vm2, %v1072_v21, %v1081_v36 }
  0x54   : > { %1554 = vmatpush.bf16.msrb.mxu2 %v4124_v19 }
  0x58   : > { %1555 = vmatpush.bf16.msrb.mxu2 %v4123_v28 }
  0x5b   : > { %731 = vmatmul.bf16.gmra.mxu0 %v639_v22 }
  0x5c   : > { %824 = vmatmul.bf16.gmra.mxu1 %v4070_v60  ;;  %v1091_v60 = vsel %vm1038_vm2, %v1081_v36, %v1090_v57 }
  0x5d   : > { %988 = vmatmul.bf16.gmra.mxu2 %v911_v23 }
  0x5e   : > { %1164 = vmatmul.bf16.gmra.mxu3 %v1073_v24 }
  0x6b   : > { %736 = vmatmul.bf16.gmra.mxu0 %v647_v39 }
  0x6c   : > { %829 = vmatmul.bf16.gmra.mxu1 %v4071_v11  ;;  %v4661_v11 = vld [vmem:[%s5389_s3] ss:$0 sm:$0xff] }
  0x6d   : > { %993 = vmatmul.bf16.gmra.mxu2 %v913_v40 }
  0x6e   : > { %1169 = vmatmul.bf16.gmra.mxu3 %v1082_v41  ;;  %v4130_v41 = vld [vmem:[%s5390_s4 + $0x60] sm:$0xff] }
  0x6f   : > { %1686 = vmatpush.bf16.msrb.mxu3 %v4130_v41 }
  0x7b   : > { %741 = vmatmul.bf16.gmra.mxu0 %v655_v58 }
  0x7c   : > { %834 = vmatmul.bf16.gmra.mxu1 %v4072_v26 }
  0x7d   : > { %998 = vmatmul.bf16.gmra.mxu2 %v915_v59 }
  0x7e   : > { %1174 = vmatmul.bf16.gmra.mxu3 %v1091_v60 }
  0x8b   : > { %746 = vmatmul.bf16.gmra.mxu0 %v658_v62 }
  0x8c   : > { %839 = vmatmul.bf16.gmra.mxu1 %v3349_v45 }
  0x8d   : > { %1003 = vmatmul.bf16.gmra.mxu2 %v914_v56 }
  0x8e   : > { %1179 = vmatmul.bf16.gmra.mxu3 %v1090_v57 }
  0xb8   : > { %v722_v4 = vpop.f32.mrf.mxu0 }
  0xb9   : > { %v815_v5 = vpop.f32.mrf.mxu1 }
  0xba   : > { %v816_v6 = vadd.f32 %v815_v5, %v722_v4 }
  0xc0   : > { %v979_v8 = vpop.f32.mrf.mxu2  ;;  %v724_v12 = vpop.f32.mrf.mxu0 }
  0xc1   : > { %v1155_v9 = vpop.f32.mrf.mxu3  ;;  %v1009_v10 = vadd.f32 %v979_v8, %v816_v6  ;;  %v817_v13 = vpop.f32.mrf.mxu1 }
  0xc2   : > { %v818_v21 = vadd.f32 %v817_v13, %v724_v12 }
  0xc3   : > { %v1185_v15 = vadd.f32 %v1155_v9, %v1009_v10 }
  0xc5   : > { %v1201_v18 = vadd.f32 %v4661_v11, %v1185_v15 }
  0xc7   : > { %v1213_v20 = vmax.f32 %v1201_v18, 0.0 }
  0xc8   : > { %v981_v22 = vpop.f32.mrf.mxu2  ;;  %v727_v26 = vpop.f32.mrf.mxu0 }
  0xc9   : > { %v1157_v23 = vpop.f32.mrf.mxu3  ;;  %v1225_v24 = vpack.c.bf16 %v1213_v20, %v1213_v20  ;;  %v1010_v25 = vadd.f32 %v981_v22, %v818_v21  ;;  %v820_v27 = vpop.f32.mrf.mxu1 }
  0xca   : > { %v821_v32 = vadd.f32 %v820_v27, %v727_v26 }
  0xcb   : > { %1238 = vst.msk [vmem:[#allocation2] sm:$0xf] %vm1237_vm3, %v1225_v24  ;;  %v1186_v30 = vadd.f32 %v1157_v23, %v1010_v25  ;;  %v4136_v23 = vld [vmem:[%s5390_s4 + $0x90] sm:$0xff] }
  0xcc   : > { %1818 = vmatpush.bf16.msra.mxu0 %v4136_v23 }
  0xcd   : > { %v1202_v31 = vadd.f32 %v4661_v11, %v1186_v30 }
  0xcf   : > { %v1214_v34 = vmax.f32 %v1202_v31, 0.0 }
  0xd0   : > { %v984_v35 = vpop.f32.mrf.mxu2  ;;  %v729_v39 = vpop.f32.mrf.mxu0 }
  0xd1   : > { %v1160_v36 = vpop.f32.mrf.mxu3  ;;  %v1226_v37 = vpack.c.bf16 %v1214_v34, %v1214_v34  ;;  %v1011_v38 = vadd.f32 %v984_v35, %v821_v32  ;;  %v822_v40 = vpop.f32.mrf.mxu1 }
  0xd2   : > { %v823_v45 = vadd.f32 %v822_v40, %v729_v39  ;;  %v4220_v8 = vld [vmem:[#allocation2] sm:$0xe] }
  0xd3   : > { %1239 = vst.msk [vmem:[#allocation2 + $0x4] sm:$0xf] %vm1237_vm3, %v1226_v37  ;;  %v1187_v42 = vadd.f32 %v1160_v36, %v1011_v38 }
  0xd5   : > { %v1203_v43 = vadd.f32 %v4661_v11, %v1187_v42 }
  0xd7   : > { %v1215_v44 = vmax.f32 %v1203_v43, 0.0 }
  0xd8   : > { %v986_v46 = vpop.f32.mrf.mxu2  ;;  %v732_v50 = vpop.f32.mrf.mxu0 }
  0xd9   : > { %v1162_v47 = vpop.f32.mrf.mxu3  ;;  %v1227_v48 = vpack.c.bf16 %v1215_v44, %v1215_v44  ;;  %v1012_v49 = vadd.f32 %v986_v46, %v823_v45  ;;  %v825_v51 = vpop.f32.mrf.mxu1 }
  0xda   : > { %v4216_v52 = vld [vmem:[#allocation2] sm:$0xff]   ;;  %v826_v56 = vadd.f32 %v825_v51, %v732_v50 }
  0xdb   : > { %1240 = vst.msk [vmem:[#allocation2 + $0x8] sm:$0xf] %vm1237_vm3, %v1227_v48  ;;  %v1188_v53 = vadd.f32 %v1162_v47, %v1012_v49  ;;  %3591 = vmatmul.msk.bf16.vlgmr.msrb.gmra.mxu1 %vm1367_vm4, %v4216_v52  ;;  %v4219_v3 = vld [vmem:[#allocation2] sm:$0xf0]  ;;  %v1307_v4 = vshll.u32 %v4216_v52, 16  ;;  %v1305_v24 = vshrl.u32 %v4216_v52, 16 }
  0xdc   : > { %v1590_v5 = vld [vmem:[#allocation2 + $0x4] sm:$0xe]  ;;  %v4221_v13 = vor.u32 %v4220_v8, %v4219_v3  ;;  %v4141_v8 = vld [vmem:[%s5390_s4 + $0xb8] sm:$0xff] }
  0xdd   : > { %v1204_v55 = vadd.f32 %v4661_v11, %v1188_v53  ;;  %v1617_v18 = vunpack.c.l.b16 %v1590_v5  ;;  %v1309_v19 = vrot.slane %v1307_v4, 1  ;;  %1925 = vmatpush.bf16.msra.mxu1 %v4141_v8 }
  0xde   : > { %v1500_v25 = vrot.slane %v4221_v13, 1 }
  0xdf   : > { %v1216_v57 = vmax.f32 %v1204_v55, 0.0  ;;  %v1310_v30 = vor.u32 %v1309_v19, %v1305_v24 }
  0xe0   : > { %v989_v58 = vpop.f32.mrf.mxu2  ;;  %v734_v62 = vpop.f32.mrf.mxu0 }
  0xe1   : > { %v1165_v59 = vpop.f32.mrf.mxu3  ;;  %v1228_v60 = vpack.c.bf16 %v1216_v57, %v1216_v57  ;;  %v1013_v61 = vadd.f32 %v989_v58, %v826_v56  ;;  %v827_v63 = vpop.f32.mrf.mxu1 }
  0xe2   : > { %v4699_v1 = vld [vmem:[#allocation2 + $0x8] sm:$0xf]  ;;  %v828_v7 = vadd.f32 %v827_v63, %v734_v62 }
  0xe3   : > { %1241 = vst.msk [vmem:[#allocation2 + $0xc] sm:$0xf] %vm1237_vm3, %v1228_v60  ;;  %v1189_v0 = vadd.f32 %v1165_v59, %v1013_v61  ;;  %v1618_v9 = vunpack.c.l.b16 %v4699_v1 }
  0xe5   : > { %v1205_v2 = vadd.f32 %v4661_v11, %v1189_v0  ;;  %v1626_v22 = vpack.c.b16 %v1618_v9, %v1617_v18 }
  0xe7   : > { %v1217_v6 = vmax.f32 %v1205_v2, 0.0  ;;  %v1731_v34 = vshrl.u32 %v1626_v22, 16  ;;  %v1734_v38 = vshll.u32 %v1626_v22, 16  ;;  %v1631_v45 = vrot.slane %v1626_v22, 1 }
  0xe8   : > { %v991_v10 = vpop.f32.mrf.mxu2  ;;  %v737_v16 = vpop.f32.mrf.mxu0 }
  0xe9   : > { %v1167_v12 = vpop.f32.mrf.mxu3  ;;  %v1229_v14 = vpack.c.bf16 %v1217_v6, %v1217_v6  ;;  %v1014_v15 = vadd.f32 %v991_v10, %v828_v7  ;;  %v830_v17 = vpop.f32.mrf.mxu1  ;;  %v1733_v46 = vrot.slane %v1731_v34, 1  ;;  %v1736_v48 = vrot.slane %v1734_v38, 2 }
  0xea   : > { %v4703_v20 = vld [vmem:[#allocation2 + $0x8] sm:$0xff]  ;;  %v831_v29 = vadd.f32 %v830_v17, %v737_v16 }
  0xeb   : > { %1242 = vst.msk [vmem:[#allocation2 + $0x10] sm:$0xf] %vm1237_vm3, %v1229_v14  ;;  %v1190_v21 = vadd.f32 %v1167_v12, %v1014_v15  ;;  %3592 = vmatmul.msk.bf16.gmra.mxu1 %vm1367_vm4, %v4703_v20  ;;  %v1501_v26 = vrot.slane %v4703_v20, 1  ;;  %v1312_v27 = vshll.u32 %v4703_v20, 16  ;;  %v1737_v59 = vor.u32 %v1736_v48, %v1733_v46 }
  0xec   : > { %v1316_v6 = vshrl.u32 %v4703_v20, 16  ;;  %v4140_v20 = vld [vmem:[%s5390_s4 + $0xb0] sm:$0xff] }
  0xed   : > { %v1206_v28 = vadd.f32 %v4661_v11, %v1190_v21  ;;  %v1502_v31 = vsel %vm904_vm1, %v1500_v25, %v1501_v26  ;;  %v1314_v32 = vrot.slane %v1312_v27, 1  ;;  %1926 = vmatpush.bf16.msra.mxu1 %v4140_v20 }
  0xee   : > { %3620 = vmatmul.msk.bf16.vlgmr.msrb.gmra.mxu2 %vm1367_vm4, %v1502_v31 }
  0xef   : > { %v1218_v33 = vmax.f32 %v1206_v28, 0.0  ;;  %v1315_v37 = vsel %vm611_vm0, %v1310_v30, %v1314_v32  ;;  %v1318_v14 = vor.u32 %v1316_v6, %v1314_v32  ;;  %v4135_v28 = vld [vmem:[%s5390_s4 + $0x88] sm:$0xff] }
  0xf0   : > { %v994_v35 = vpop.f32.mrf.mxu2  ;;  %v739_v41 = vpop.f32.mrf.mxu0  ;;  %3570 = vmatmul.msk.bf16.vlgmr.msrb.gmra.mxu0 %vm1367_vm4, %v1315_v37  ;;  %v4138_v37 = vld [vmem:[%s5390_s4 + $0xa0] sm:$0xff] }
  0xf1   : > { %v1170_v36 = vpop.f32.mrf.mxu3  ;;  %v1230_v39 = vpack.c.bf16 %v1218_v33, %v1218_v33  ;;  %v1015_v40 = vadd.f32 %v994_v35, %v831_v29  ;;  %v832_v42 = vpop.f32.mrf.mxu1  ;;  %v4139_v29 = vld [vmem:[%s5390_s4 + $0xa8] sm:$0xff]  ;;  %1819 = vmatpush.bf16.msra.mxu0 %v4135_v28 }
  0xf2   : > { %v4720_v43 = vld [vmem:[#allocation2 + $0xc] sm:$0xff]  ;;  %v833_v56 = vadd.f32 %v832_v42, %v739_v41  ;;  %1927 = vmatpush.bf16.msra.mxu1 %v4139_v29  ;;  %v4153_v29 = vld [vmem:[%s5390_s4 + $0xf8] sm:$0xff] }
  0xf3   : > { %1243 = vst.msk [vmem:[#allocation2 + $0x14] sm:$0xf] %vm1237_vm3, %v1230_v39  ;;  %v1191_v44 = vadd.f32 %v1170_v36, %v1015_v40  ;;  %v1632_v47 = vrot.slane %v4720_v43, 1  ;;  %v1739_v49 = vshrl.u32 %v4720_v43, 16  ;;  %v1742_v50 = vshll.u32 %v4720_v43, 16  ;;  %v4147_v28 = vld [vmem:[%s5390_s4 + $0xc8] sm:$0xff]  ;;  %2191 = vmatpush.bf16.msra.mxu3 %v4153_v29 }
  0xf5   : > { %v1207_v51 = vadd.f32 %v4661_v11, %v1191_v44  ;;  %v1633_v52 = vsel %vm904_vm1, %v1631_v45, %v1632_v47  ;;  %v1741_v53 = vrot.slane %v1739_v49, 1  ;;  %v1744_v54 = vrot.slane %v1742_v50, 2 }
  0xf6   : > { %3661 = vmatmul.msk.bf16.vlgmr.msrb.gmra.mxu3 %vm1367_vm4, %v1633_v52  ;;  %1928 = vmatpush.bf16.msra.mxu1 %v4138_v37 }
  0xf7   : > { %v1219_v55 = vmax.f32 %v1207_v51, 0.0  ;;  %v1745_v60 = vor.u32 %v1744_v54, %v1741_v53  ;;  %v4134_v53 = vld [vmem:[%s5390_s4 + $0x80] sm:$0xff] }
  0xf8   : > { %v996_v57 = vpop.f32.mrf.mxu2  ;;  %v742_v63 = vpop.f32.mrf.mxu0  ;;  %1820 = vmatpush.bf16.msra.mxu0 %v4134_v53  ;;  %v4151_v53 = vld [vmem:[%s5390_s4 + $0xe8] sm:$0xff] }
  0xf9   : > { %v1172_v58 = vpop.f32.mrf.mxu3  ;;  %v1231_v61 = vpack.c.bf16 %v1219_v55, %v1219_v55  ;;  %v1016_v62 = vadd.f32 %v996_v57, %v833_v56  ;;  %v835_v0 = vpop.f32.mrf.mxu1  ;;  %v4732_v3 = vsel %vm1038_vm2, %v1737_v59, %v1745_v60 }
  0xfa   : > { %v4729_v2 = vld [vmem:[#allocation2 + $0x10] sm:$0xff]  ;;  %v836_v12 = vadd.f32 %v835_v0, %v742_v63 }
  0xfb   : > { %1244 = vst.msk [vmem:[#allocation2 + $0x18] sm:$0xf] %vm1237_vm3, %v1231_v61  ;;  %v1192_v4 = vadd.f32 %v1172_v58, %v1016_v62  ;;  %3593 = vmatmul.msk.bf16.gmra.mxu1 %vm1367_vm4, %v4729_v2  ;;  %v1503_v5 = vrot.slane %v4729_v2, 1  ;;  %v1320_v7 = vshll.u32 %v4729_v2, 16  ;;  %v1324_v51 = vshrl.u32 %v4729_v2, 16 }
  0xfd   : > { %v1208_v10 = vadd.f32 %v4661_v11, %v1192_v4  ;;  %v1504_v13 = vsel %vm904_vm1, %v1501_v26, %v1503_v5  ;;  %v1322_v15 = vrot.slane %v1320_v7, 1  ;;  %v4148_v4 = vld [vmem:[%s5390_s4 + $0xd0] sm:$0xff] }
  0xfe   : > { %3621 = vmatmul.msk.bf16.gmra.mxu2 %vm1367_vm4, %v1504_v13 }
  0xff   : > { %v1220_v16 = vmax.f32 %v1208_v10, 0.0  ;;  %v1323_v19 = vsel %vm611_vm0, %v1318_v14, %v1322_v15  ;;  %v1326_v57 = vor.u32 %v1324_v51, %v1322_v15 }
 0x100   : > { %v999_v17 = vpop.f32.mrf.mxu2  ;;  %3571 = vmatmul.msk.bf16.gmra.mxu0 %vm1367_vm4, %v1323_v19  ;;  %v744_v23 = vpop.f32.mrf.mxu0 }
 0x101   : > { %v1175_v18 = vpop.f32.mrf.mxu3  ;;  %v1232_v21 = vpack.c.bf16 %v1220_v16, %v1220_v16  ;;  %v1017_v22 = vadd.f32 %v999_v17, %v836_v12  ;;  %v837_v24 = vpop.f32.mrf.mxu1 }
 0x102   : > { %v4751_v25 = vld [vmem:[#allocation2 + $0x14] sm:$0xff]  ;;  %v838_v36 = vadd.f32 %v837_v24, %v744_v23 }
 0x103   : > { %1245 = vst.msk [vmem:[#allocation2 + $0x1c] sm:$0xf] %vm1237_vm3, %v1232_v21  ;;  %v1193_v26 = vadd.f32 %v1175_v18, %v1017_v22  ;;  %v1634_v27 = vrot.slane %v4751_v25, 1  ;;  %v1748_v30 = vshrl.u32 %v4751_v25, 16  ;;  %v1751_v32 = vshll.u32 %v4751_v25, 16 }
 0x105   : > { %v1209_v31 = vadd.f32 %v4661_v11, %v1193_v26  ;;  %v1635_v33 = vsel %vm904_vm1, %v1632_v47, %v1634_v27  ;;  %v1750_v34 = vrot.slane %v1748_v30, 1  ;;  %v1753_v38 = vrot.slane %v1751_v32, 2 }
 0x106   : > { %3662 = vmatmul.msk.bf16.gmra.mxu3 %vm1367_vm4, %v1635_v33 }
 0x107   : > { %v1221_v35 = vmax.f32 %v1209_v31, 0.0  ;;  %v4771_v46 = vor.u32 %v1753_v38, %v1750_v34 }
 0x108   : > { %v1001_v39 = vpop.f32.mrf.mxu2  ;;  %v747_v44 = vpop.f32.mrf.mxu0 }
 0x109   : > { %v1177_v40 = vpop.f32.mrf.mxu3  ;;  %v1233_v41 = vpack.c.bf16 %v1221_v35, %v1221_v35  ;;  %v1018_v42 = vadd.f32 %v1001_v39, %v838_v36  ;;  %v840_v45 = vpop.f32.mrf.mxu1  ;;  %v4778_v49 = vsel %vm1038_vm2, %v1745_v60, %v4771_v46  ;;  %v4149_v60 = vld [vmem:[%s5390_s4 + $0xd8] sm:$0xff] }
 0x10a   : > { %v4773_v47 = vld [vmem:[#allocation2 + $0x18] sm:$0xff]  ;;  %v841_v55 = vadd.f32 %v840_v45, %v747_v44  ;;  %2056 = vmatpush.bf16.msra.mxu2 %v4149_v60  ;;  %v4152_v44 = vld [vmem:[%s5390_s4 + $0xf0] sm:$0xff] }
 0x10b   : > { %1246 = vst.msk [vmem:[#allocation2 + $0x20] sm:$0xf] %vm1237_vm3, %v1233_v41  ;;  %v1194_v48 = vadd.f32 %v1177_v40, %v1018_v42  ;;  %3594 = vmatmul.msk.bf16.gmra.mxu1 %vm1367_vm4, %v4773_v47  ;;  %v1505_v50 = vrot.slane %v4773_v47, 1  ;;  %v1328_v52 = vshll.u32 %v4773_v47, 16  ;;  %v1332_v40 = vshrl.u32 %v4773_v47, 16  ;;  %v4146_v42 = vld [vmem:[%s5390_s4 + $0xc0] sm:$0xff]  ;;  %2192 = vmatpush.bf16.msra.mxu3 %v4152_v44 }
 0x10d   : > { %v1210_v54 = vadd.f32 %v4661_v11, %v1194_v48  ;;  %v1506_v56 = vsel %vm904_vm1, %v1503_v5, %v1505_v50  ;;  %v1330_v58 = vrot.slane %v1328_v52, 1 }
 0x10e   : > { %3622 = vmatmul.msk.bf16.gmra.mxu2 %vm1367_vm4, %v1506_v56  ;;  %v1252_v56 = vld [vmem:[#allocation2 + $0x2c] sm:$0x1] }
 0x10f   : > { %v1222_v59 = vmax.f32 %v1210_v54, 0.0  ;;  %v1331_v63 = vsel %vm611_vm0, %v1326_v57, %v1330_v58  ;;  %2057 = vmatpush.bf16.msra.mxu2 %v4148_v4  ;;  %v1334_v51 = vor.u32 %v1332_v40, %v1330_v58  ;;  %v4162_v58 = vld [vmem:[%s5390_s4 + $0x118] sm:$0xff]  ;;  %2193 = vmatpush.bf16.msra.mxu3 %v4151_v53 }
 0x110   : > { %v1004_v61 = vpop.f32.mrf.mxu2  ;;  %3572 = vmatmul.msk.bf16.gmra.mxu0 %vm1367_vm4, %v1331_v63  ;;  %v749_v5 = vpop.f32.mrf.mxu0 }
 0x111   : > { %v1180_v62 = vpop.f32.mrf.mxu3  ;;  %v1234_v0 = vpack.c.bf16 %v1222_v59, %v1222_v59  ;;  %v1019_v2 = vadd.f32 %v1004_v61, %v841_v55  ;;  %v842_v6 = vpop.f32.mrf.mxu1  ;;  %2326 = vmatpush.bf16.msrb.mxu0 %v4162_v58 }
 0x112   : > { %v4801_v7 = vld [vmem:[#allocation2 + $0x1c] sm:$0xff]  ;;  %v843_v19 = vadd.f32 %v842_v6, %v749_v5 }
 0x113   : > { %v1263_v8 = vld [vmem:[#allocation2 + $0x20] sm:$0x3]  ;;  %1247 = vst.msk [vmem:[#allocation2 + $0x24] sm:$0xf] %vm1237_vm3, %v1234_v0  ;;  %v1195_v12 = vadd.f32 %v1180_v62, %v1019_v2  ;;  %v1636_v15 = vrot.slane %v4801_v7, 1  ;;  %v1757_v16 = vshrl.u32 %v4801_v7, 16  ;;  %2058 = vmatpush.bf16.msra.mxu2 %v4147_v28 }
 0x114   : > { %v1484_v10 = vld [vmem:[#allocation2 + $0x20] sm:$0x7]  ;;  %v1298_v13 = vunpack.c.l.b16 %v1263_v8  ;;  %v1760_v17 = vshll.u32 %v4801_v7, 16  ;;  %v1874_v8 = vrot.slane %v4720_v43, 2  ;;  %v4143_v43 = vld [vmem:[#allocation2 + $0x10] sm:$0xff] }
 0x115   : > { %v1497_v14 = vunpack.c.l.b16 %v1484_v10  ;;  %v1211_v18 = vadd.f32 %v4661_v11, %v1195_v12  ;;  %v1637_v21 = vsel %vm904_vm1, %v1634_v27, %v1636_v15  ;;  %v1759_v23 = vrot.slane %v1757_v16, 1  ;;  %v4150_v62 = vld [vmem:[%s5390_s4 + $0xe0] sm:$0xff]  ;;  %v3734_v16 = vld [vmem:[#allocation2 + $0x8] sm:$0xc] }
 0x116   : > { %v4808_v20 = vpack.c.b16 %v1298_v13, %v1298_v13  ;;  %v1762_v24 = vrot.slane %v1760_v17, 2  ;;  %3663 = vmatmul.msk.bf16.gmra.mxu3 %vm1367_vm4, %v1637_v21  ;;  %v4161_v13 = vld [vmem:[%s5390_s4 + $0x110] sm:$0xff] }
 0x117   : > { %v4815_v22 = vpack.c.b16 %v1497_v14, %v1497_v14  ;;  %v1223_v26 = vmax.f32 %v1211_v18, 0.0  ;;  %2059 = vmatpush.bf16.msra.mxu2 %v4146_v42  ;;  %2194 = vmatpush.bf16.msra.mxu3 %v4150_v62  ;;  %v4142_v14 = vld [vmem:[#allocation2 + $0x8] sm:$0xf0]  ;;  %v2005_v18 = vrot.slane %v4143_v43, 2 }
 0x118   : > { %v1006_v30 = vpop.f32.mrf.mxu2  ;;  %v1336_v32 = vshll.u32 %v4808_v20, 16  ;;  %v1763_v27 = vor.u32 %v1762_v24, %v1759_v23  ;;  %v1340_v1 = vshrl.u32 %v4808_v20, 16  ;;  %2327 = vmatpush.bf16.msrb.mxu0 %v4161_v13  ;;  %v3735_v17 = vor.u32 %v4142_v14, %v3734_v16 }
 0x119   : > { %v1182_v31 = vpop.f32.mrf.mxu3  ;;  %v1235_v33 = vpack.c.bf16 %v1223_v26, %v1223_v26  ;;  %v1020_v34 = vadd.f32 %v1006_v30, %v843_v19  ;;  %v1507_v35 = vrot.slane %v4815_v22, 1  ;;  %v2113_v19 = vshrl.u32 %v4143_v43, 16 }
 0x11a   : > { %v1598_v36 = vld [vmem:[#allocation2 + $0x24] sm:$0x7]  ;;  %v4828_v37 = vsel %vm1038_vm2, %v4771_v46, %v1763_v27  ;;  %v1338_v41 = vrot.slane %v1336_v32, 1  ;;  %v2004_v22 = vrot.slane %v3735_v17, 2  ;;  %v2105_v23 = vshrl.u32 %v3735_v17, 16 }
 0x11b   : > { %1248 = vst.msk [vmem:[#allocation2 + $0x28] sm:$0xf] %vm1237_vm3, %v1235_v33  ;;  %v1196_v38 = vadd.f32 %v1182_v31, %v1020_v34  ;;  %v1625_v39 = vunpack.c.l.b16 %v1598_v36  ;;  %3595 = vmatmul.msk.bf16.gmra.mxu1 %vm1367_vm4, %v4808_v20  ;;  %v1508_v48 = vsel %vm904_vm1, %v1505_v50, %v1507_v35  ;;  %v1855_v50 = vld [vmem:[#allocation2 + $0x4] sm:$0xc]  ;;  %v2116_v20 = vshll.u32 %v4143_v43, 16  ;;  %v4144_v33 = vld [vmem:[#allocation2 + $0x18] sm:$0xff] }
 0x11c   : > { %v1339_v47 = vsel %vm611_vm0, %v1334_v51, %v1338_v41  ;;  %v1868_v0 = vunpack.c.l.b16 %v1855_v50  ;;  %v2108_v24 = vshll.u32 %v3735_v17, 16  ;;  %v2006_v26 = vsel %vm1872_vm8, %v2004_v22, %v2005_v18  ;;  %v4145_v51 = vld [vmem:[#allocation2 + $0x20] sm:$0xff] }
 0x11d   : > { %v1212_v45 = vadd.f32 %v4661_v11, %v1196_v38  ;;  %v1630_v46 = vpack.c.b16 %v1625_v39, %v1625_v39  ;;  %v2115_v28 = vrot.slane %v2113_v19, 2  ;;  %v2118_v29 = vrot.slane %v2116_v20, 3 }
 0x11e   : > { %3623 = vmatmul.msk.bf16.gmra.mxu2 %vm1367_vm4, %v1508_v48  ;;  %v1870_v4 = vpack.c.b16 %v1618_v9, %v1868_v0  ;;  %v1342_v9 = vor.u32 %v1340_v1, %v1338_v41  ;;  %v2107_v30 = vrot.slane %v2105_v23, 2  ;;  %v1878_v34 = vrot.slane %v4801_v7, 2 }
 0x11f   : > { %v1224_v52 = vmax.f32 %v1212_v45, 0.0  ;;  %v1766_v54 = vshrl.u32 %v1630_v46, 16  ;;  %v1769_v55 = vshll.u32 %v1630_v46, 16  ;;  %v1638_v61 = vrot.slane %v1630_v46, 1 }
 0x120   : > { %3573 = vmatmul.msk.bf16.gmra.mxu0 %vm1367_vm4, %v1339_v47  ;;  %v1873_v10 = vrot.slane %v1870_v4, 2  ;;  %v2119_v31 = vor.u32 %v2118_v29, %v2115_v28  ;;  %v2007_v36 = vrot.slane %v4144_v33, 2  ;;  %v2122_v38 = vshrl.u32 %v4144_v33, 16  ;;  %v4159_v47 = vld [vmem:[%s5390_s4 + $0x100] sm:$0xff]  ;;  %v4154_v29 = vld [vmem:[#allocation2 + $0x8] sm:$0xf0] }
 0x121   : > { %v1236_v57 = vpack.c.bf16 %v1224_v52, %v1224_v52  ;;  %v1768_v59 = vrot.slane %v1766_v54, 1  ;;  %v1771_v60 = vrot.slane %v1769_v55, 2  ;;  %v1639_v6 = vsel %vm904_vm1, %v1636_v15, %v1638_v61 }
 0x122   : > { %v1875_v12 = vsel %vm1872_vm8, %v1873_v10, %v1874_v8  ;;  %v1876_v15 = vrot.slane %v4751_v25, 2  ;;  %v2110_v25 = vrot.slane %v2108_v24, 3  ;;  %v2125_v39 = vshll.u32 %v4144_v33, 16 }
 0x123   : > { %v1253_v63 = vsel %vm4848_vm7, %v1236_v57, %v1252_v56  ;;  %v4862_v2 = vor.u32 %v1771_v60, %v1768_v59  ;;  %v2008_v41 = vsel %vm1872_vm8, %v2005_v18, %v2007_v36  ;;  %v2124_v42 = vrot.slane %v2122_v38, 2 }
 0x124   : > { %1254 = vst [vmem:[#allocation2 + $0x2c] sm:$0x1] %v1253_v63  ;;  %v1877_v21 = vsel %vm1872_vm8, %v1874_v8, %v1876_v15  ;;  %v2111_v32 = vor.u32 %v2110_v25, %v2107_v30  ;;  %v1879_v40 = vsel %vm1872_vm8, %v1876_v15, %v1878_v34  ;;  %v2127_v44 = vrot.slane %v2125_v39, 3  ;;  %v4155_v30 = vld [vmem:[#allocation2 + $0x10] sm:$0xff] }
 0x125   : > { %v4868_v5 = vsel %vm1038_vm2, %v1763_v27, %v4862_v2  ;;  %v2009_v54 = vrot.slane %v4145_v51, 2  ;;  %v2131_v55 = vshrl.u32 %v4145_v51, 16  ;;  %v2134_v11 = vshll.u32 %v4145_v51, 16 }
 0x126   : > { %3664 = vmatmul.msk.bf16.gmra.mxu3 %vm1367_vm4, %v1639_v6  ;;  %v2120_v27 = vsel %vm2103_vm9, %v2111_v32, %v2119_v31  ;;  %v2128_v45 = vor.u32 %v2127_v44, %v2124_v42  ;;  %vm2721_vm0 = vcmask 518144  }
 0x127   : > { %v2133_v50 = vrot.slane %v2131_v55, 2  ;;  %v2136_v57 = vrot.slane %v2134_v11, 3 }
 0x128   : > { %v2129_v48 = vsel %vm2103_vm9, %v2119_v31, %v2128_v45  ;;  %v3808_v31 = vld [vmem:[#allocation2 + $0x8] sm:$0x8] }
 0x129   : > { %v2137_v59 = vor.u32 %v2136_v57, %v2133_v50  ;;  %v3809_v33 = vor.u32 %v4154_v29, %v3808_v31 }
 0x12b   : > { %3719 = vmatmul.msk.bf16.vlgmr.msra.gmra.mxu1 %vm1367_vm4, %v1875_v12 }
 0x12e   : > { %3624 = vmatmul.msk.bf16.gmra.mxu2 %vm1367_vm4, %v1507_v35  ;;  %v4160_v35 = vld [vmem:[%s5390_s4 + $0x108] sm:$0xff] }
 0x12f   : > { %2328 = vmatpush.bf16.msrb.mxu0 %v4160_v35  ;;  %v2275_v35 = vrot.slane %v4155_v30, 3 }
 0x130   : > { %3574 = vmatmul.msk.bf16.gmra.mxu0 %vm1367_vm4, %v1342_v9 }
 0x133   : > { %2329 = vmatpush.bf16.msrb.mxu0 %v4159_v47 }
 0x136   : > { %3665 = vmatmul.msk.bf16.gmra.mxu3 %vm1367_vm4, %v1638_v61  ;;  %v2138_v61 = vsel %vm2103_vm9, %v2128_v45, %v2137_v59  ;;  %v4156_v45 = vld [vmem:[#allocation2 + $0x18] sm:$0xff] }
 0x13b   : > { %3720 = vmatmul.msk.bf16.gmra.mxu1 %vm1367_vm4, %v1877_v21 }
 0x13e   : > { %3764 = vmatmul.msk.bf16.vlgmr.msra.gmra.mxu2 %vm1367_vm4, %v2006_v26 }
 0x140   : > { %3690 = vmatmul.msk.bf16.vlgmr.msra.gmra.mxu0 %vm1367_vm4, %v4732_v3  ;;  %v1856_v3 = vld [vmem:[#allocation2 + $0x24] sm:$0xff]  }
 0x141   : > { %v1869_v7 = vunpack.c.l.b16 %v1856_v3  ;;  %v1998_v60 = vunpack.c.h.b16 %v1856_v3 }
 0x143   : > { %v1871_v46 = vpack.c.b16 %v1869_v7, %v1869_v7  ;;  %v2003_v62 = vpack.c.b16 %v1998_v60, %v1998_v60 }
 0x145   : > { %v1880_v52 = vrot.slane %v1871_v46, 2  ;;  %v2011_v0 = vrot.slane %v2003_v62, 2  ;;  %v2140_v4 = vshrl.u32 %v2003_v62, 16  ;;  %v2143_v6 = vshll.u32 %v2003_v62, 16 }
 0x146   : > { %3793 = vmatmul.msk.bf16.vlgmr.msra.gmra.mxu3 %vm1367_vm4, %v2120_v27 }
 0x147   : > { %v1881_v56 = vsel %vm1872_vm8, %v1878_v34, %v1880_v52  ;;  %v2012_v10 = vsel %vm1872_vm8, %v2009_v54, %v2011_v0  ;;  %v2142_v12 = vrot.slane %v2140_v4, 2  ;;  %v2145_v1 = vrot.slane %v2143_v6, 3 }
 0x149   : > { %v2146_v14 = vor.u32 %v2145_v1, %v2142_v12  ;;  %v4166_v1 = vld [vmem:[%s5392_s6 + $0x18] sm:$0xff] }
 0x14a   : > { %2465 = vmatpush.bf16.msrb.mxu2 %v4166_v1 }
 0x14b   : > { %3721 = vmatmul.msk.bf16.gmra.mxu1 %vm1367_vm4, %v1879_v40  ;;  %v2147_v16 = vsel %vm2103_vm9, %v2137_v59, %v2146_v14 }
 0x14e   : > { %3765 = vmatmul.msk.bf16.gmra.mxu2 %vm1367_vm4, %v2008_v41 }
 0x150   : > { %3691 = vmatmul.msk.bf16.gmra.mxu0 %vm1367_vm4, %v4778_v49  ;;  %v2010_v49 = vsel %vm1872_vm8, %v2007_v36, %v2009_v54  ;;  %v2274_v36 = vrot.slane %v3809_v33, 3 }
 0x152   : > { %v2276_v39 = vsel %vm2273_vm10, %v2274_v36, %v2275_v35 }
 0x156   : > { %3794 = vmatmul.msk.bf16.gmra.mxu3 %vm1367_vm4, %v2129_v48 }
 0x158   : > { %v1459_v53 = vpop.f32.mrf.mxu1 }
 0x15b   : > { %3722 = vmatmul.msk.bf16.gmra.mxu1 %vm1367_vm4, %v1881_v56 }
 0x15e   : > { %3766 = vmatmul.msk.bf16.gmra.mxu2 %vm1367_vm4, %v2010_v49 }
 0x160   : > { %v4912_v58 = vpop.f32.mrf.mxu1  ;;  %3692 = vmatmul.msk.bf16.gmra.mxu0 %vm1367_vm4, %v4828_v37 }
 0x166   : > { %3795 = vmatmul.msk.bf16.gmra.mxu3 %vm1367_vm4, %v2138_v61  ;;  %v4157_v61 = vld [vmem:[#allocation2 + $0x20] sm:$0xff] }
 0x167   : > { %v2279_v6 = vrot.slane %v4157_v61, 3 }
 0x168   : > { %v1464_v63 = vpop.f32.mrf.mxu1 }
 0x16b   : > { %3723 = vmatmul.msk.bf16.gmra.mxu1 %vm1367_vm4, %v1880_v52 }
 0x16d   : > { %v1392_v8 = vpop.f32.mrf.mxu0 }
 0x16e   : > { %v1460_v9 = vadd.f32 %v1459_v53, %v1392_v8  ;;  %3767 = vmatmul.msk.bf16.gmra.mxu2 %vm1367_vm4, %v2012_v10  ;;  %v2277_v53 = vrot.slane %v4156_v45, 3 }
 0x170   : > { %v4921_v37 = vpop.f32.mrf.mxu1  ;;  %3693 = vmatmul.msk.bf16.gmra.mxu0 %vm1367_vm4, %v4868_v5  ;;  %v2278_v11 = vsel %vm2273_vm10, %v2275_v35, %v2277_v53 }
 0x171   : > { %v1557_v13 = vpop.f32.mrf.mxu2 }
 0x172   : > { %v1581_v43 = vadd.f32 %v1557_v13, %v1460_v9  ;;  %v2280_v9 = vsel %vm2273_vm10, %v2277_v53, %v2279_v6 }
 0x175   : > { %v4925_v15 = vpop.f32.mrf.mxu0 }
 0x176   : > { %3796 = vmatmul.msk.bf16.gmra.mxu3 %vm1367_vm4, %v2147_v16 }
 0x178   : > { %v1469_v17 = vpop.f32.mrf.mxu1 }
 0x179   : > { %v4929_v18 = vpop.f32.mrf.mxu2  ;;  %v1688_v19 = vpop.f32.mrf.mxu3 }
 0x17a   : > { %v4931_v20 = vadd.f32 %v1688_v19, %v1581_v43 }
 0x17d   : > { %v1397_v21 = vpop.f32.mrf.mxu0 }
 0x17e   : > { %v1465_v22 = vadd.f32 %v1464_v63, %v1397_v21  ;;  %3768 = vmatmul.msk.bf16.gmra.mxu2 %vm1367_vm4, %v2011_v0  ;;  %v3824_v21 = vld [vmem:[#allocation2 + $0x28] sm:$0xf] }
 0x180   : > { %v1471_v5 = vpop.f32.mrf.mxu1  ;;  %3694 = vmatmul.msk.bf16.gmra.mxu0 %vm1367_vm4, %v4862_v2 }
 0x181   : > { %v1562_v23 = vpop.f32.mrf.mxu2  ;;  %v4936_v24 = vpop.f32.mrf.mxu3 }
 0x182   : > { %v1583_v26 = vadd.f32 %v1562_v23, %v1465_v22  ;;  %v4158_v22 = vld [vmem:[#allocation2 + $0x28] sm:$0x10] }
 0x183   : > { %v3825_v23 = vor.u32 %v4158_v22, %v3824_v21 }
 0x185   : > { %v4938_v28 = vpop.f32.mrf.mxu0  ;;  %v2281_v31 = vrot.slane %v3825_v23, 3 }
 0x186   : > { %3797 = vmatmul.msk.bf16.gmra.mxu3 %vm1367_vm4, %v2146_v14 }
 0x187   : > { %v2282_v35 = vsel %vm2273_vm10, %v2279_v6, %v2281_v31 }
 0x188   : > { %v1474_v25 = vpop.f32.mrf.mxu1 }
 0x189   : > { %v4941_v32 = vpop.f32.mrf.mxu2  ;;  %v1693_v27 = vpop.f32.mrf.mxu3 }
 0x18a   : > { %v4943_v34 = vadd.f32 %v1693_v27, %v1583_v26 }
 0x18d   : > { %v1402_v2 = vpop.f32.mrf.mxu0 }
 0x18e   : > { %v1470_v38 = vadd.f32 %v1469_v17, %v1402_v2  ;;  %v1462_v2 = vadd.f32 %v4912_v58, %v4925_v15 }
 0x190   : > { %v1476_v40 = vpop.f32.mrf.mxu1  ;;  %3842 = vmatmul.msk.bf16.vlgmr.msrb.gmra.mxu0 %vm1367_vm4, %v2276_v39 }
 0x191   : > { %v1567_v3 = vpop.f32.mrf.mxu2  ;;  %v4947_v41 = vpop.f32.mrf.mxu3 }
 0x192   : > { %v1585_v42 = vadd.f32 %v1567_v3, %v1470_v38  ;;  %v1582_v3 = vadd.f32 %v4929_v18, %v1462_v2 }
 0x195   : > { %v1404_v44 = vpop.f32.mrf.mxu0 }
 0x196   : > { %v1472_v7 = vadd.f32 %v1471_v5, %v1404_v44  ;;  %v4165_v44 = vld [vmem:[%s5392_s6 + $0x10] sm:$0xff] }
 0x197   : > { %2466 = vmatpush.bf16.msrb.mxu2 %v4165_v44 }
 0x198   : > { %v1479_v46 = vpop.f32.mrf.mxu1 }
 0x199   : > { %v1569_v48 = vpop.f32.mrf.mxu2  ;;  %v1698_v51 = vpop.f32.mrf.mxu3 }
 0x19a   : > { %v4949_v52 = vadd.f32 %v1698_v51, %v1585_v42  ;;  %v1586_v56 = vadd.f32 %v1569_v48, %v1472_v7 }
 0x19d   : > { %v1407_v54 = vpop.f32.mrf.mxu0 }
 0x19e   : > { %v1475_v55 = vadd.f32 %v1474_v25, %v1407_v54 }
 0x1a0   : > { %v1481_v47 = vpop.f32.mrf.mxu1  ;;  %3843 = vmatmul.msk.bf16.gmra.mxu0 %vm1367_vm4, %v2278_v11 }
 0x1a1   : > { %v1572_v49 = vpop.f32.mrf.mxu2  ;;  %v1700_v50 = vpop.f32.mrf.mxu3 }
 0x1a2   : > { %v1587_v57 = vadd.f32 %v1572_v49, %v1475_v55  ;;  %v4953_v59 = vadd.f32 %v1700_v50, %v1586_v56  ;;  %v1467_v55 = vadd.f32 %v4921_v37, %v4938_v28 }
 0x1a4   : > { %v1584_v49 = vadd.f32 %v4941_v32, %v1467_v55 }
 0x1a5   : > { %v1409_v60 = vpop.f32.mrf.mxu0 }
 0x1a6   : > { %v1477_v10 = vadd.f32 %v1476_v40, %v1409_v60  ;;  %v1715_v60 = vadd.f32 %v4947_v41, %v1584_v49  ;;  %v4267_v49 = vld [vmem:[%s5391_s5] ss:$0 sm:$0xff] }
 0x1a8   : > { %v1930_v62 = vpop.f32.mrf.mxu1 }
 0x1a9   : > { %v1574_v63 = vpop.f32.mrf.mxu2  ;;  %v1703_v0 = vpop.f32.mrf.mxu3 }
 0x1aa   : > { %v4955_v4 = vadd.f32 %v1703_v0, %v1587_v57  ;;  %v1588_v13 = vadd.f32 %v1574_v63, %v1477_v10 }
 0x1ad   : > { %v1412_v8 = vpop.f32.mrf.mxu0 }
 0x1ae   : > { %v1480_v12 = vadd.f32 %v1479_v46, %v1412_v8 }
 0x1b0   : > { %v1932_v14 = vpop.f32.mrf.mxu1  ;;  %3844 = vmatmul.msk.bf16.gmra.mxu0 %vm1367_vm4, %v2280_v9 }
 0x1b1   : > { %v1577_v43 = vpop.f32.mrf.mxu2  ;;  %v1705_v16 = vpop.f32.mrf.mxu3 }
 0x1b2   : > { %v1589_v17 = vadd.f32 %v1577_v43, %v1480_v12  ;;  %v4962_v19 = vadd.f32 %v1705_v16, %v1588_v13  ;;  %v2399_v43 = vld [vmem:[%s5393_s7] sm:$0xf] }
 0x1b3   : > { %v2406_v16 = vsel %vm2404_vm11, %v2399_v43, 0 }
 0x1b4   : > { %2415 = vmatpush.bf16.msrb.mxu1 %v2406_v16 }
 0x1b5   : > { %v1414_v5 = vpop.f32.mrf.mxu0 }
 0x1b8   : > { %v1935_v26 = vpop.f32.mrf.mxu1 }
 0x1b9   : > { %v1579_v29 = vpop.f32.mrf.mxu2  ;;  %v1708_v30 = vpop.f32.mrf.mxu3 }
 0x1ba   : > { %v4964_v25 = vadd.f32 %v1708_v30, %v1589_v17  ;;  %v4163_v30 = vld [vmem:[%s5392_s6] sm:$0xff] }
 0x1bd   : > { %v1822_v27 = vpop.f32.mrf.mxu0 }
 0x1be   : > { %v1846_v33 = vadd.f32 %v1822_v27, %v4931_v20  ;;  %v1713_v20 = vadd.f32 %v4936_v24, %v1582_v3 }
 0x1c0   : > { %v1937_v36 = vpop.f32.mrf.mxu1  ;;  %3845 = vmatmul.msk.bf16.gmra.mxu0 %vm1367_vm4, %v2282_v35  ;;  %v1954_v38 = vadd.f32 %v1930_v62, %v1846_v33 }
 0x1c1   : > { %v1710_v39 = vpop.f32.mrf.mxu3  ;;  %v2061_v40 = vpop.f32.mrf.mxu2 }
 0x1c2   : > { %v2085_v42 = vadd.f32 %v2061_v40, %v1954_v38 }
 0x1c5   : > { %v1824_v7 = vpop.f32.mrf.mxu0 }
 0x1c6   : > { %v1847_v45 = vadd.f32 %v1824_v7, %v1713_v20 }
 0x1c8   : > { %v1940_v46 = vpop.f32.mrf.mxu1  ;;  %v1955_v58 = vadd.f32 %v1932_v14, %v1847_v45 }
 0x1c9   : > { %v2063_v15 = vpop.f32.mrf.mxu2  ;;  %v2196_v48 = vpop.f32.mrf.mxu3 }
 0x1ca   : > { %v2086_v51 = vadd.f32 %v2063_v15, %v1955_v58  ;;  %v4976_v53 = vadd.f32 %v2196_v48, %v2085_v42  ;;  %v534_v48 = vld [vmem:[%s532_s30] sm:$0x1]  ;;  %s3229_s30 = scalar_lea.sflag [#allocation4], %s523_s18 }
 0x1cd   : > { %v1827_v54 = vpop.f32.mrf.mxu0 }
 0x1ce   : > { %v1848_v18 = vadd.f32 %v1827_v54, %v4943_v34  ;;  %v4164_v34 = vld [vmem:[%s5392_s6 + $0x8] sm:$0xff] }
 0x1cf   : > { %2467 = vmatpush.bf16.msrb.mxu2 %v4164_v34 }
 0x1d0   : > { %v1942_v11 = vpop.f32.mrf.mxu1  ;;  %3846 = vmatmul.msk.bf16.gmra.mxu0 %vm1367_vm4, %v2281_v31  ;;  %v1956_v24 = vadd.f32 %v1935_v26, %v1848_v18  ;;  %v5007_v18 = vpack.c.bf16 %v534_v48, %v534_v48 }
 0x1d1   : > { %v2066_v56 = vpop.f32.mrf.mxu2  ;;  %v2198_v47 = vpop.f32.mrf.mxu3 }
 0x1d2   : > { %v2087_v50 = vadd.f32 %v2066_v56, %v1956_v24  ;;  %v4983_v57 = vadd.f32 %v2198_v47, %v2086_v51  ;;  %3847 = vmatmul.msk.bf16.vlgmr.msrb.gmra.mxu1 %vm2400_vm12, %v5007_v18 }
 0x1d3   : > { %2468 = vmatpush.bf16.msrb.mxu2 %v4163_v30 }
 0x1d5   : > { %v1829_v61 = vpop.f32.mrf.mxu0 }
 0x1d6   : > { %v1849_v62 = vadd.f32 %v1829_v61, %v1715_v60 }
 0x1d8   : > { %v1945_v37 = vpop.f32.mrf.mxu1  ;;  %v1957_v28 = vadd.f32 %v1937_v36, %v1849_v62 }
 0x1d9   : > { %v2068_v63 = vpop.f32.mrf.mxu2  ;;  %v2201_v0 = vpop.f32.mrf.mxu3 }
 0x1da   : > { %v2088_v6 = vadd.f32 %v2068_v63, %v1957_v28  ;;  %v4989_v8 = vadd.f32 %v2201_v0, %v2087_v50 }
 0x1dd   : > { %v1832_v32 = vpop.f32.mrf.mxu0 }
 0x1de   : > { %v1850_v10 = vadd.f32 %v1832_v32, %v4949_v52 }
 0x1e0   : > { %v1947_v12 = vpop.f32.mrf.mxu1  ;;  %v1958_v1 = vadd.f32 %v1940_v46, %v1850_v10 }
 0x1e1   : > { %v2071_v41 = vpop.f32.mrf.mxu2  ;;  %v2203_v9 = vpop.f32.mrf.mxu3 }
 0x1e2   : > { %v2089_v13 = vadd.f32 %v2071_v41, %v1958_v1  ;;  %v2223_v14 = vadd.f32 %v2203_v9, %v2088_v6 }
 0x1e5   : > { %v1834_v17 = vpop.f32.mrf.mxu0 }
 0x1e6   : > { %v1851_v21 = vadd.f32 %v1834_v17, %v4953_v59 }
 0x1e8   : > { %v1950_v22 = vpop.f32.mrf.mxu1  ;;  %v1959_v5 = vadd.f32 %v1942_v11, %v1851_v21 }
 0x1e9   : > { %v2073_v52 = vpop.f32.mrf.mxu2  ;;  %v2206_v23 = vpop.f32.mrf.mxu3 }
 0x1ea   : > { %v2090_v26 = vadd.f32 %v2073_v52, %v1959_v5  ;;  %v2224_v29 = vadd.f32 %v2206_v23, %v2089_v13 }
 0x1ed   : > { %v1837_v31 = vpop.f32.mrf.mxu0 }
 0x1ee   : > { %v1852_v27 = vadd.f32 %v1837_v31, %v4955_v4 }
 0x1f0   : > { %v1952_v33 = vpop.f32.mrf.mxu1  ;;  %v1960_v35 = vadd.f32 %v1945_v37, %v1852_v27 }
 0x1f1   : > { %v2076_v2 = vpop.f32.mrf.mxu2  ;;  %v2208_v36 = vpop.f32.mrf.mxu3 }
 0x1f2   : > { %v2091_v59 = vadd.f32 %v2076_v2, %v1960_v35  ;;  %v2225_v38 = vadd.f32 %v2208_v36, %v2090_v26 }
 0x1f5   : > { %v1839_v39 = vpop.f32.mrf.mxu0 }
 0x1f6   : > { %v1853_v40 = vadd.f32 %v1839_v39, %v4962_v19 }
 0x1f8   : > { %v1961_v3 = vadd.f32 %v1947_v12, %v1853_v40 }
 0x1f9   : > { %v2078_v42 = vpop.f32.mrf.mxu2  ;;  %v2211_v44 = vpop.f32.mrf.mxu3 }
 0x1fa   : > { %v2092_v20 = vadd.f32 %v2078_v42, %v1961_v3  ;;  %v2226_v7 = vadd.f32 %v2211_v44, %v2091_v59  ;;  %v4268_v42 = vld [vmem:[%s5394_s8] ss:$0 sm:$0xff] }
 0x1fd   : > { %v1842_v45 = vpop.f32.mrf.mxu0 }
 0x1fe   : > { %v1854_v46 = vadd.f32 %v1842_v45, %v4964_v25  ;;  %v4269_v45 = vld [vmem:[%s5395_s9] ss:$0 sm:$0xff] }
 0x200   : > { %v1962_v4 = vadd.f32 %v1950_v22, %v1854_v46 }
 0x201   : > { %v2081_v58 = vpop.f32.mrf.mxu2  ;;  %v2213_v15 = vpop.f32.mrf.mxu3 }
 0x202   : > { %v2093_v51 = vadd.f32 %v2081_v58, %v1962_v4  ;;  %v2227_v54 = vadd.f32 %v2213_v15, %v2092_v20 }
 0x205   : > { %v1844_v19 = vpop.f32.mrf.mxu0 }
 0x209   : > { %v2083_v55 = vpop.f32.mrf.mxu2  ;;  %v2216_v11 = vpop.f32.mrf.mxu3 }
 0x20a   : > { %v2228_v25 = vadd.f32 %v2216_v11, %v2093_v51 }
 0x20d   : > { %v2331_v24 = vpop.f32.mrf.mxu0 }
 0x20e   : > { %v2355_v47 = vadd.f32 %v2331_v24, %v4976_v53 }
 0x210   : > { %v5015_v60 = vadd.f32 %v4267_v49, %v2355_v47 }
 0x211   : > { %v2218_v56 = vpop.f32.mrf.mxu3 }
 0x212   : > { %v2377_v34 = vmax.f32 %v5015_v60, 0.0 }
 0x215   : > { %v2333_v50 = vpop.f32.mrf.mxu0 }
 0x216   : > { %v2356_v61 = vadd.f32 %v2333_v50, %v4983_v57 }
 0x218   : > { %v5018_v62 = vadd.f32 %v4267_v49, %v2356_v61 }
 0x21a   : > { %v2378_v37 = vmax.f32 %v5018_v62, 0.0 }
 0x21c   : > { %v2386_v53 = vpack.c.bf16 %v2378_v37, %v2377_v34 }
 0x21d   : > { %v2336_v28 = vpop.f32.mrf.mxu0 }
 0x21e   : > { %3864 = vmatmul.msk.bf16.vlgmr.msrb.gmra.mxu2 %vm1367_vm4, %v2386_v53  ;;  %v2357_v63 = vadd.f32 %v2336_v28, %v4989_v8 }
 0x220   : > { %v5028_v6 = vadd.f32 %v4267_v49, %v2357_v63 }
 0x222   : > { %v2379_v10 = vmax.f32 %v5028_v6, 0.0  ;;  %v4169_v6 = vld [vmem:[%s5397_s11 + $0xc] sm:$0xf0] }
 0x225   : > { %v2338_v0 = vpop.f32.mrf.mxu0 }
 0x226   : > { %v2358_v57 = vadd.f32 %v2338_v0, %v2223_v14 }
 0x228   : > { %v5030_v32 = vadd.f32 %v4267_v49, %v2358_v57 }
 0x22a   : > { %v2380_v12 = vmax.f32 %v5030_v32, 0.0  ;;  %v4180_v32 = vld [vmem:[%s5397_s11 + $0x6c] sm:$0xf] }
 0x22c   : > { %v2387_v1 = vpack.c.bf16 %v2380_v12, %v2379_v10 }
 0x22d   : > { %v2341_v41 = vpop.f32.mrf.mxu0 }
 0x22e   : > { %3865 = vmatmul.msk.bf16.gmra.mxu2 %vm1367_vm4, %v2387_v1  ;;  %v2359_v9 = vadd.f32 %v2341_v41, %v2224_v29 }
 0x230   : > { %v5039_v13 = vadd.f32 %v4267_v49, %v2359_v9 }
 0x232   : > { %v2381_v16 = vmax.f32 %v5039_v13, 0.0  ;;  %v4176_v13 = vld [vmem:[%s5397_s11 + $0x4c] sm:$0xf] }
 0x235   : > { %v2343_v8 = vpop.f32.mrf.mxu0 }
 0x236   : > { %v2360_v43 = vadd.f32 %v2343_v8, %v2225_v38 }
 0x238   : > { %v5041_v14 = vadd.f32 %v4267_v49, %v2360_v43 }
 0x23a   : > { %v2382_v17 = vmax.f32 %v5041_v14, 0.0  ;;  %v3879_v14 = vld [vmem:[%s5397_s11 + $0x8] sm:$0xf] }
 0x23c   : > { %v2388_v21 = vpack.c.bf16 %v2382_v17, %v2381_v16 }
 0x23d   : > { %v2346_v22 = vpop.f32.mrf.mxu0 }
 0x23e   : > { %3866 = vmatmul.msk.bf16.gmra.mxu2 %vm1367_vm4, %v2388_v21  ;;  %v2361_v5 = vadd.f32 %v2346_v22, %v2226_v7 }
 0x240   : > { %v5050_v23 = vadd.f32 %v4267_v49, %v2361_v5 }
 0x242   : > { %v2383_v30 = vmax.f32 %v5050_v23, 0.0 }
 0x245   : > { %v2348_v52 = vpop.f32.mrf.mxu0 }
 0x246   : > { %v2362_v26 = vadd.f32 %v2348_v52, %v2227_v54 }
 0x248   : > { %v5052_v29 = vadd.f32 %v4267_v49, %v2362_v26 }
 0x24a   : > { %v2384_v31 = vmax.f32 %v5052_v29, 0.0 }
 0x24c   : > { %v2389_v27 = vpack.c.bf16 %v2384_v31, %v2383_v30 }
 0x24d   : > { %v2351_v33 = vpop.f32.mrf.mxu0 }
 0x24e   : > { %v2363_v35 = vadd.f32 %v2351_v33, %v2228_v25  ;;  %3867 = vmatmul.msk.bf16.gmra.mxu2 %vm1367_vm4, %v2389_v27 }
 0x24f   : > { %v2417_v39 = vpop.f32.mrf.mxu1 }
 0x250   : > { %v2376_v2 = vadd.f32 %v4267_v49, %v2363_v35  ;;  %v2421_v3 = vperm.slane %v2417_v39, 0 }
 0x252   : > { %v5061_v59 = vmax.f32 %v2376_v2, 0.0 }
 0x254   : > { %v2390_v38 = vpack.c.bf16 %v5061_v59, %v5061_v59 }
 0x255   : > { %v2353_v36 = vpop.f32.mrf.mxu0 }
 0x257   : > { %v2419_v40 = vpop.f32.mrf.mxu1 }
 0x25e   : > { %3868 = vmatmul.msk.bf16.gmra.mxu2 %vm1367_vm4, %v2390_v38 }
 0x2a1   : > { %v2470_v44 = vpop.f32.mrf.mxu2 }
 0x2a2   : > { %v2471_v20 = vadd.f32 %v2470_v44, %v2421_v3 }
 0x2a4   : > { %v2498_v7 = vadd.f32 %v4268_v42, %v2471_v20 }
 0x2a6   : > { %v2507_v46 = vmax.f32 %v2498_v7, 0.0 }
 0x2a8   : > { %v2520_v4 = vmul.f32 %v4269_v45, %v2507_v46 }
 0x2a9   : > { %v2472_v58 = vpop.f32.mrf.mxu2 }
 0x2aa   : > { %v2473_v15 = vadd.f32 %v2472_v58, %v2421_v3  ;;  %2529 = vadd.xlane.f32.xlu0 %v2520_v4 }
 0x2ac   : > { %v2499_v48 = vadd.f32 %v4268_v42, %v2473_v15 }
 0x2ae   : > { %v2508_v51 = vmax.f32 %v2499_v48, 0.0 }
 0x2b0   : > { %v2521_v54 = vmul.f32 %v4269_v45, %v2508_v51 }
 0x2b1   : > { %v2475_v19 = vpop.f32.mrf.mxu2 }
 0x2b2   : > { %v2476_v55 = vadd.f32 %v2475_v19, %v2421_v3  ;;  %2531 = vadd.xlane.f32.xlu1 %v2521_v54  ;;  %v2553_v54 = vld [vmem:[%s5396_s10 + $0x20] sm:$0xff] }
 0x2b4   : > { %v2500_v11 = vadd.f32 %v4268_v42, %v2476_v55  ;;  %v2552_v55 = vld [vmem:[%s5396_s10 + $0x18] sm:$0xff] }
 0x2b6   : > { %v2509_v25 = vmax.f32 %v2500_v11, 0.0  ;;  %v2554_v11 = vld [vmem:[%s5396_s10 + $0x28] sm:$0xff] }
 0x2b8   : > { %v2522_v24 = vmul.f32 %v4269_v45, %v2509_v25  ;;  %v2555_v25 = vld [vmem:[%s5396_s10 + $0x30] sm:$0xff] }
 0x2b9   : > { %v2477_v56 = vpop.f32.mrf.mxu2 }
 0x2ba   : > { %v2478_v47 = vadd.f32 %v2477_v56, %v2421_v3  ;;  %2533 = vadd.xlane.f32.xlu1 %v2522_v24 }
 0x2bc   : > { %v2501_v49 = vadd.f32 %v4268_v42, %v2478_v47 }
 0x2be   : > { %v2510_v50 = vmax.f32 %v2501_v49, 0.0 }
 0x2c0   : > { %v2523_v61 = vmul.f32 %v4269_v45, %v2510_v50  ;;  %v2550_v50 = vld [vmem:[%s5396_s10 + $0x8] sm:$0xff] }
 0x2c1   : > { %v2480_v53 = vpop.f32.mrf.mxu2 }
 0x2c2   : > { %v2481_v28 = vadd.f32 %v2480_v53, %v2421_v3  ;;  %2535 = vadd.xlane.f32.xlu2 %v2523_v61  ;;  %v2551_v61 = vld [vmem:[%s5396_s10 + $0x10] sm:$0xff] }
 0x2c4   : > { %v2502_v63 = vadd.f32 %v4268_v42, %v2481_v28 }
 0x2c6   : > { %v2511_v0 = vmax.f32 %v2502_v63, 0.0 }
 0x2c8   : > { %v2524_v57 = vmul.f32 %v4269_v45, %v2511_v0  ;;  %v2557_v0 = vld [vmem:[%s5396_s10 + $0x40] sm:$0x7] }
 0x2c9   : > { %v2482_v1 = vpop.f32.mrf.mxu2 }
 0x2ca   : > { %v2483_v41 = vadd.f32 %v2482_v1, %v2421_v3  ;;  %2537 = vadd.xlane.f32.xlu0 %v2524_v57 }
 0x2cc   : > { %v2503_v9 = vadd.f32 %v4268_v42, %v2483_v41 }
 0x2ce   : > { %v2512_v8 = vmax.f32 %v2503_v9, 0.0 }
 0x2d0   : > { %v2525_v43 = vmul.f32 %v4269_v45, %v2512_v8 }
 0x2d1   : > { %v2485_v21 = vpop.f32.mrf.mxu2 }
 0x2d2   : > { %v2486_v22 = vadd.f32 %v2485_v21, %v2421_v3  ;;  %2539 = vadd.xlane.f32.xlu2 %v2525_v43 }
 0x2d4   : > { %v2504_v5 = vadd.f32 %v4268_v42, %v2486_v22 }
 0x2d6   : > { %v2513_v52 = vmax.f32 %v2504_v5, 0.0 }
 0x2d8   : > { %v2526_v26 = vmul.f32 %v4269_v45, %v2513_v52 }
 0x2d9   : > { %v2487_v27 = vpop.f32.mrf.mxu2 }
 0x2da   : > { %v2488_v33 = vadd.f32 %v2487_v27, %v2421_v3  ;;  %2541 = vadd.xlane.f32.xlu0 %v2526_v26 }
 0x2dc   : > { %v2505_v35 = vadd.f32 %v4268_v42, %v2488_v33 }
 0x2de   : > { %v2514_v2 = vmax.f32 %v2505_v35, 0.0 }
 0x2e0   : > { %v2527_v36 = vmul.f32 %v4269_v45, %v2514_v2 }
 0x2e1   : > { %v2490_v38 = vpop.f32.mrf.mxu2 }
 0x2e2   : > { %v2491_v39 = vadd.f32 %v2490_v38, %v2421_v3  ;;  %2543 = vadd.xlane.f32.xlu1 %v2527_v36  ;;  %v2556_v3 = vld [vmem:[%s5396_s10 + $0x38] sm:$0xff] }
 0x2e4   : > { %v2506_v40 = vadd.f32 %v4268_v42, %v2491_v39 }
 0x2e6   : > { %v2515_v44 = vmax.f32 %v2506_v40, 0.0 }
 0x2e8   : > { %v2528_v20 = vmul.f32 %v4269_v45, %v2515_v44  ;;  %v2549_v45 = vld [vmem:[%s5396_s10] sm:$0xff] }
 0x2e9   : > { %v2492_v7 = vpop.f32.mrf.mxu2 }
 0x2ea   : > { %v2546_v46 = vsel %vm2545_vm13, %v2528_v20, 0.0 }
 0x2eb   : > { %2547 = vadd.xlane.f32.xlu2 %v2546_v46 }
 0x31d   : > { %v2530_v58 = vpop.xlane.xlu0 %2529 }
 0x31e   : > { %v2558_v49 = vadd.f32 %v2549_v45, %v2530_v58 }
 0x320   : > { %v2568_v8 = vsel %vm2567_vm14, %v2558_v49, -inf }
 0x325   : > { %v2532_v4 = vpop.xlane.xlu1 %2531 }
 0x326   : > { %v2559_v57 = vadd.f32 %v2550_v50, %v2532_v4 }
 0x328   : > { %v2569_v33 = vsel %vm2567_vm14, %v2559_v57, -inf }
 0x32d   : > { %v2534_v15 = vpop.xlane.xlu1 %2533 }
 0x32e   : > { %v2560_v1 = vadd.f32 %v2551_v61, %v2534_v15 }
 0x330   : > { %v2570_v35 = vsel %vm2567_vm14, %v2560_v1, -inf }
 0x335   : > { %v2536_v48 = vpop.xlane.xlu2 %2535 }
 0x336   : > { %v2561_v53 = vadd.f32 %v2552_v55, %v2536_v48 }
 0x338   : > { %v2571_v21 = vsel %vm2567_vm14, %v2561_v53, -inf }
 0x33d   : > { %v2538_v51 = vpop.xlane.xlu0 %2537 }
 0x33e   : > { %v2562_v56 = vadd.f32 %v2553_v54, %v2538_v51 }
 0x340   : > { %v2572_v41 = vsel %vm2567_vm14, %v2562_v56, -inf }
 0x341   : > { %v2573_v26 = vmax.f32 %v2568_v8, %v2572_v41 }
 0x345   : > { %v2540_v19 = vpop.xlane.xlu2 %2539 }
 0x346   : > { %v2563_v28 = vadd.f32 %v2554_v11, %v2540_v19 }
 0x348   : > { %v2574_v22 = vsel %vm2567_vm14, %v2563_v28, -inf }
 0x349   : > { %v2575_v36 = vmax.f32 %v2569_v33, %v2574_v22 }
 0x34d   : > { %v2542_v24 = vpop.xlane.xlu0 %2541 }
 0x34e   : > { %v2564_v63 = vadd.f32 %v2555_v25, %v2542_v24 }
 0x350   : > { %v2576_v5 = vsel %vm2567_vm14, %v2564_v63, -inf }
 0x351   : > { %v2577_v38 = vmax.f32 %v2570_v35, %v2576_v5 }
 0x355   : > { %v2544_v42 = vpop.xlane.xlu1 %2543 }
 0x356   : > { %v5090_v47 = vadd.f32 %v2556_v3, %v2544_v42 }
 0x358   : > { %v2578_v9 = vsel %vm2567_vm14, %v5090_v47, -inf }
 0x359   : > { %v2579_v27 = vmax.f32 %v2571_v21, %v2578_v9 }
 0x35b   : > { %v2584_v40 = vmax.f32 %v2577_v38, %v2579_v27 }
 0x35e   : > { %v2548_v43 = vpop.xlane.xlu2 %2547 }
 0x35f   : > { %v2566_v52 = vadd.f32 %v2557_v0, %v2548_v43 }
 0x361   : > { %v2581_v2 = vsel %vm2580_vm15, %v2566_v52, -inf }
 0x362   : > { %v2582_v39 = vmax.f32 %v2573_v26, %v2581_v2 }
 0x364   : > { %v2583_v44 = vmax.f32 %v2582_v39, %v2575_v36 }
 0x366   : > { %v2585_v20 = vmax.f32 %v2583_v44, %v2584_v40 }
 0x368   : > { %v2586_v7 = vrot.slane %v2585_v20, 4 }
 0x36a   : > { %v2587_v46 = vmax.f32 %v2585_v20, %v2586_v7 }
 0x36c   : > { %v2588_v4 = vrot.slane %v2587_v46, 2 }
 0x36e   : > { %v2589_v58 = vmax.f32 %v2587_v46, %v2588_v4 }
 0x370   : > { %v2590_v15 = vrot.slane %v2589_v58, 1 }
 0x372   : > { %v2591_v48 = vmax.f32 %v2589_v58, %v2590_v15 }
 0x374   : > { %v2592_v51 = vsub.f32 %v2558_v49, %v2591_v48  ;;  %v2593_v54 = vsub.f32 %v2559_v57, %v2591_v48  ;;  %v2594_v19 = vsub.f32 %v2560_v1, %v2591_v48  ;;  %v2595_v3 = vsub.f32 %v2561_v53, %v2591_v48 }
 0x375   : > { %v2596_v42 = vsub.f32 %v2562_v56, %v2591_v48  ;;  %v2597_v25 = vsub.f32 %v2563_v28, %v2591_v48  ;;  %v2598_v50 = vsub.f32 %v2564_v63, %v2591_v48  ;;  %v2599_v0 = vsub.f32 %v5090_v47, %v2591_v48 }
 0x376   : > { %v2601_v45 = vmul.f32 1.442695, %v2592_v51  ;;  %v2603_v55 = vmul.f32 1.442695, %v2593_v54  ;;  %v2605_v11 = vmul.f32 1.442695, %v2594_v19  ;;  %v2600_v9 = vsub.f32 %v2566_v52, %v2591_v48 }
 0x377   : > { %v2607_v24 = vmul.f32 1.442695, %v2595_v3  ;;  %v2609_v61 = vmul.f32 1.442695, %v2596_v42  ;;  %v2611_v41 = vmul.f32 1.442695, %v2597_v25 }
 0x378   : > { %4270 = vpow2.f32 %v2601_v45  ;;  %v2613_v49 = vmul.f32 1.442695, %v2598_v50  ;;  %v4354_v53 = vmov 0   ;;  %v2615_v28 = vmul.f32 1.442695, %v2599_v0 }
 0x379   : > { %4272 = vpow2.f32 %v2603_v55  ;;  %4265 = vset.pattern.permute.xlu2 %v4354_v53  ;;  %4264 = vset.pattern.permute.xlu1 %v4354_v53  ;;  %v2617_v47 = vmul.f32 1.442695, %v2600_v9  ;;  %v3919_v45 = vld [vmem:[%s5397_s11 + $0x60] sm:$0xf]  ;;  %v4181_v55 = vld [vmem:[%s5397_s11 + $0x6c] sm:$0xf0] }
 0x37a   : > { %4274 = vpow2.f32 %v2605_v11  ;;  %4263 = vset.pattern.permute.xlu0 %v4354_v53  ;;  %v3920_v11 = vor.u32 %v4181_v55, %v3919_v45  ;;  %v3929_v45 = vld [vmem:[%s5397_s11 + $0x78] sm:$0xf0]  ;;  %v3911_v55 = vld [vmem:[%s5397_s11 + $0x48] sm:$0xf] }
 0x37b   : > { %4276 = vpow2.f32 %v2607_v24 }
 0x37c   : > { %4278 = vpow2.f32 %v2609_v61  ;;  %2844 = vmatpush.bf16.msrb.mxu3 %v3920_v11  ;;  %v4178_v11 = vld [vmem:[%s5397_s11 + $0x54] sm:$0xf0] }
 0x37d   : > { %4280 = vpow2.f32 %v2611_v41 }
 0x37e   : > { %v4271_v57 = vpop.eup %4270  ;;  %4282 = vpow2.f32 %v2613_v49 }
 0x37f   : > { %v4273_v56 = vpop.eup %4272  ;;  %v2619_v1 = vsel %vm2567_vm14, %v4271_v57, 0.0  ;;  %4284 = vpow2.f32 %v2615_v28 }
 0x380   : > { %v4275_v63 = vpop.eup %4274  ;;  %v2620_v8 = vsel %vm2567_vm14, %v4273_v56, 0.0  ;;  %4286 = vpow2.f32 %v2617_v47 }
 0x381   : > { %v4277_v43 = vpop.eup %4276  ;;  %v2621_v21 = vadd.f32 %v2620_v8, %v2619_v1  ;;  %v2622_v22 = vsel %vm2567_vm14, %v4275_v63, 0.0  ;;  %v4173_v8 = vld [vmem:[%s5397_s11 + $0x2c] sm:$0xf0] }
 0x382   : > { %v4279_v5 = vpop.eup %4278  ;;  %v2624_v26 = vsel %vm2567_vm14, %v4277_v43, 0.0 }
 0x383   : > { %v2623_v52 = vadd.f32 %v2622_v22, %v2621_v21  ;;  %v4281_v27 = vpop.eup %4280  ;;  %v2626_v35 = vsel %vm2567_vm14, %v4279_v5, 0.0  ;;  %v4179_v22 = vld [vmem:[%s5397_s11 + $0x64] sm:$0xf] }
 0x384   : > { %v4283_v2 = vpop.eup %4282  ;;  %v2628_v38 = vsel %vm2567_vm14, %v4281_v27, 0.0 }
 0x385   : > { %v2625_v33 = vadd.f32 %v2624_v26, %v2623_v52  ;;  %v4285_v39 = vpop.eup %4284  ;;  %v2630_v44 = vsel %vm2567_vm14, %v4283_v2, 0.0 }
 0x386   : > { %v4287_v20 = vpop.eup %4286  ;;  %v2632_v46 = vsel %vm2567_vm14, %v4285_v39, 0.0 }
 0x387   : > { %v2627_v36 = vadd.f32 %v2626_v35, %v2625_v33  ;;  %v2634_v58 = vsel %vm2580_vm15, %v4287_v20, 0.0  ;;  %v4175_v35 = vld [vmem:[%s5397_s11 + $0x44] sm:$0xf] }
 0x389   : > { %v2629_v40 = vadd.f32 %v2628_v38, %v2627_v36 }
 0x38b   : > { %v2631_v7 = vadd.f32 %v2630_v44, %v2629_v40  ;;  %v4171_v44 = vld [vmem:[%s5397_s11 + $0x24] sm:$0xf] }
 0x38d   : > { %v2633_v4 = vadd.f32 %v2632_v46, %v2631_v7  ;;  %v4167_v7 = vld [vmem:[%s5397_s11 + $0x4] sm:$0xf] }
 0x38f   : > { %v2635_v15 = vadd.f32 %v2634_v58, %v2633_v4 }
 0x391   : > { %v2636_v48 = vrot.slane %v2635_v15, 4 }
 0x393   : > { %v2637_v51 = vadd.f32 %v2636_v48, %v2635_v15  ;;  %v3873_v15 = vld [vmem:[%s5397_s11 + $0x10] sm:$0xf0] }
 0x395   : > { %v2638_v54 = vrot.slane %v2637_v51, 2 }
 0x397   : > { %v2639_v19 = vadd.f32 %v2638_v54, %v2637_v51  ;;  %v3876_v54 = vor.u32 %v4167_v7, %v3873_v15  ;;  %v4211_v7 = vld [vmem:[%s5399_s13 + $0xe0] sm:$0xff]  ;;  %v4190_v15 = vld [vmem:[%s5399_s13 + $0x38] sm:$0xff] }
 0x399   : > { %v2640_v3 = vrot.slane %v2639_v19, 1 }
 0x39b   : > { %v2641_v42 = vadd.f32 %v2640_v3, %v2639_v19  ;;  %v3927_v19 = vld [vmem:[%s5397_s11 + $0x68] sm:$0xf]  ;;  %v4182_v3 = vld [vmem:[%s5397_s11 + $0x74] sm:$0xf0] }
 0x39d   : > { %4288 = vrcp.f32 %v2641_v42  ;;  %v3928_v42 = vor.u32 %v4182_v3, %v3927_v19  ;;  %v4202_v19 = vld [vmem:[%s5399_s13 + $0x98] sm:$0xff]  ;;  %v4189_v3 = vld [vmem:[%s5399_s13 + $0x30] sm:$0xff] }
 0x3a3   : > { %v4289_v25 = vpop.eup %4288 }
 0x3a4   : > { %v2645_v24 = vmul.f32 %v4289_v25, %v4275_v63  ;;  %v2644_v50 = vmul.f32 %v4289_v25, %v4273_v56  ;;  %v2643_v61 = vmul.f32 %v4289_v25, %v4271_v57  ;;  %v2646_v0 = vmul.f32 %v4289_v25, %v4277_v43  ;;  %v3903_v56 = vld [vmem:[%s5397_s11 + $0x40] sm:$0xf]  ;;  %v4177_v57 = vld [vmem:[%s5397_s11 + $0x4c] sm:$0xf0] }
 0x3a5   : > { %v2647_v41 = vmul.f32 %v4289_v25, %v4279_v5  ;;  %v2650_v9 = vmul.f32 %v4289_v25, %v4285_v39  ;;  %v2648_v49 = vmul.f32 %v4289_v25, %v4281_v27  ;;  %v2649_v53 = vmul.f32 %v4289_v25, %v4283_v2  ;;  %v3887_v63 = vld [vmem:[%s5397_s11 + $0x20] sm:$0xf]  ;;  %v3921_v5 = vld [vmem:[%s5397_s11 + $0x70] sm:$0xf0] }
 0x3a6   : > { %2664 = vperm.xlu2 %4265, %v2645_v24   ;;  %2659 = vperm.xlu1 %4264, %v2644_v50   ;;  %v2651_v28 = vmul.f32 %v4289_v25, %v4287_v20  ;;  %v3904_v1 = vor.u32 %v4177_v57, %v3903_v56  ;;  %v3888_v43 = vor.u32 %v4173_v8, %v3887_v63  ;;  %v3905_v2 = vld [vmem:[%s5397_s11 + $0x50] sm:$0xf0]  ;;  %v4172_v57 = vld [vmem:[%s5397_s11 + $0x2c] sm:$0xf] }
 0x3a7   : > { %2654 = vperm.xlu0 %4263, %v2643_v61   ;;  %v3924_v52 = vor.u32 %v4179_v22, %v3921_v5  ;;  %v3908_v38 = vor.u32 %v4175_v35, %v3905_v2  ;;  %v3889_v20 = vld [vmem:[%s5397_s11 + $0x30] sm:$0xf0]  ;;  %v3932_v25 = vor.u32 %v4180_v32, %v3929_v45  ;;  %v3912_v61 = vor.u32 %v4178_v11, %v3911_v55  ;;  %v4187_v45 = vld [vmem:[%s5399_s13 + $0x20] sm:$0xff]  ;;  %v4198_v55 = vld [vmem:[%s5399_s13 + $0x78] sm:$0xff] }
 0x3a8   : > { %2845 = vmatpush.bf16.msrb.mxu3 %v3904_v1  ;;  %v3897_v1 = vld [vmem:[%s5397_s11 + $0x38] sm:$0xf0]  ;;  %v4209_v32 = vld [vmem:[%s5399_s13 + $0xd0] sm:$0xff] }
 0x3a9   : > { %2857 = vmatpush.bf16.msra.mxu1 %v3924_v52  ;;  %v3900_v5 = vor.u32 %v4172_v57, %v3897_v1  ;;  %v4186_v11 = vld [vmem:[%s5399_s13 + $0x18] sm:$0xff]  ;;  %v2747_v57 = vld [vmem:[%s5398_s12] sm:$0xf] }
 0x3aa   : > { %v2830_v1 = vperm.slane %v2747_v57, 1 }
 0x3ac   : > { %2846 = vmatpush.bf16.msrb.mxu3 %v3888_v43 }
 0x3ad   : > { %2858 = vmatpush.bf16.msra.mxu1 %v3908_v38 }
 0x3ae   : > { %2669 = vperm.xlu2 %4265, %v2646_v0   ;;  %2674 = vperm.xlu1 %4264, %v2647_v41   ;;  %v3895_v41 = vld [vmem:[%s5397_s11 + $0x28] sm:$0xf] }
 0x3af   : > { %2689 = vperm.xlu0 %4263, %v2650_v9   ;;  %v4174_v9 = vld [vmem:[%s5397_s11 + $0x34] sm:$0xf0] }
 0x3b0   : > { %v3896_v63 = vor.u32 %v4174_v9, %v3895_v41  ;;  %v4208_v41 = vld [vmem:[%s5399_s13 + $0xc8] sm:$0xff] }
 0x3b1   : > { %v4184_v9 = vld [vmem:[%s5399_s13 + $0x8] sm:$0xff] }
 0x3b6   : > { %2679 = vperm.xlu2 %4265, %v2648_v49   ;;  %2684 = vperm.xlu1 %4264, %v2649_v53  }
 0x3be   : > { %2694 = vperm.xlu2 %4265, %v2651_v28  }
 0x400   : > { %v2665_v47 = vpop.permute.xlu2 %2664 }
 0x401   : > { %v2699_v39 = vmul.f32 %v2665_v47, %v2379_v10  ;;  %v3892_v10 = vor.u32 %v4171_v44, %v3889_v20 }
 0x403   : > { %v2709_v46 = vsel %vm1367_vm4, %v2699_v39, 0.0  ;;  %2859 = vmatpush.bf16.msra.mxu1 %v3892_v10  ;;  %v4214_v39 = vld [vmem:[%s5399_s13 + $0xf8] sm:$0xff] }
 0x404   : > { %3212 = vmatpush.bf16.msra.mxu2 %v4214_v39 }
 0x407   : > { %2860 = vmatpush.bf16.msra.mxu1 %v3876_v54  ;;  %v4210_v54 = vld [vmem:[%s5399_s13 + $0xd8] sm:$0xff] }
 0x408   : > { %v2670_v21 = vpop.permute.xlu2 %2669 }
 0x409   : > { %v2700_v4 = vmul.f32 %v2670_v21, %v2380_v12 }
 0x40b   : > { %v2711_v24 = vsel %vm1367_vm4, %v2700_v4, 0.0  ;;  %2883 = vmatpush.bf16.msrb.mxu1 %v3932_v25  ;;  %v2964_v4 = vld [vmem:[%s5400_s14] sm:$0xf]  ;;  %v4197_v25 = vld [vmem:[%s5399_s13 + $0x70] sm:$0xff] }
 0x410   : > { %v2680_v60 = vpop.permute.xlu2 %2679 }
 0x411   : > { %v2702_v49 = vmul.f32 %v2680_v60, %v2382_v17  ;;  %v4170_v17 = vld [vmem:[%s5397_s11 + $0x14] sm:$0xf0]  ;;  %v4212_v60 = vld [vmem:[%s5399_s13 + $0xe8] sm:$0xff] }
 0x412   : > { %v3880_v29 = vor.u32 %v4170_v17, %v3879_v14  ;;  %v2829_v14 = vperm.slane %v2747_v57, 0 }
 0x413   : > { %v2715_v47 = vsel %vm1367_vm4, %v2702_v49, 0.0  ;;  %v4200_v49 = vld [vmem:[%s5399_s13 + $0x88] sm:$0xff] }
 0x418   : > { %v2660_v26 = vpop.permute.xlu1 %2659  ;;  %v2695_v8 = vpop.permute.xlu2 %2694 }
 0x419   : > { %v2698_v27 = vmul.f32 %v2660_v26, %v2378_v37  ;;  %v2655_v33 = vpop.permute.xlu0 %2654  ;;  %v4168_v26 = vld [vmem:[%s5397_s11 + $0xc] sm:$0xf] }
 0x41a   : > { %v2697_v36 = vmul.f32 %v2655_v33, %v2377_v34  ;;  %v3871_v34 = vld [vmem:[%s5397_s11] sm:$0xf]  ;;  %v2705_v33 = vmul.f32 %v2695_v8, %v5061_v59  ;;  %v4206_v59 = vld [vmem:[%s5399_s13 + $0xb8] sm:$0xff] }
 0x41b   : > { %v2707_v40 = vsel %vm1367_vm4, %v2698_v27, 0.0  ;;  %v3872_v58 = vor.u32 %v4169_v6, %v3871_v34  ;;  %v3881_v27 = vld [vmem:[%s5397_s11 + $0x18] sm:$0xf0]  ;;  %3199 = vmatpush.bf16.msra.mxu0 %v4206_v59  ;;  %v4204_v34 = vld [vmem:[%s5399_s13 + $0xa8] sm:$0xff] }
 0x41c   : > { %v2706_v62 = vsel %vm1367_vm4, %v2697_v36, 0.0  ;;  %v2722_v36 = vsel %vm2721_vm0, %v2705_v33, 0.0 }
 0x41d   : > { %v2708_v37 = vadd.f32 %v2707_v40, %v2706_v62  ;;  %2847 = vmatpush.bf16.msrb.mxu3 %v3872_v58  ;;  %v4213_v62 = vld [vmem:[%s5399_s13 + $0xf0] sm:$0xff] }
 0x41e   : > { %3213 = vmatpush.bf16.msra.mxu2 %v4213_v62 }
 0x41f   : > { %v2710_v48 = vadd.f32 %v2709_v46, %v2708_v37  ;;  %v4205_v37 = vld [vmem:[%s5399_s13 + $0xb0] sm:$0xff]  ;;  %v4203_v46 = vld [vmem:[%s5399_s13 + $0xa0] sm:$0xff] }
 0x420   : > { %v2675_v51 = vpop.permute.xlu1 %2674  ;;  %3200 = vmatpush.bf16.msra.mxu0 %v4205_v37 }
 0x421   : > { %v2701_v12 = vmul.f32 %v2675_v51, %v2381_v16  ;;  %v3913_v16 = vld [vmem:[%s5397_s11 + $0x58] sm:$0xf0]  ;;  %2870 = vmatpush.bf16.msra.mxu3 %v3928_v42  ;;  %v2712_v0 = vadd.f32 %v2711_v24, %v2710_v48  ;;  %v2690_v56 = vpop.permute.xlu0 %2689  ;;  %v2966_v51 = vsel %vm2404_vm11, %v2964_v4, 0  ;;  %v4201_v42 = vld [vmem:[%s5399_s13 + $0x90] sm:$0xff]  ;;  %v3225_v4 = vld [vmem:[%s5425_s29] sm:$0x1] }
 0x422   : > { %v3916_v53 = vor.u32 %v4176_v13, %v3913_v16  ;;  %v2704_v21 = vmul.f32 %v2690_v56, %v2384_v31  ;;  %v3884_v31 = vor.u32 %v4168_v26, %v3881_v27  ;;  %3214 = vmatpush.bf16.msra.mxu2 %v4212_v60  ;;  %v4196_v13 = vld [vmem:[%s5399_s13 + $0x68] sm:$0xff]  ;;  %v4195_v16 = vld [vmem:[%s5399_s13 + $0x60] sm:$0xff]  ;;  %v4194_v24 = vld [vmem:[%s5399_s13 + $0x58] sm:$0xff]  ;;  %v2832_v26 = vperm.slane %v2747_v57, 3 }
 0x423   : > { %v2713_v50 = vsel %vm1367_vm4, %v2701_v12, 0.0  ;;  %v4188_v12 = vld [vmem:[%s5399_s13 + $0x28] sm:$0xff]  ;;  %v4199_v56 = vld [vmem:[%s5399_s13 + $0x80] sm:$0xff] }
 0x424   : > { %v2714_v28 = vadd.f32 %v2713_v50, %v2712_v0  ;;  %2884 = vmatpush.bf16.msrb.mxu1 %v3916_v53  ;;  %3201 = vmatpush.bf16.msra.mxu0 %v4204_v34  ;;  %v4193_v50 = vld [vmem:[%s5399_s13 + $0x50] sm:$0xff]  ;;  %v4183_v53 = vld [vmem:[%s5399_s13] sm:$0xff] }
 0x425   : > { %2871 = vmatpush.bf16.msra.mxu3 %v3912_v61  ;;  %v4192_v61 = vld [vmem:[%s5399_s13 + $0x48] sm:$0xff]  ;;  %v4185_v0 = vld [vmem:[%s5399_s13 + $0x10] sm:$0xff] }
 0x426   : > { %v2716_v52 = vadd.f32 %v2715_v47, %v2714_v28  ;;  %3215 = vmatpush.bf16.msra.mxu2 %v4211_v7  ;;  %v4207_v28 = vld [vmem:[%s5399_s13 + $0xc0] sm:$0xff] }
 0x428   : > { %v2685_v43 = vpop.permute.xlu1 %2684  ;;  %2885 = vmatpush.bf16.msrb.mxu1 %v3900_v5  ;;  %3202 = vmatpush.bf16.msra.mxu0 %v4203_v46 }
 0x429   : > { %v2703_v22 = vmul.f32 %v2685_v43, %v2383_v30  ;;  %2872 = vmatpush.bf16.msra.mxu3 %v3896_v63  ;;  %v2719_v30 = vsel %vm1367_vm4, %v2704_v21, 0.0 }
 0x42a   : > { %3216 = vmatpush.bf16.msra.mxu2 %v4210_v54 }
 0x42b   : > { %v2717_v35 = vsel %vm1367_vm4, %v2703_v22, 0.0 }
 0x42c   : > { %v2718_v23 = vadd.f32 %v2717_v35, %v2716_v52  ;;  %2886 = vmatpush.bf16.msrb.mxu1 %v3884_v31  ;;  %3203 = vmatpush.bf16.msra.mxu0 %v4202_v19 }
 0x42d   : > { %2873 = vmatpush.bf16.msra.mxu3 %v3880_v29 }
 0x42e   : > { %v2720_v2 = vadd.f32 %v2719_v30, %v2718_v23  ;;  %3217 = vmatpush.bf16.msra.mxu2 %v4209_v32  ;;  %v2831_v23 = vperm.slane %v2747_v57, 2 }
 0x430   : > { %v2723_v38 = vadd.f32 %v2722_v36, %v2720_v2  ;;  %3204 = vmatpush.bf16.msra.mxu0 %v4201_v42 }
 0x432   : > { %v2724_v40 = vrot.slane %v2723_v38, 4  ;;  %3218 = vmatpush.bf16.msra.mxu2 %v4208_v41 }
 0x434   : > { %v2725_v44 = vadd.f32 %v2724_v40, %v2723_v38  ;;  %3205 = vmatpush.bf16.msra.mxu0 %v4200_v49 }
 0x436   : > { %v2726_v20 = vrot.slane %v2725_v44, 2  ;;  %3219 = vmatpush.bf16.msra.mxu2 %v4207_v28 }
 0x438   : > { %v2727_v6 = vadd.f32 %v2726_v20, %v2725_v44  ;;  %3206 = vmatpush.bf16.msra.mxu0 %v4199_v56 }
 0x43a   : > { %v2728_v10 = vrot.slane %v2727_v6, 1 }
 0x43c   : > { %v2729_v58 = vadd.f32 %v2728_v10, %v2727_v6 }
 0x43e   : > { %v2730_v48 = vpack.c.bf16 %v2729_v58, %v2729_v58 }
 0x440   : > { %3933 = vmatmul.msk.bf16.vlgmr.msrb.gmra.mxu3 %vm1367_vm4, %v2730_v48  ;;  %3934 = vmatmul.msk.bf16.vlgmr.msra.gmra.mxu1 %vm1367_vm4, %v2730_v48 }
 0x441   : > { %2975 = vmatpush.bf16.msrb.mxu3 %v2966_v51  ;;  %3173 = vmatpush.bf16.msra.mxu1 %v4190_v15 }
 0x445   : > { %3174 = vmatpush.bf16.msra.mxu1 %v4189_v3 }
 0x449   : > { %3175 = vmatpush.bf16.msra.mxu1 %v4188_v12 }
 0x44d   : > { %3176 = vmatpush.bf16.msra.mxu1 %v4187_v45 }
 0x450   : > { %3935 = vmatmul.msk.bf16.vlgmr.msra.gmra.mxu3 %vm1367_vm4, %v2730_v48  ;;  %3936 = vmatmul.msk.bf16.vlgmr.msrb.gmra.mxu1 %vm1367_vm4, %v2730_v48 }
 0x451   : > { %3186 = vmatpush.bf16.msra.mxu3 %v4198_v55  ;;  %3177 = vmatpush.bf16.msra.mxu1 %v4186_v11 }
 0x455   : > { %3187 = vmatpush.bf16.msra.mxu3 %v4197_v25  ;;  %3178 = vmatpush.bf16.msra.mxu1 %v4185_v0 }
 0x459   : > { %3188 = vmatpush.bf16.msra.mxu3 %v4196_v13  ;;  %3179 = vmatpush.bf16.msra.mxu1 %v4184_v9 }
 0x45d   : > { %3189 = vmatpush.bf16.msra.mxu3 %v4195_v16  ;;  %3180 = vmatpush.bf16.msra.mxu1 %v4183_v53 }
 0x460   : > { %3937 = vmatmul.msk.bf16.vlgmr.msrb.gmra.mxu3 %vm2400_vm12, %v5007_v18  ;;  %v4191_v18 = vld [vmem:[%s5399_s13 + $0x40] sm:$0xff] }
 0x461   : > { %3190 = vmatpush.bf16.msra.mxu3 %v4194_v24 }
 0x465   : > { %3191 = vmatpush.bf16.msra.mxu3 %v4193_v50 }
 0x469   : > { %3192 = vmatpush.bf16.msra.mxu3 %v4192_v61 }
 0x46d   : > { %3193 = vmatpush.bf16.msra.mxu3 %v4191_v18 }
 0x4bd   : > { %v2862_v63 = vpop.f32.mrf.mxu1 }
 0x4be   : > { %v2863_v8 = vadd.f32 %v2862_v63, %v2830_v1 }
 0x4c0   : > { %v2893_v43 = vmax.f32 %v2863_v8, 0.0 }
 0x4c2   : > { %v2897_v17 = vpack.c.bf16 %v2893_v43, %v2893_v43 }
 0x4c3   : > { %v2849_v47 = vpop.f32.mrf.mxu3 }
 0x4c4   : > { %v2850_v21 = vadd.f32 %v2849_v47, %v2829_v14  ;;  %3194 = vmatmul.bf16.vlgmr.msra.gmra.mxu3 %v2897_v17 }
 0x4c5   : > { %v2864_v22 = vpop.f32.mrf.mxu1 }
 0x4c6   : > { %v2892_v5 = vmax.f32 %v2850_v21, 0.0 }
 0x4c8   : > { %v2896_v52 = vpack.c.bf16 %v2892_v5, %v2892_v5 }
 0x4ca   : > { %3181 = vmatmul.bf16.vlgmr.msra.gmra.mxu1 %v2896_v52 }
 0x4cb   : > { %v2851_v27 = vpop.f32.mrf.mxu3 }
 0x4cd   : > { %v2888_v33 = vpop.f32.mrf.mxu1 }
 0x4ce   : > { %v2889_v35 = vadd.f32 %v2888_v33, %v2832_v26 }
 0x4d0   : > { %v2895_v29 = vmax.f32 %v2889_v35, 0.0 }
 0x4d2   : > { %v2899_v30 = vpack.c.bf16 %v2895_v29, %v2895_v29 }
 0x4d3   : > { %v2875_v31 = vpop.f32.mrf.mxu3 }
 0x4d4   : > { %v2876_v2 = vadd.f32 %v2875_v31, %v2831_v23  ;;  %3220 = vmatmul.bf16.vlgmr.msra.gmra.mxu2 %v2899_v30 }
 0x4d5   : > { %v2890_v36 = vpop.f32.mrf.mxu1 }
 0x4d6   : > { %v2894_v38 = vmax.f32 %v2876_v2, 0.0 }
 0x4d8   : > { %v2898_v39 = vpack.c.bf16 %v2894_v38, %v2894_v38 }
 0x4da   : > { %3207 = vmatmul.bf16.vlgmr.msra.gmra.mxu0 %v2898_v39 }
 0x4db   : > { %v2877_v59 = vpop.f32.mrf.mxu3 }
 0x4e3   : > { %v2977_v40 = vpop.f32.mrf.mxu3 }
 0x4eb   : > { %v2979_v62 = vpop.f32.mrf.mxu3 }
 0x547   : > { %v3182_v37 = vpop.f32.mrf.mxu1  ;;  %v3195_v44 = vpop.f32.mrf.mxu3 }
 0x548   : > { %v3183_v34 = vadd.f32 %v3182_v37, %v2977_v40 }
 0x54a   : > { %v3196_v6 = vadd.f32 %v3195_v44, %v3183_v34 }
 0x54f   : > { %v3184_v20 = vpop.f32.mrf.mxu1  ;;  %v3197_v60 = vpop.f32.mrf.mxu3 }
 0x557   : > { %v3208_v10 = vpop.f32.mrf.mxu0  ;;  %v3221_v7 = vpop.f32.mrf.mxu2 }
 0x558   : > { %v3209_v46 = vadd.f32 %v3208_v10, %v3196_v6 }
 0x55a   : > { %v3222_v58 = vadd.f32 %v3221_v7, %v3209_v46 }
 0x55c   : > { %v3226_v15 = vadd.f32 %v3225_v4, %v3222_v58 }
 0x55e   : > { %3227 = vst [vmem:[%s524_s26] sm:$0x1] %v3226_v15 }
 0x55f   : > { %v3210_v48 = vpop.f32.mrf.mxu0  ;;  %v3223_v51 = vpop.f32.mrf.mxu2 }
 0x560   : > { %4317 = shalt.err (!%p4314_p3)
}
 0x561   : > { %4223 = dma.vmem_to_hbm [thread:$0]  (%p4478_p5), %s3240_s28, 16, %s3242_s23, %s3229_s30  }
 0x562 PF: > { %s5427_s18 = sld [smem:[#allocation8_spill]] }
 0x563   : > { %s5428_s0 = sld [smem:[#allocation6_spill]] }
 0x568   : > { %p4229_p4 = scmp.ge.s32.totalorder %s5427_s18, 2 }
 0x569   : > { %s3253_s26 = sand.u32 1, %s5428_s0  }
 0x56a   : > { %p4226_p7 = pnand %p4229_p4, %p4482_p6  ;;  %s3254_s27 = scalar_lea.sflag [#allocation4], %s3253_s26 }
 0x56c   : > { %p4227_p8 = pneg %p4226_p7 }
 0x56e   : > { %4335 = dma.done.wait (%p4227_p8), %s3254_s27, 16  }
 0x56f   : > { %4337 = vsyncadd (%p4227_p8), %s3254_s27, 4294967280  ;;  %s5430_s24 = sld [smem:[#allocation9_spill]]  ;;  %s5433_s21 = smov %s4344_s22 }
 0x570   : > { %s5431_s25 = sld [smem:[#allocation7_spill]] }
 0x571   : > { %s5432_s23 = sld [smem:[#allocation10_spill]] }
 0x575   : > { %p26_p9 = scmp.ge.s32.totalorder %s5430_s24, 4  }
 0x576   : > { %s5434_s22 = smov %s5431_s25 }
 0x577   :  { %28 = sbr.rel (!%p26_p9) target bundleno = 6 (0x6), region = 133 }
 0x57c   :  { %3259 = vsyncpa [#allocation4], 1 }
 0x57d   :  { %3261 = vsyncpa [#allocation4 + $0x1], 1 }

</bundles_post_ra>
